<compile_context>
chip_gen: v6e
topology: v6e:2x2x1
jax: 0.10.0
libtpu: 0.0.40
codegen_flags: <defaults>
</compile_context>

<pallas_src>
import math

import jax
import jax.numpy as jnp
from jax import lax
from jax.experimental import pallas as pl
from jax.experimental.pallas import tpu as pltpu

BN_EPS = 1e-5
LANE = 128


def _round_up(x, m):
    return ((x + m - 1) // m) * m


# --------------------------- fused block kernel ------------------------------
def _make_block_kernel(k2, H1, W1, pad2, H2, W2):
    """Whole BottleNet block for one batch element.

    Refs (per grid step):
      xcol_ref : (M1, K1P)          bf16  packed im2col of x (conv1 + residual)
      w1_ref   : (K1P, C1P)         bf16  conv1 weight, taps packed, BN1 folded
      b1_ref   : (1, C1P)           f32   folded BN1 bias
      wr_ref   : (K1P, C2P)         bf16  residual weight (identity / downsample)
      br_ref   : (1, C2P)           f32   residual bias
      w2_ref   : (k2*k2, C1P, C2P)  bf16  conv2 weight per tap, BN2 folded
      b2_ref   : (1, C2P)           f32
      o_ref    : (M2, C2P)          bf16
    Scratch:
      y1pad_ref: (H1+2p2, W1+2p2, C1P) bf16  conv1 output with conv2 halo
      ysh_ref  : (k2, H1+2p2, W2, C1P) bf16  W-shifted copies (k relayouts)
      acc2_ref : (M2, C2P) f32              conv2 accumulator (seeded w/ residual)
    """
    M2 = H2 * W2

    def kernel(xcol_ref, w1_ref, b1_ref, wr_ref, br_ref, w2_ref, b2_ref,
               o_ref, y1pad_ref, ysh_ref, acc2_ref):
        C1P = w1_ref.shape[-1]
        xcol = xcol_ref[...]

        # residual branch first: result lives in the VMEM accumulator, not vregs.
        acc2_ref[...] = (jnp.dot(xcol, wr_ref[...],
                                 preferred_element_type=jnp.float32)
                         + br_ref[...])

        # conv1 + folded BN1 + ReLU: a single packed MXU matmul.
        acc1 = jnp.dot(xcol, w1_ref[...], preferred_element_type=jnp.float32)
        y1 = jnp.maximum(acc1 + b1_ref[...], 0.0).astype(jnp.bfloat16)

        # place y1 inside the zero halo needed by conv2 (border stays zero).
        y1pad_ref[...] = jnp.zeros_like(y1pad_ref)
        y1pad_ref[pl.ds(pad2, H1), pl.ds(pad2, W1), :] = y1.reshape(H1, W1, C1P)

        # pre-materialize the k2 W-shifted views once (k relayouts, not k*k).
        for dj in range(k2):
            ysh_ref[dj] = y1pad_ref[:, pl.ds(dj, W2), :]

        # conv2: k2*k2 MXU matmuls accumulated into the f32 VMEM scratch.
        for di in range(k2):
            for dj in range(k2):
                patch = ysh_ref[dj, pl.ds(di, H2), :, :].reshape(M2, C1P)
                acc2_ref[...] += jnp.dot(patch, w2_ref[di * k2 + dj],
                                         preferred_element_type=jnp.float32)

        # folded BN2 bias + residual (already in acc) + ReLU; lane-dense bf16 store.
        o_ref[...] = jnp.maximum(acc2_ref[...] + b2_ref[...], 0.0).astype(o_ref.dtype)

    return kernel


# --------------------------------- helpers ------------------------------------
def _im2col(x_nhwc, k, stride, pad):
    """Packed im2col: (N, Ho*Wo, k*k*C), tap-major (tap = di*k + dj) then channel."""
    N, H, W, C = x_nhwc.shape
    Ho = (H + 2 * pad - k) // stride + 1
    Wo = (W + 2 * pad - k) // stride + 1
    xp = jnp.pad(x_nhwc, ((0, 0), (pad, pad), (pad, pad), (0, 0)))
    cols = []
    for di in range(k):
        for dj in range(k):
            patch = xp[:, di:di + (Ho - 1) * stride + 1:stride,
                          dj:dj + (Wo - 1) * stride + 1:stride, :]
            cols.append(patch.reshape(N, Ho * Wo, C))
    return jnp.concatenate(cols, axis=-1), Ho, Wo


def _fold_bn(w, b, gamma, beta, mean, var):
    scale = gamma / jnp.sqrt(var + BN_EPS)
    return w * scale[:, None, None, None], (b - mean) * scale + beta


# ------------------------------- BottleNet ------------------------------------
class BottleNetPallas:
    def __init__(self, cfg1, cfg2, key):
        self.cfg1, self.cfg2 = cfg1, cfg2
        self.stride = cfg1[3]
        ks = jax.random.split(key, 8)

        def conv_init(k, cin, cout, ksz):
            k1, k2 = jax.random.split(k)
            bound = 1.0 / math.sqrt(cin * ksz * ksz)
            w = jax.random.uniform(k1, (cout, cin, ksz, ksz), jnp.float32, -bound, bound)
            b = jax.random.uniform(k2, (cout,), jnp.float32, -bound, bound)
            return w, b

        def bn_init(k, c):
            k1, k2, k3, k4 = jax.random.split(k, 4)
            gamma = jax.random.uniform(k1, (c,), jnp.float32, 0.5, 1.5)
            beta = jax.random.uniform(k2, (c,), jnp.float32, -0.2, 0.2)
            mean = jax.random.uniform(k3, (c,), jnp.float32, -0.1, 0.1)
            var = jax.random.uniform(k4, (c,), jnp.float32, 0.5, 1.5)
            return gamma, beta, mean, var

        self.w1, self.b1 = conv_init(ks[0], cfg1[0], cfg1[1], cfg1[2])
        self.bn1 = bn_init(ks[1], cfg1[1])
        self.w2, self.b2 = conv_init(ks[2], cfg2[0], cfg2[1], cfg2[2])
        self.bn2 = bn_init(ks[3], cfg2[1])
        if self.stride == 2:
            self.wd, self.bd = conv_init(ks[4], cfg1[0], cfg2[1], 1)
            self.bnd = bn_init(ks[5], cfg2[1])

    def __call__(self, x_nchw):
        c1, c2 = self.cfg1, self.cfg2
        N, Cin, H, W = x_nchw.shape
        k1, s1, p1 = c1[2], c1[3], c1[4]
        k2, s2, p2 = c2[2], c2[3], c2[4]
        C1, C2 = c1[1], c2[1]
        assert c1[0] == Cin and c2[0] == C1
        assert s2 == 1, "conv2 stride != 1 not supported in the fused kernel"
        assert p1 < k1

        C1P = _round_up(C1, LANE)
        C2P = _round_up(C2, LANE)

        # NCHW -> NHWC once, bf16, then packed im2col (taps into contraction axis).
        x_nhwc = jnp.transpose(x_nchw, (0, 2, 3, 1)).astype(jnp.bfloat16)
        xcol, H1, W1 = _im2col(x_nhwc, k1, s1, p1)
        K1 = k1 * k1 * Cin
        K1P = _round_up(K1, LANE)
        xcol = jnp.pad(xcol, ((0, 0), (0, 0), (0, K1P - K1)))

        H2 = (H1 + 2 * p2 - k2) + 1
        W2 = (W1 + 2 * p2 - k2) + 1
        M1, M2 = H1 * W1, H2 * W2
        assert M1 == M2, "residual grid must match conv2 output grid"

        # conv1 weight: fold BN1 and pack taps into the contraction axis.
        w1f, b1f = _fold_bn(self.w1, self.b1, *self.bn1)
        w1p = jnp.transpose(w1f, (2, 3, 1, 0)).reshape(K1, C1)
        w1p = jnp.pad(w1p, ((0, K1P - K1), (0, C1P - C1))).astype(jnp.bfloat16)
        b1p = jnp.pad(b1f, (0, C1P - C1)).reshape(1, C1P).astype(jnp.float32)

        # conv2 weight: fold BN2, per-tap (C1P, C2P) slabs.
        w2f, b2f = _fold_bn(self.w2, self.b2, *self.bn2)
        w2p = jnp.transpose(w2f, (2, 3, 1, 0)).reshape(k2 * k2, C1, C2)
        w2p = jnp.pad(w2p, ((0, 0), (0, C1P - C1), (0, C2P - C2))).astype(jnp.bfloat16)
        b2p = jnp.pad(b2f, (0, C2P - C2)).reshape(1, C2P).astype(jnp.float32)

        # Residual branch reuses xcol: its sample point x[s*i, s*j] is exactly
        # conv1's centre tap (p1, p1), so it is one more matmul on the same input.
        tapc = p1 * k1 + p1
        if self.stride == 2:
            wdf, bdf = _fold_bn(self.wd, self.bd, *self.bnd)
            wr = jnp.zeros((K1, C2), jnp.float32)
            wr = wr.at[tapc * Cin:(tapc + 1) * Cin, :].set(wdf[:, :, 0, 0].T)
            brf = bdf
        else:
            assert Cin == C2, "identity residual requires Cin == conv2 out channels"
            assert H1 == H and W1 == W, "identity residual requires a 'same' conv1"
            wr = jnp.zeros((K1, C2), jnp.float32)
            wr = wr.at[tapc * Cin + jnp.arange(Cin), jnp.arange(Cin)].set(1.0)
            brf = jnp.zeros((C2,), jnp.float32)
        wrp = jnp.pad(wr, ((0, K1P - K1), (0, C2P - C2))).astype(jnp.bfloat16)
        brp = jnp.pad(brf, (0, C2P - C2)).reshape(1, C2P).astype(jnp.float32)

        H1p, W1p = H1 + 2 * p2, W1 + 2 * p2

        # Advisory cost estimate from TRUE (unpadded) channel counts.
        flops = (2 * N * M1 * K1 * C1
                 + 2 * N * M2 * (k2 * k2 * C1) * C2
                 + (2 * N * M2 * Cin * C2 if self.stride == 2 else N * M2 * C2))
        bytes_accessed = (xcol.size * 2 + w1p.size * 2 + wrp.size * 2 + w2p.size * 2
                          + b1p.size * 4 + brp.size * 4 + b2p.size * 4
                          + N * M2 * C2P * 2)

        out = pl.pallas_call(
            _make_block_kernel(k2, H1, W1, p2, H2, W2),
            out_shape=jax.ShapeDtypeStruct((N, M2, C2P), jnp.bfloat16),
            grid=(N,),
            in_specs=[
                pl.BlockSpec((None, M1, K1P), lambda n: (n, 0, 0)),
                pl.BlockSpec((K1P, C1P), lambda n: (0, 0)),
                pl.BlockSpec((1, C1P), lambda n: (0, 0)),
                pl.BlockSpec((K1P, C2P), lambda n: (0, 0)),
                pl.BlockSpec((1, C2P), lambda n: (0, 0)),
                pl.BlockSpec((k2 * k2, C1P, C2P), lambda n: (0, 0, 0)),
                pl.BlockSpec((1, C2P), lambda n: (0, 0)),
            ],
            out_specs=pl.BlockSpec((None, M2, C2P), lambda n: (n, 0, 0)),
            scratch_shapes=[
                pltpu.VMEM((H1p, W1p, C1P), jnp.bfloat16),      # y1 + conv2 halo
                pltpu.VMEM((k2, H1p, W2, C1P), jnp.bfloat16),   # W-shifted copies
                pltpu.VMEM((M2, C2P), jnp.float32),             # conv2 accumulator
            ],
            compiler_params=pltpu.CompilerParams(
                dimension_semantics=("parallel",),      # batch steps -> 2 TCs on v7x
                vmem_limit_bytes=32 * 1024 * 1024),
            cost_estimate=pl.CostEstimate(flops=flops, transcendentals=0,
                                          bytes_accessed=bytes_accessed),
        )(xcol, w1p, b1p, wrp, brp, w2p, b2p)

        out = out.reshape(N, H2, W2, C2P)[..., :C2].astype(jnp.float32)
        return jnp.transpose(out, (0, 3, 1, 2))        # back to NCHW

    # pure-JAX reference mirroring the kernel's numerics policy (bf16 matmul
    # operands with BN folded into weights, f32 accumulation, bf16 VMEM storage
    # of y1 and bf16 output store) so the correctness check is tight.
    def reference(self, x):
        def conv_bn(xf, w, b, gamma, beta, mean, var, stride, pad):
            scale = gamma / jnp.sqrt(var + BN_EPS)
            wf = (w * scale[:, None, None, None]).astype(jnp.bfloat16)
            bias = (b - mean) * scale + beta
            y = lax.conv_general_dilated(
                xf.astype(jnp.bfloat16), wf, (stride, stride),
                ((pad, pad), (pad, pad)),
                dimension_numbers=("NCHW", "OIHW", "NCHW"),
                preferred_element_type=jnp.float32)
            return y + bias[None, :, None, None]

        c1, c2 = self.cfg1, self.cfg2
        y1 = jax.nn.relu(conv_bn(x, self.w1, self.b1, *self.bn1, c1[3], c1[4]))
        y1 = y1.astype(jnp.bfloat16).astype(jnp.float32)   # bf16 VMEM intermediate
        net = conv_bn(y1, self.w2, self.b2, *self.bn2, c2[3], c2[4])
        if self.stride == 2:
            identity = conv_bn(x, self.wd, self.bd, *self.bnd, 2, 0)
        else:
            identity = x.astype(jnp.bfloat16).astype(jnp.float32)
        out = jax.nn.relu(identity + net)
        return out.astype(jnp.bfloat16).astype(jnp.float32)  # bf16 output store


# ---------------------------------- main --------------------------------------
if __name__ == "__main__":
    key = jax.random.PRNGKey(0)
    kx, kp1, kp2 = jax.random.split(key, 3)
    x = jax.random.normal(kx, (2, 4, 16, 16), jnp.float32)

    # stride-1 block (identity residual)
    model1 = BottleNetPallas(cfg1=[4, 8, 3, 1, 1], cfg2=[8, 4, 3, 1, 1], key=kp1)
    out1 = jax.block_until_ready(jax.jit(model1.__call__)(x))
    ref1 = model1.reference(x)
    assert out1.shape == (2, 4, 16, 16)
    assert jnp.allclose(out1, ref1, rtol=1e-2, atol=1e-2), \
        float(jnp.max(jnp.abs(out1 - ref1)))

    # stride-2 block (downsample residual branch)
    model2 = BottleNetPallas(cfg1=[4, 8, 3, 2, 1], cfg2=[8, 16, 3, 1, 1], key=kp2)
    out2 = jax.block_until_ready(jax.jit(model2.__call__)(x))
    ref2 = model2.reference(x)
    assert out2.shape == (2, 16, 8, 8)
    assert jnp.allclose(out2, ref2, rtol=1e-2, atol=1e-2), \
        float(jnp.max(jnp.abs(out2 - ref2)))

    print("KERNEL_OK")
</pallas_src>

<mosaic_0001>
module attributes {stable_mosaic.version = 11 : i64} {
  func.func @kernel(%arg0: i32, %arg1: memref<1x256x128xbf16, #tpu.memory_space<vmem>>, %arg2: memref<128x128xbf16, #tpu.memory_space<vmem>>, %arg3: memref<1x128xf32, #tpu.memory_space<vmem>>, %arg4: memref<128x128xbf16, #tpu.memory_space<vmem>>, %arg5: memref<1x128xf32, #tpu.memory_space<vmem>>, %arg6: memref<9x128x128xbf16, #tpu.memory_space<vmem>>, %arg7: memref<1x128xf32, #tpu.memory_space<vmem>>, %arg8: memref<1x256x128xbf16, #tpu.memory_space<vmem>>, %arg9: memref<18x18x128xbf16, #tpu.memory_space<vmem>>, %arg10: memref<3x18x16x128xbf16, #tpu.memory_space<vmem>>, %arg11: memref<256x128xf32, #tpu.memory_space<vmem>>) attributes {dimension_semantics = [#tpu.dimension_semantics<parallel>], iteration_bounds = array<i64: 2>, scalar_prefetch = 0 : i64, scratch_operands = 3 : i64, tpu.core_type = #tpu.core_type<tc>, window_params = [{transform_indices = @transform_0, window_bounds = array<i64: 1, 256, 128>}, {pipeline_mode = #tpu.pipeline_mode<synchronous>, transform_indices = @transform_1, window_bounds = array<i64: 128, 128>}, {pipeline_mode = #tpu.pipeline_mode<synchronous>, transform_indices = @transform_2, window_bounds = array<i64: 1, 128>}, {pipeline_mode = #tpu.pipeline_mode<synchronous>, transform_indices = @transform_3, window_bounds = array<i64: 128, 128>}, {pipeline_mode = #tpu.pipeline_mode<synchronous>, transform_indices = @transform_4, window_bounds = array<i64: 1, 128>}, {pipeline_mode = #tpu.pipeline_mode<synchronous>, transform_indices = @transform_5, window_bounds = array<i64: 9, 128, 128>}, {pipeline_mode = #tpu.pipeline_mode<synchronous>, transform_indices = @transform_6, window_bounds = array<i64: 1, 128>}, {transform_indices = @transform_7, window_bounds = array<i64: 1, 256, 128>}]} {
    %c0 = arith.constant 0 : index
    %c0_0 = arith.constant 0 : index
    %c0_1 = arith.constant 0 : index
    %0 = vector.load %arg1[%c0, %c0_0, %c0_1] : memref<1x256x128xbf16, #tpu.memory_space<vmem>>, vector<1x256x128xbf16>
    %1 = vector.shape_cast %0 : vector<1x256x128xbf16> to vector<256x128xbf16>
    %c0_2 = arith.constant 0 : index
    %c0_3 = arith.constant 0 : index
    %2 = vector.load %arg4[%c0_2, %c0_3] : memref<128x128xbf16, #tpu.memory_space<vmem>>, vector<128x128xbf16>
    %cst = arith.constant dense<0.000000e+00> : vector<256x128xf32>
    %3 = tpu.matmul %1, %2, %cst {dimension_numbers = #tpu.dot_dimension_numbers<[1], [0], [0], [1], [0, 0, 1, 1], [], []>} : vector<256x128xbf16>, vector<128x128xbf16>, vector<256x128xf32> -> vector<256x128xf32>
    %c0_4 = arith.constant 0 : index
    %c0_5 = arith.constant 0 : index
    %4 = vector.load %arg5[%c0_4, %c0_5] : memref<1x128xf32, #tpu.memory_space<vmem>>, vector<1x128xf32>
    %5 = vector.broadcast %4 : vector<1x128xf32> to vector<256x128xf32>
    %6 = arith.addf %3, %5 : vector<256x128xf32>
    %c0_6 = arith.constant 0 : index
    %c0_7 = arith.constant 0 : index
    %7 = vector.load %arg11[%c0_6, %c0_7] : memref<256x128xf32, #tpu.memory_space<vmem>>, vector<256x128xf32>
    tpu.vector_store %arg11[%c0_6, %c0_7], %6 {strides = array<i32>} : memref<256x128xf32, #tpu.memory_space<vmem>>, vector<256x128xf32>,
    %c0_8 = arith.constant 0 : index
    %c0_9 = arith.constant 0 : index
    %8 = vector.load %arg2[%c0_8, %c0_9] : memref<128x128xbf16, #tpu.memory_space<vmem>>, vector<128x128xbf16>
    %cst_10 = arith.constant dense<0.000000e+00> : vector<256x128xf32>
    %9 = tpu.matmul %1, %8, %cst_10 {dimension_numbers = #tpu.dot_dimension_numbers<[1], [0], [0], [1], [0, 0, 1, 1], [], []>} : vector<256x128xbf16>, vector<128x128xbf16>, vector<256x128xf32> -> vector<256x128xf32>
    %c0_11 = arith.constant 0 : index
    %c0_12 = arith.constant 0 : index
    %10 = vector.load %arg3[%c0_11, %c0_12] : memref<1x128xf32, #tpu.memory_space<vmem>>, vector<1x128xf32>
    %11 = vector.broadcast %10 : vector<1x128xf32> to vector<256x128xf32>
    %12 = arith.addf %9, %11 : vector<256x128xf32>
    %cst_13 = arith.constant 0.000000e+00 : f32
    %13 = vector.broadcast %cst_13 : f32 to vector<256x128xf32>
    %14 = arith.maximumf %12, %13 : vector<256x128xf32>
    %15 = arith.truncf %14 : vector<256x128xf32> to vector<256x128xbf16>
    %cst_14 = arith.constant 0.000000e+00 : bf16
    %16 = vector.broadcast %cst_14 : bf16 to vector<18x18x128xbf16>
    %c0_15 = arith.constant 0 : index
    %c0_16 = arith.constant 0 : index
    %c0_17 = arith.constant 0 : index
    %17 = vector.load %arg9[%c0_15, %c0_16, %c0_17] : memref<18x18x128xbf16, #tpu.memory_space<vmem>>, vector<18x18x128xbf16>
    tpu.vector_store %arg9[%c0_15, %c0_16, %c0_17], %16 {strides = array<i32>} : memref<18x18x128xbf16, #tpu.memory_space<vmem>>, vector<18x18x128xbf16>,
    %18 = vector.shape_cast %15 : vector<256x128xbf16> to vector<16x16x128xbf16>
    %c1 = arith.constant 1 : index
    %c1_18 = arith.constant 1 : index
    %c0_19 = arith.constant 0 : index
    %19 = vector.load %arg9[%c1, %c1_18, %c0_19] : memref<18x18x128xbf16, #tpu.memory_space<vmem>>, vector<16x16x128xbf16>
    tpu.vector_store %arg9[%c1, %c1_18, %c0_19], %18 {strides = array<i32>} : memref<18x18x128xbf16, #tpu.memory_space<vmem>>, vector<16x16x128xbf16>,
    %c0_20 = arith.constant 0 : index
    %c0_21 = arith.constant 0 : index
    %c0_22 = arith.constant 0 : index
    %20 = vector.load %arg9[%c0_20, %c0_21, %c0_22] : memref<18x18x128xbf16, #tpu.memory_space<vmem>>, vector<18x16x128xbf16>
    %c0_23 = arith.constant 0 : index
    %c0_24 = arith.constant 0 : index
    %c0_25 = arith.constant 0 : index
    %c0_26 = arith.constant 0 : index
    %21 = vector.load %arg10[%c0_23, %c0_24, %c0_25, %c0_26] : memref<3x18x16x128xbf16, #tpu.memory_space<vmem>>, vector<1x18x16x128xbf16>
    %22 = vector.shape_cast %21 : vector<1x18x16x128xbf16> to vector<18x16x128xbf16>
    %23 = vector.shape_cast %20 : vector<18x16x128xbf16> to vector<1x18x16x128xbf16>
    tpu.vector_store %arg10[%c0_23, %c0_24, %c0_25, %c0_26], %23 {strides = array<i32>} : memref<3x18x16x128xbf16, #tpu.memory_space<vmem>>, vector<1x18x16x128xbf16>,
    %c0_27 = arith.constant 0 : index
    %c1_28 = arith.constant 1 : index
    %c0_29 = arith.constant 0 : index
    %24 = vector.load %arg9[%c0_27, %c1_28, %c0_29] : memref<18x18x128xbf16, #tpu.memory_space<vmem>>, vector<18x16x128xbf16>
    %c1_30 = arith.constant 1 : index
    %c0_31 = arith.constant 0 : index
    %c0_32 = arith.constant 0 : index
    %c0_33 = arith.constant 0 : index
    %25 = vector.load %arg10[%c1_30, %c0_31, %c0_32, %c0_33] : memref<3x18x16x128xbf16, #tpu.memory_space<vmem>>, vector<1x18x16x128xbf16>
    %26 = vector.shape_cast %25 : vector<1x18x16x128xbf16> to vector<18x16x128xbf16>
    %27 = vector.shape_cast %24 : vector<18x16x128xbf16> to vector<1x18x16x128xbf16>
    tpu.vector_store %arg10[%c1_30, %c0_31, %c0_32, %c0_33], %27 {strides = array<i32>} : memref<3x18x16x128xbf16, #tpu.memory_space<vmem>>, vector<1x18x16x128xbf16>,
    %c0_34 = arith.constant 0 : index
    %c2 = arith.constant 2 : index
    %c0_35 = arith.constant 0 : index
    %28 = vector.load %arg9[%c0_34, %c2, %c0_35] : memref<18x18x128xbf16, #tpu.memory_space<vmem>>, vector<18x16x128xbf16>
    %c2_36 = arith.constant 2 : index
    %c0_37 = arith.constant 0 : index
    %c0_38 = arith.constant 0 : index
    %c0_39 = arith.constant 0 : index
    %29 = vector.load %arg10[%c2_36, %c0_37, %c0_38, %c0_39] : memref<3x18x16x128xbf16, #tpu.memory_space<vmem>>, vector<1x18x16x128xbf16>
    %30 = vector.shape_cast %29 : vector<1x18x16x128xbf16> to vector<18x16x128xbf16>
    %31 = vector.shape_cast %28 : vector<18x16x128xbf16> to vector<1x18x16x128xbf16>
    tpu.vector_store %arg10[%c2_36, %c0_37, %c0_38, %c0_39], %31 {strides = array<i32>} : memref<3x18x16x128xbf16, #tpu.memory_space<vmem>>, vector<1x18x16x128xbf16>,
    %c0_40 = arith.constant 0 : index
    %c0_41 = arith.constant 0 : index
    %c0_42 = arith.constant 0 : index
    %c0_43 = arith.constant 0 : index
    %32 = vector.load %arg10[%c0_40, %c0_41, %c0_42, %c0_43] : memref<3x18x16x128xbf16, #tpu.memory_space<vmem>>, vector<1x16x16x128xbf16>
    %33 = vector.shape_cast %32 : vector<1x16x16x128xbf16> to vector<16x16x128xbf16>
    %34 = vector.shape_cast %33 : vector<16x16x128xbf16> to vector<256x128xbf16>
    %c0_44 = arith.constant 0 : index
    %c0_45 = arith.constant 0 : index
    %35 = vector.load %arg11[%c0_44, %c0_45] : memref<256x128xf32, #tpu.memory_space<vmem>>, vector<256x128xf32>
    %c0_46 = arith.constant 0 : index
    %c0_47 = arith.constant 0 : index
    %c0_48 = arith.constant 0 : index
    %36 = vector.load %arg6[%c0_46, %c0_47, %c0_48] : memref<9x128x128xbf16, #tpu.memory_space<vmem>>, vector<1x128x128xbf16>
    %37 = vector.shape_cast %36 : vector<1x128x128xbf16> to vector<128x128xbf16>
    %cst_49 = arith.constant dense<0.000000e+00> : vector<256x128xf32>
    %38 = tpu.matmul %34, %37, %cst_49 {dimension_numbers = #tpu.dot_dimension_numbers<[1], [0], [0], [1], [0, 0, 1, 1], [], []>} : vector<256x128xbf16>, vector<128x128xbf16>, vector<256x128xf32> -> vector<256x128xf32>
    %39 = arith.addf %35, %38 : vector<256x128xf32>
    %c0_50 = arith.constant 0 : index
    %c0_51 = arith.constant 0 : index
    %40 = vector.load %arg11[%c0_50, %c0_51] : memref<256x128xf32, #tpu.memory_space<vmem>>, vector<256x128xf32>
    tpu.vector_store %arg11[%c0_50, %c0_51], %39 {strides = array<i32>} : memref<256x128xf32, #tpu.memory_space<vmem>>, vector<256x128xf32>,
    %c1_52 = arith.constant 1 : index
    %c0_53 = arith.constant 0 : index
    %c0_54 = arith.constant 0 : index
    %c0_55 = arith.constant 0 : index
    %41 = vector.load %arg10[%c1_52, %c0_53, %c0_54, %c0_55] : memref<3x18x16x128xbf16, #tpu.memory_space<vmem>>, vector<1x16x16x128xbf16>
    %42 = vector.shape_cast %41 : vector<1x16x16x128xbf16> to vector<16x16x128xbf16>
    %43 = vector.shape_cast %42 : vector<16x16x128xbf16> to vector<256x128xbf16>
    %c0_56 = arith.constant 0 : index
    %c0_57 = arith.constant 0 : index
    %44 = vector.load %arg11[%c0_56, %c0_57] : memref<256x128xf32, #tpu.memory_space<vmem>>, vector<256x128xf32>
    %c1_58 = arith.constant 1 : index
    %c0_59 = arith.constant 0 : index
    %c0_60 = arith.constant 0 : index
    %45 = vector.load %arg6[%c1_58, %c0_59, %c0_60] : memref<9x128x128xbf16, #tpu.memory_space<vmem>>, vector<1x128x128xbf16>
    %46 = vector.shape_cast %45 : vector<1x128x128xbf16> to vector<128x128xbf16>
    %cst_61 = arith.constant dense<0.000000e+00> : vector<256x128xf32>
    %47 = tpu.matmul %43, %46, %cst_61 {dimension_numbers = #tpu.dot_dimension_numbers<[1], [0], [0], [1], [0, 0, 1, 1], [], []>} : vector<256x128xbf16>, vector<128x128xbf16>, vector<256x128xf32> -> vector<256x128xf32>
    %48 = arith.addf %44, %47 : vector<256x128xf32>
    %c0_62 = arith.constant 0 : index
    %c0_63 = arith.constant 0 : index
    %49 = vector.load %arg11[%c0_62, %c0_63] : memref<256x128xf32, #tpu.memory_space<vmem>>, vector<256x128xf32>
    tpu.vector_store %arg11[%c0_62, %c0_63], %48 {strides = array<i32>} : memref<256x128xf32, #tpu.memory_space<vmem>>, vector<256x128xf32>,
    %c2_64 = arith.constant 2 : index
    %c0_65 = arith.constant 0 : index
    %c0_66 = arith.constant 0 : index
    %c0_67 = arith.constant 0 : index
    %50 = vector.load %arg10[%c2_64, %c0_65, %c0_66, %c0_67] : memref<3x18x16x128xbf16, #tpu.memory_space<vmem>>, vector<1x16x16x128xbf16>
    %51 = vector.shape_cast %50 : vector<1x16x16x128xbf16> to vector<16x16x128xbf16>
    %52 = vector.shape_cast %51 : vector<16x16x128xbf16> to vector<256x128xbf16>
    %c0_68 = arith.constant 0 : index
    %c0_69 = arith.constant 0 : index
    %53 = vector.load %arg11[%c0_68, %c0_69] : memref<256x128xf32, #tpu.memory_space<vmem>>, vector<256x128xf32>
    %c2_70 = arith.constant 2 : index
    %c0_71 = arith.constant 0 : index
    %c0_72 = arith.constant 0 : index
    %54 = vector.load %arg6[%c2_70, %c0_71, %c0_72] : memref<9x128x128xbf16, #tpu.memory_space<vmem>>, vector<1x128x128xbf16>
    %55 = vector.shape_cast %54 : vector<1x128x128xbf16> to vector<128x128xbf16>
    %cst_73 = arith.constant dense<0.000000e+00> : vector<256x128xf32>
    %56 = tpu.matmul %52, %55, %cst_73 {dimension_numbers = #tpu.dot_dimension_numbers<[1], [0], [0], [1], [0, 0, 1, 1], [], []>} : vector<256x128xbf16>, vector<128x128xbf16>, vector<256x128xf32> -> vector<256x128xf32>
    %57 = arith.addf %53, %56 : vector<256x128xf32>
    %c0_74 = arith.constant 0 : index
    %c0_75 = arith.constant 0 : index
    %58 = vector.load %arg11[%c0_74, %c0_75] : memref<256x128xf32, #tpu.memory_space<vmem>>, vector<256x128xf32>
    tpu.vector_store %arg11[%c0_74, %c0_75], %57 {strides = array<i32>} : memref<256x128xf32, #tpu.memory_space<vmem>>, vector<256x128xf32>,
    %c0_76 = arith.constant 0 : index
    %c1_77 = arith.constant 1 : index
    %c0_78 = arith.constant 0 : index
    %c0_79 = arith.constant 0 : index
    %59 = vector.load %arg10[%c0_76, %c1_77, %c0_78, %c0_79] : memref<3x18x16x128xbf16, #tpu.memory_space<vmem>>, vector<1x16x16x128xbf16>
    %60 = vector.shape_cast %59 : vector<1x16x16x128xbf16> to vector<16x16x128xbf16>
    %61 = vector.shape_cast %60 : vector<16x16x128xbf16> to vector<256x128xbf16>
    %c0_80 = arith.constant 0 : index
    %c0_81 = arith.constant 0 : index
    %62 = vector.load %arg11[%c0_80, %c0_81] : memref<256x128xf32, #tpu.memory_space<vmem>>, vector<256x128xf32>
    %c3 = arith.constant 3 : index
    %c0_82 = arith.constant 0 : index
    %c0_83 = arith.constant 0 : index
    %63 = vector.load %arg6[%c3, %c0_82, %c0_83] : memref<9x128x128xbf16, #tpu.memory_space<vmem>>, vector<1x128x128xbf16>
    %64 = vector.shape_cast %63 : vector<1x128x128xbf16> to vector<128x128xbf16>
    %cst_84 = arith.constant dense<0.000000e+00> : vector<256x128xf32>
    %65 = tpu.matmul %61, %64, %cst_84 {dimension_numbers = #tpu.dot_dimension_numbers<[1], [0], [0], [1], [0, 0, 1, 1], [], []>} : vector<256x128xbf16>, vector<128x128xbf16>, vector<256x128xf32> -> vector<256x128xf32>
    %66 = arith.addf %62, %65 : vector<256x128xf32>
    %c0_85 = arith.constant 0 : index
    %c0_86 = arith.constant 0 : index
    %67 = vector.load %arg11[%c0_85, %c0_86] : memref<256x128xf32, #tpu.memory_space<vmem>>, vector<256x128xf32>
    tpu.vector_store %arg11[%c0_85, %c0_86], %66 {strides = array<i32>} : memref<256x128xf32, #tpu.memory_space<vmem>>, vector<256x128xf32>,
    %c1_87 = arith.constant 1 : index
    %c1_88 = arith.constant 1 : index
    %c0_89 = arith.constant 0 : index
    %c0_90 = arith.constant 0 : index
    %68 = vector.load %arg10[%c1_87, %c1_88, %c0_89, %c0_90] : memref<3x18x16x128xbf16, #tpu.memory_space<vmem>>, vector<1x16x16x128xbf16>
    %69 = vector.shape_cast %68 : vector<1x16x16x128xbf16> to vector<16x16x128xbf16>
    %70 = vector.shape_cast %69 : vector<16x16x128xbf16> to vector<256x128xbf16>
    %c0_91 = arith.constant 0 : index
    %c0_92 = arith.constant 0 : index
    %71 = vector.load %arg11[%c0_91, %c0_92] : memref<256x128xf32, #tpu.memory_space<vmem>>, vector<256x128xf32>
    %c4 = arith.constant 4 : index
    %c0_93 = arith.constant 0 : index
    %c0_94 = arith.constant 0 : index
    %72 = vector.load %arg6[%c4, %c0_93, %c0_94] : memref<9x128x128xbf16, #tpu.memory_space<vmem>>, vector<1x128x128xbf16>
    %73 = vector.shape_cast %72 : vector<1x128x128xbf16> to vector<128x128xbf16>
    %cst_95 = arith.constant dense<0.000000e+00> : vector<256x128xf32>
    %74 = tpu.matmul %70, %73, %cst_95 {dimension_numbers = #tpu.dot_dimension_numbers<[1], [0], [0], [1], [0, 0, 1, 1], [], []>} : vector<256x128xbf16>, vector<128x128xbf16>, vector<256x128xf32> -> vector<256x128xf32>
    %75 = arith.addf %71, %74 : vector<256x128xf32>
    %c0_96 = arith.constant 0 : index
    %c0_97 = arith.constant 0 : index
    %76 = vector.load %arg11[%c0_96, %c0_97] : memref<256x128xf32, #tpu.memory_space<vmem>>, vector<256x128xf32>
    tpu.vector_store %arg11[%c0_96, %c0_97], %75 {strides = array<i32>} : memref<256x128xf32, #tpu.memory_space<vmem>>, vector<256x128xf32>,
    %c2_98 = arith.constant 2 : index
    %c1_99 = arith.constant 1 : index
    %c0_100 = arith.constant 0 : index
    %c0_101 = arith.constant 0 : index
    %77 = vector.load %arg10[%c2_98, %c1_99, %c0_100, %c0_101] : memref<3x18x16x128xbf16, #tpu.memory_space<vmem>>, vector<1x16x16x128xbf16>
    %78 = vector.shape_cast %77 : vector<1x16x16x128xbf16> to vector<16x16x128xbf16>
    %79 = vector.shape_cast %78 : vector<16x16x128xbf16> to vector<256x128xbf16>
    %c0_102 = arith.constant 0 : index
    %c0_103 = arith.constant 0 : index
    %80 = vector.load %arg11[%c0_102, %c0_103] : memref<256x128xf32, #tpu.memory_space<vmem>>, vector<256x128xf32>
    %c5 = arith.constant 5 : index
    %c0_104 = arith.constant 0 : index
    %c0_105 = arith.constant 0 : index
    %81 = vector.load %arg6[%c5, %c0_104, %c0_105] : memref<9x128x128xbf16, #tpu.memory_space<vmem>>, vector<1x128x128xbf16>
    %82 = vector.shape_cast %81 : vector<1x128x128xbf16> to vector<128x128xbf16>
    %cst_106 = arith.constant dense<0.000000e+00> : vector<256x128xf32>
    %83 = tpu.matmul %79, %82, %cst_106 {dimension_numbers = #tpu.dot_dimension_numbers<[1], [0], [0], [1], [0, 0, 1, 1], [], []>} : vector<256x128xbf16>, vector<128x128xbf16>, vector<256x128xf32> -> vector<256x128xf32>
    %84 = arith.addf %80, %83 : vector<256x128xf32>
    %c0_107 = arith.constant 0 : index
    %c0_108 = arith.constant 0 : index
    %85 = vector.load %arg11[%c0_107, %c0_108] : memref<256x128xf32, #tpu.memory_space<vmem>>, vector<256x128xf32>
    tpu.vector_store %arg11[%c0_107, %c0_108], %84 {strides = array<i32>} : memref<256x128xf32, #tpu.memory_space<vmem>>, vector<256x128xf32>,
    %c0_109 = arith.constant 0 : index
    %c2_110 = arith.constant 2 : index
    %c0_111 = arith.constant 0 : index
    %c0_112 = arith.constant 0 : index
    %86 = vector.load %arg10[%c0_109, %c2_110, %c0_111, %c0_112] : memref<3x18x16x128xbf16, #tpu.memory_space<vmem>>, vector<1x16x16x128xbf16>
    %87 = vector.shape_cast %86 : vector<1x16x16x128xbf16> to vector<16x16x128xbf16>
    %88 = vector.shape_cast %87 : vector<16x16x128xbf16> to vector<256x128xbf16>
    %c0_113 = arith.constant 0 : index
    %c0_114 = arith.constant 0 : index
    %89 = vector.load %arg11[%c0_113, %c0_114] : memref<256x128xf32, #tpu.memory_space<vmem>>, vector<256x128xf32>
    %c6 = arith.constant 6 : index
    %c0_115 = arith.constant 0 : index
    %c0_116 = arith.constant 0 : index
    %90 = vector.load %arg6[%c6, %c0_115, %c0_116] : memref<9x128x128xbf16, #tpu.memory_space<vmem>>, vector<1x128x128xbf16>
    %91 = vector.shape_cast %90 : vector<1x128x128xbf16> to vector<128x128xbf16>
    %cst_117 = arith.constant dense<0.000000e+00> : vector<256x128xf32>
    %92 = tpu.matmul %88, %91, %cst_117 {dimension_numbers = #tpu.dot_dimension_numbers<[1], [0], [0], [1], [0, 0, 1, 1], [], []>} : vector<256x128xbf16>, vector<128x128xbf16>, vector<256x128xf32> -> vector<256x128xf32>
    %93 = arith.addf %89, %92 : vector<256x128xf32>
    %c0_118 = arith.constant 0 : index
    %c0_119 = arith.constant 0 : index
    %94 = vector.load %arg11[%c0_118, %c0_119] : memref<256x128xf32, #tpu.memory_space<vmem>>, vector<256x128xf32>
    tpu.vector_store %arg11[%c0_118, %c0_119], %93 {strides = array<i32>} : memref<256x128xf32, #tpu.memory_space<vmem>>, vector<256x128xf32>,
    %c1_120 = arith.constant 1 : index
    %c2_121 = arith.constant 2 : index
    %c0_122 = arith.constant 0 : index
    %c0_123 = arith.constant 0 : index
    %95 = vector.load %arg10[%c1_120, %c2_121, %c0_122, %c0_123] : memref<3x18x16x128xbf16, #tpu.memory_space<vmem>>, vector<1x16x16x128xbf16>
    %96 = vector.shape_cast %95 : vector<1x16x16x128xbf16> to vector<16x16x128xbf16>
    %97 = vector.shape_cast %96 : vector<16x16x128xbf16> to vector<256x128xbf16>
    %c0_124 = arith.constant 0 : index
    %c0_125 = arith.constant 0 : index
    %98 = vector.load %arg11[%c0_124, %c0_125] : memref<256x128xf32, #tpu.memory_space<vmem>>, vector<256x128xf32>
    %c7 = arith.constant 7 : index
    %c0_126 = arith.constant 0 : index
    %c0_127 = arith.constant 0 : index
    %99 = vector.load %arg6[%c7, %c0_126, %c0_127] : memref<9x128x128xbf16, #tpu.memory_space<vmem>>, vector<1x128x128xbf16>
    %100 = vector.shape_cast %99 : vector<1x128x128xbf16> to vector<128x128xbf16>
    %cst_128 = arith.constant dense<0.000000e+00> : vector<256x128xf32>
    %101 = tpu.matmul %97, %100, %cst_128 {dimension_numbers = #tpu.dot_dimension_numbers<[1], [0], [0], [1], [0, 0, 1, 1], [], []>} : vector<256x128xbf16>, vector<128x128xbf16>, vector<256x128xf32> -> vector<256x128xf32>
    %102 = arith.addf %98, %101 : vector<256x128xf32>
    %c0_129 = arith.constant 0 : index
    %c0_130 = arith.constant 0 : index
    %103 = vector.load %arg11[%c0_129, %c0_130] : memref<256x128xf32, #tpu.memory_space<vmem>>, vector<256x128xf32>
    tpu.vector_store %arg11[%c0_129, %c0_130], %102 {strides = array<i32>} : memref<256x128xf32, #tpu.memory_space<vmem>>, vector<256x128xf32>,
    %c2_131 = arith.constant 2 : index
    %c2_132 = arith.constant 2 : index
    %c0_133 = arith.constant 0 : index
    %c0_134 = arith.constant 0 : index
    %104 = vector.load %arg10[%c2_131, %c2_132, %c0_133, %c0_134] : memref<3x18x16x128xbf16, #tpu.memory_space<vmem>>, vector<1x16x16x128xbf16>
    %105 = vector.shape_cast %104 : vector<1x16x16x128xbf16> to vector<16x16x128xbf16>
    %106 = vector.shape_cast %105 : vector<16x16x128xbf16> to vector<256x128xbf16>
    %c0_135 = arith.constant 0 : index
    %c0_136 = arith.constant 0 : index
    %107 = vector.load %arg11[%c0_135, %c0_136] : memref<256x128xf32, #tpu.memory_space<vmem>>, vector<256x128xf32>
    %c8 = arith.constant 8 : index
    %c0_137 = arith.constant 0 : index
    %c0_138 = arith.constant 0 : index
    %108 = vector.load %arg6[%c8, %c0_137, %c0_138] : memref<9x128x128xbf16, #tpu.memory_space<vmem>>, vector<1x128x128xbf16>
    %109 = vector.shape_cast %108 : vector<1x128x128xbf16> to vector<128x128xbf16>
    %cst_139 = arith.constant dense<0.000000e+00> : vector<256x128xf32>
    %110 = tpu.matmul %106, %109, %cst_139 {dimension_numbers = #tpu.dot_dimension_numbers<[1], [0], [0], [1], [0, 0, 1, 1], [], []>} : vector<256x128xbf16>, vector<128x128xbf16>, vector<256x128xf32> -> vector<256x128xf32>
    %111 = arith.addf %107, %110 : vector<256x128xf32>
    %c0_140 = arith.constant 0 : index
    %c0_141 = arith.constant 0 : index
    %112 = vector.load %arg11[%c0_140, %c0_141] : memref<256x128xf32, #tpu.memory_space<vmem>>, vector<256x128xf32>
    tpu.vector_store %arg11[%c0_140, %c0_141], %111 {strides = array<i32>} : memref<256x128xf32, #tpu.memory_space<vmem>>, vector<256x128xf32>,
    %c0_142 = arith.constant 0 : index
    %c0_143 = arith.constant 0 : index
    %113 = vector.load %arg11[%c0_142, %c0_143] : memref<256x128xf32, #tpu.memory_space<vmem>>, vector<256x128xf32>
    %c0_144 = arith.constant 0 : index
    %c0_145 = arith.constant 0 : index
    %114 = vector.load %arg7[%c0_144, %c0_145] : memref<1x128xf32, #tpu.memory_space<vmem>>, vector<1x128xf32>
    %115 = vector.broadcast %114 : vector<1x128xf32> to vector<256x128xf32>
    %116 = arith.addf %113, %115 : vector<256x128xf32>
    %cst_146 = arith.constant 0.000000e+00 : f32
    %117 = vector.broadcast %cst_146 : f32 to vector<256x128xf32>
    %118 = arith.maximumf %116, %117 : vector<256x128xf32>
    %119 = arith.truncf %118 : vector<256x128xf32> to vector<256x128xbf16>
    %c0_147 = arith.constant 0 : index
    %c0_148 = arith.constant 0 : index
    %c0_149 = arith.constant 0 : index
    %120 = vector.load %arg8[%c0_147, %c0_148, %c0_149] : memref<1x256x128xbf16, #tpu.memory_space<vmem>>, vector<1x256x128xbf16>
    %121 = vector.shape_cast %120 : vector<1x256x128xbf16> to vector<256x128xbf16>
    %122 = vector.shape_cast %119 : vector<256x128xbf16> to vector<1x256x128xbf16>
    tpu.vector_store %arg8[%c0_147, %c0_148, %c0_149], %122 {strides = array<i32>} : memref<1x256x128xbf16, #tpu.memory_space<vmem>>, vector<1x256x128xbf16>,
    return
  }
  func.func @transform_0(%arg0: i32) -> (i32, i32, i32) {
    %c0_i32 = arith.constant 0 : i32
    %c0_i32_0 = arith.constant 0 : i32
    %c0_i32_1 = arith.constant 0 : i32
    return %arg0, %c0_i32, %c0_i32_0 : i32, i32, i32
  }
  func.func @transform_1(%arg0: i32) -> (i32, i32) {
    %c0_i32 = arith.constant 0 : i32
    %c0_i32_0 = arith.constant 0 : i32
    %c0_i32_1 = arith.constant 0 : i32
    return %c0_i32, %c0_i32_0 : i32, i32
  }
  func.func @transform_2(%arg0: i32) -> (i32, i32) {
    %c0_i32 = arith.constant 0 : i32
    %c0_i32_0 = arith.constant 0 : i32
    %c0_i32_1 = arith.constant 0 : i32
    return %c0_i32, %c0_i32_0 : i32, i32
  }
  func.func @transform_3(%arg0: i32) -> (i32, i32) {
    %c0_i32 = arith.constant 0 : i32
    %c0_i32_0 = arith.constant 0 : i32
    %c0_i32_1 = arith.constant 0 : i32
    return %c0_i32, %c0_i32_0 : i32, i32
  }
  func.func @transform_4(%arg0: i32) -> (i32, i32) {
    %c0_i32 = arith.constant 0 : i32
    %c0_i32_0 = arith.constant 0 : i32
    %c0_i32_1 = arith.constant 0 : i32
    return %c0_i32, %c0_i32_0 : i32, i32
  }
  func.func @transform_5(%arg0: i32) -> (i32, i32, i32) {
    %c0_i32 = arith.constant 0 : i32
    %c0_i32_0 = arith.constant 0 : i32
    %c0_i32_1 = arith.constant 0 : i32
    %c0_i32_2 = arith.constant 0 : i32
    return %c0_i32, %c0_i32_0, %c0_i32_1 : i32, i32, i32
  }
  func.func @transform_6(%arg0: i32) -> (i32, i32) {
    %c0_i32 = arith.constant 0 : i32
    %c0_i32_0 = arith.constant 0 : i32
    %c0_i32_1 = arith.constant 0 : i32
    return %c0_i32, %c0_i32_0 : i32, i32
  }
  func.func @transform_7(%arg0: i32) -> (i32, i32, i32) {
    %c0_i32 = arith.constant 0 : i32
    %c0_i32_0 = arith.constant 0 : i32
    %c0_i32_1 = arith.constant 0 : i32
    return %arg0, %c0_i32, %c0_i32_0 : i32, i32, i32
  }
}

</mosaic_0001>

<bundles_post_ra>
// kernel: a_call__.1
= control target key start
LH: loop header
LB: loop body
LE: loop exit
PB: predicated region body
PF: predicated region fallthrough
CT: control target
= control target key end

     0   :  { %s8595_s24 = smov 0   ;;  %s10208_s0 = inlined_call_operand.vmem [shape: bf16[2,256,128], index: 0, kind: input, shape index: {}]   ;;  %s10209_s1 = inlined_call_operand.vmem [shape: bf16[128,128], index: 1, kind: input, shape index: {}]   ;;  %s10210_s2 = inlined_call_operand.vmem [shape: f32[1,128], index: 2, kind: input, shape index: {}]   ;;  %s10211_s3 = inlined_call_operand.vmem [shape: bf16[128,128], index: 3, kind: input, shape index: {}]   ;;  %s10212_s4 = inlined_call_operand.vmem [shape: f32[1,128], index: 4, kind: input, shape index: {}]   ;;  %s10213_s5 = inlined_call_operand.vmem [shape: bf16[9,128,128], index: 5, kind: input, shape index: {}]   ;;  %s10214_s6 = inlined_call_operand.vmem [shape: f32[1,128], index: 6, kind: input, shape index: {}]   ;;  %s10215_s7 = inlined_call_operand.vmem [shape: bf16[2,256,128], index: 7, kind: output, shape index: {}]  }
   0x1 LB: > { %s6844_s25 = sadd.s32 4294967295, %s8552_s24   ;;  %p6848_p0 = scmp.ge.s32.totalorder %s8552_s24, 1  ;;  %s8552_s24 = sphi %s8595_s24, %s17_s24  }
   0x2   : > { %p237_p1 = scmp.lt.s32.totalorder %s8552_s24, 3 }
   0x4   : > { %p238_p2 = pnand %p6848_p0, %p237_p1 }
   0x6   : > { %241 = sbr.rel (%p238_p2) target bundleno = 894 (0x37e), region = 48 }
   0xb   : > { %v8294_v0 = vld [vmem:[%s10211_s3 + $0x38] sm:$0xff]   ;;  %p269_p3 = scmp.lt.s32.totalorder %s6844_s25, 1  ;;  %v8295_v1 = vld [vmem:[%s10211_s3 + $0x30] sm:$0xff]   ;;  %v8296_v2 = vld [vmem:[%s10211_s3 + $0x28] sm:$0xff]   ;;  %v8554_v32 = vmov 0   ;;  %vm1410_vm3 = vcmask 1043456  }
   0xc   : > { %8269 = vmatprep.subr.bf16.mxu1 %v8294_v0  ;;  %7741 = vmatprep.subr.bf16.mxu0 %v8294_v0  ;;  %v8297_v3 = vld [vmem:[%s10211_s3 + $0x20] sm:$0xff]   ;;  %v8298_v5 = vld [vmem:[%s10211_s3 + $0x18] sm:$0xff]   ;;  %v8299_v6 = vld [vmem:[%s10211_s3 + $0x10] sm:$0xff]   ;;  %958 = vst [vmem:[#allocation2 + $0x18] sm:$0xf] %v8554_v32  ;;  %vm1417_vm8 = vcmask 1040384  }
   0xd   : > { %s10286_s25 = smov (!%p269_p3, %s6844_s25), 1  ;;  %8277 = vmatpush3.bf16.msra.mxu1 %v8294_v0  ;;  %7742 = vmatpush3.bf16.msra.mxu0 %v8294_v0  ;;  %v8300_v7 = vld [vmem:[%s10211_s3 + $0x8] sm:$0xff]   ;;  %v8301_v8 = vld [vmem:[%s10211_s3] sm:$0xff]   ;;  %v8304_v10 = vld [vmem:[%s10209_s1 + $0x38] sm:$0xff]   ;;  %952 = vst [vmem:[#allocation2] sm:$0xf] %v8554_v32 }
   0xe   : > { %8270 = vmatprep.subr.bf16.mxu1 %v8295_v1  ;;  %s7316_s9 = sshll.u32 %s10286_s25, 7  ;;  %7743 = vmatprep.subr.bf16.mxu0 %v8295_v1  ;;  %v8305_v12 = vld [vmem:[%s10209_s1 + $0x30] sm:$0xff]   ;;  %v8308_v16 = vld [vmem:[%s10209_s1 + $0x28] sm:$0xff]   ;;  %v8309_v19 = vld [vmem:[%s10209_s1 + $0x20] sm:$0xff]   ;;  %953 = vst [vmem:[#allocation2 + $0x4] sm:$0xf] %v8554_v32 }
   0xf   : > { %s8620_s12 = scalar_lea.vmem %s10208_s0, %s7316_s9  ;;  %v8312_v22 = vld [vmem:[%s10209_s1 + $0x18] sm:$0xff]   ;;  %v8313_v25 = vld [vmem:[%s10209_s1 + $0x10] sm:$0xff]   ;;  %v8316_v28 = vld [vmem:[%s10209_s1 + $0x8] sm:$0xff]   ;;  %954 = vst [vmem:[#allocation2 + $0x8] sm:$0x1] %v8554_v32  ;;  %vm2269_vm11 = vcmask 1042432  }
  0x10   : > { %v8626_v4 = vld [vmem:[%s8620_s12 + $0x40] sm:$0xff]   ;;  %v8303_v11 = vld [vmem:[%s8620_s12 + $0x48] sm:$0xff]   ;;  %v8306_v13 = vld [vmem:[%s8620_s12 + $0x50] sm:$0xff]   ;;  %955 = vst [vmem:[#allocation2 + $0xc] sm:$0xf] %v8554_v32  ;;  %vm2270_vm12 = vcmask 1046532  }
  0x11   : > { %8278 = vmatpush3.bf16.msra.mxu1 %v8295_v1  ;;  %7744 = vmatpush3.bf16.msra.mxu0 %v8295_v1  ;;  %v8318_v9 = vld [vmem:[%s8620_s12] sm:$0xff]   ;;  %v8319_v14 = vld [vmem:[%s8620_s12 + $0x8] sm:$0xff]   ;;  %v8320_v15 = vld [vmem:[%s8620_s12 + $0x10] sm:$0xff]   ;;  %956 = vst [vmem:[#allocation2 + $0x10] sm:$0xf] %v8554_v32 }
  0x12   : > { %8271 = vmatprep.subr.bf16.mxu1 %v8296_v2  ;;  %7745 = vmatprep.subr.bf16.mxu0 %v8296_v2  ;;  %v8307_v17 = vld [vmem:[%s8620_s12 + $0x58] sm:$0xff]   ;;  %v8310_v18 = vld [vmem:[%s8620_s12 + $0x60] sm:$0xff]   ;;  %v8311_v23 = vld [vmem:[%s8620_s12 + $0x68] sm:$0xff]   ;;  %957 = vst [vmem:[#allocation2 + $0x14] sm:$0x1] %v8554_v32 }
  0x13   : > { %7773 = vmatprep.mubr.bf16.mxu1 %v8626_v4  ;;  %7757 = vmatprep.mubr.bf16.mxu0 %v8318_v9  ;;  %v8321_v20 = vld [vmem:[%s8620_s12 + $0x18] sm:$0xff]   ;;  %v8322_v21 = vld [vmem:[%s8620_s12 + $0x20] sm:$0xff]   ;;  %v8314_v24 = vld [vmem:[%s8620_s12 + $0x70] sm:$0xff]   ;;  %959 = vst [vmem:[#allocation2 + $0x1c] sm:$0xf] %v8554_v32 }
  0x14   : > { %v8323_v26 = vld [vmem:[%s8620_s12 + $0x28] sm:$0xff]   ;;  %v8324_v27 = vld [vmem:[%s8620_s12 + $0x30] sm:$0xff]   ;;  %v8315_v29 = vld [vmem:[%s8620_s12 + $0x78] sm:$0xff]   ;;  %960 = vst [vmem:[#allocation2 + $0x20] sm:$0x1] %v8554_v32 }
  0x15   : > { %8279 = vmatpush3.bf16.msra.mxu1 %v8296_v2  ;;  %7746 = vmatpush3.bf16.msra.mxu0 %v8296_v2  ;;  %v8317_v30 = vld [vmem:[%s10209_s1] sm:$0xff]   ;;  %v8325_v31 = vld [vmem:[%s8620_s12 + $0x38] sm:$0xff]   ;;  %961 = vst [vmem:[#allocation2 + $0x24] sm:$0xf] %v8554_v32  ;;  %962 = vst [vmem:[#allocation2 + $0x28] sm:$0xf] %v8554_v32  ;;  %s10085_s12 = scalar_lea.vmem %s10215_s7, %s7316_s9 }
  0x16   : > { %8272 = vmatprep.subr.bf16.mxu1 %v8297_v3  ;;  %7747 = vmatprep.subr.bf16.mxu0 %v8297_v3  ;;  %963 = vst [vmem:[#allocation2 + $0x2c] sm:$0x1] %v8554_v32  ;;  %964 = vst [vmem:[#allocation2 + $0x30] sm:$0xf] %v8554_v32  ;;  %v8326_v33 = vld [vmem:[%s10213_s5 + $0x38] sm:$0xff]   ;;  %v8327_v34 = vld [vmem:[%s10213_s5 + $0x30] sm:$0xff]  }
  0x17   : > { %965 = vst [vmem:[#allocation2 + $0x34] sm:$0xf] %v8554_v32  ;;  %966 = vst [vmem:[#allocation2 + $0x38] sm:$0x1] %v8554_v32  ;;  %v8328_v35 = vld [vmem:[%s10213_s5 + $0x28] sm:$0xff]   ;;  %v8329_v36 = vld [vmem:[%s10213_s5 + $0x78] sm:$0xff]  }
  0x18   : > { %967 = vst [vmem:[#allocation2 + $0x3c] sm:$0xf] %v8554_v32  ;;  %968 = vst [vmem:[#allocation2 + $0x40] sm:$0xf] %v8554_v32  ;;  %v8330_v37 = vld [vmem:[%s10213_s5 + $0x20] sm:$0xff]   ;;  %v8331_v38 = vld [vmem:[%s10213_s5 + $0x70] sm:$0xff]  }
  0x19   : > { %8280 = vmatpush3.bf16.msra.mxu1 %v8297_v3  ;;  %7748 = vmatpush3.bf16.msra.mxu0 %v8297_v3  ;;  %969 = vst [vmem:[#allocation2 + $0x44] sm:$0x1] %v8554_v32  ;;  %970 = vst [vmem:[#allocation2 + $0x48] sm:$0xf] %v8554_v32  ;;  %v8332_v39 = vld [vmem:[%s10213_s5 + $0x18] sm:$0xff]   ;;  %v8333_v40 = vld [vmem:[%s10213_s5 + $0x68] sm:$0xff]  }
  0x1a   : > { %8273 = vmatprep.subr.bf16.mxu1 %v8298_v5  ;;  %7749 = vmatprep.subr.bf16.mxu0 %v8298_v5  ;;  %971 = vst [vmem:[#allocation2 + $0x4c] sm:$0xf] %v8554_v32  ;;  %972 = vst [vmem:[#allocation2 + $0x50] sm:$0x1] %v8554_v32  ;;  %v8334_v41 = vld [vmem:[%s10213_s5 + $0x10] sm:$0xff]   ;;  %v8335_v42 = vld [vmem:[%s10213_s5 + $0x60] sm:$0xff]  }
  0x1b   : > { %973 = vst [vmem:[#allocation2 + $0x54] sm:$0xf] %v8554_v32  ;;  %974 = vst [vmem:[#allocation2 + $0x58] sm:$0xf] %v8554_v32  ;;  %v1527_v43 = vld [vmem:[#allocation2] sm:$0xff]   ;;  %v8336_v44 = vld [vmem:[%s10213_s5 + $0x8] sm:$0xff]  }
  0x1c   : > { %975 = vst [vmem:[#allocation2 + $0x5c] sm:$0x1] %v8554_v32  ;;  %976 = vst [vmem:[#allocation2 + $0x60] sm:$0xf] %v8554_v32  ;;  %v1599_v45 = vld [vmem:[#allocation2] sm:$0xf] }
  0x1d   : > { %8281 = vmatpush3.bf16.msra.mxu1 %v8298_v5  ;;  %7750 = vmatpush3.bf16.msra.mxu0 %v8298_v5  ;;  %977 = vst [vmem:[#allocation2 + $0x64] sm:$0xf] %v8554_v32  ;;  %978 = vst [vmem:[#allocation2 + $0x68] sm:$0x1] %v8554_v32  ;;  %v1600_v46 = vld [vmem:[#allocation2 + $0x4] sm:$0xf] }
  0x1e   : > { %8274 = vmatprep.subr.bf16.mxu1 %v8299_v6  ;;  %7751 = vmatprep.subr.bf16.mxu0 %v8299_v6  ;;  %979 = vst [vmem:[#allocation2 + $0x6c] sm:$0xf] %v8554_v32  ;;  %980 = vst [vmem:[#allocation2 + $0x70] sm:$0xf] %v8554_v32  ;;  %v8337_v47 = vld [vmem:[%s10213_s5 + $0x58] sm:$0xff]   ;;  %v1657_v48 = vshrl.u32 %v1599_v45, 16 }
  0x1f   : > { %981 = vst [vmem:[#allocation2 + $0x74] sm:$0x1] %v8554_v32  ;;  %982 = vst [vmem:[#allocation2 + $0x78] sm:$0xf] %v8554_v32  ;;  %v1660_v49 = vshll.u32 %v1599_v45, 16  ;;  %v1666_v50 = vshll.u32 %v1600_v46, 16 }
  0x20   : > { %983 = vst [vmem:[#allocation2 + $0x7c] sm:$0xf] %v8554_v32  ;;  %984 = vst [vmem:[#allocation2 + $0x80] sm:$0x1] %v8554_v32  ;;  %v1670_v51 = vshrl.u32 %v1600_v46, 16  ;;  %v1659_v52 = vrot.slane %v1657_v48, 4 }
  0x21   : > { %8282 = vmatpush3.bf16.msra.mxu1 %v8299_v6  ;;  %7752 = vmatpush3.bf16.msra.mxu0 %v8299_v6  ;;  %985 = vst [vmem:[#allocation2 + $0x84] sm:$0xf] %v8554_v32  ;;  %986 = vst [vmem:[#allocation2 + $0x88] sm:$0xf] %v8554_v32  ;;  %v1662_v53 = vrot.slane %v1660_v49, 5  ;;  %v1668_v54 = vrot.slane %v1666_v50, 5 }
  0x22   : > { %8275 = vmatprep.subr.bf16.mxu1 %v8300_v7  ;;  %7753 = vmatprep.subr.bf16.mxu0 %v8300_v7  ;;  %987 = vst [vmem:[#allocation2 + $0x8c] sm:$0x1] %v8554_v32  ;;  %988 = vst [vmem:[#allocation2 + $0x90] sm:$0xf] %v8554_v32  ;;  %v8338_v55 = vld [vmem:[%s10213_s5] sm:$0xff]   ;;  %v1672_v57 = vrot.slane %v1670_v51, 4 }
  0x23   : > { %989 = vst [vmem:[#allocation2 + $0x94] sm:$0xf] %v8554_v32  ;;  %990 = vst [vmem:[#allocation2 + $0x98] sm:$0x1] %v8554_v32  ;;  %v1601_v56 = vld [vmem:[#allocation2 + $0x8] sm:$0x1]  ;;  %v1663_v59 = vor.u32 %v1662_v53, %v1659_v52 }
  0x24   : > { %991 = vst [vmem:[#allocation2 + $0x9c] sm:$0xf] %v8554_v32  ;;  %992 = vst [vmem:[#allocation2 + $0xa0] sm:$0xf] %v8554_v32  ;;  %v8339_v58 = vld [vmem:[%s10213_s5 + $0x50] sm:$0xff]   ;;  %v1676_v60 = vshll.u32 %v1601_v56, 16  ;;  %v1673_v61 = vor.u32 %v1672_v57, %v1668_v54 }
  0x25   : > { %8283 = vmatpush3.bf16.msra.mxu1 %v8300_v7  ;;  %7754 = vmatpush3.bf16.msra.mxu0 %v8300_v7  ;;  %993 = vst [vmem:[#allocation2 + $0xa4] sm:$0x1] %v8554_v32  ;;  %994 = vst [vmem:[#allocation2 + $0xa8] sm:$0xf] %v8554_v32  ;;  %vm1653_vm0 = vsmask.f32 3328 }
  0x26   : > { %8276 = vmatprep.subr.bf16.mxu1 %v8301_v8  ;;  %7755 = vmatprep.subr.bf16.mxu0 %v8301_v8  ;;  %995 = vst [vmem:[#allocation2 + $0xac] sm:$0xf] %v8554_v32  ;;  %996 = vst [vmem:[#allocation2 + $0xb0] sm:$0x1] %v8554_v32  ;;  %vm1654_vm1 = vsmask.f32 7440 }
  0x27   : > { %997 = vst [vmem:[#allocation2 + $0xb4] sm:$0xf] %v8554_v32  ;;  %998 = vst [vmem:[#allocation2 + $0xb8] sm:$0xf] %v8554_v32  ;;  %v1664_v63 = vrot.slane %v1663_v59, 4  ;;  %v1674_v0 = vrot.slane %v1673_v61, 4 }
  0x28   : > { %999 = vst [vmem:[#allocation2 + $0xbc] sm:$0x1] %v8554_v32  ;;  %1000 = vst [vmem:[#allocation2 + $0xc0] sm:$0xf] %v8554_v32  ;;  %v1678_v1 = vrot.slane %v1676_v60, 5  ;;  %v8344_v2 = vld [vmem:[%s10213_s5 + $0x48] sm:$0xff]  }
  0x29   : > { %8284 = vmatpush3.bf16.msra.mxu1 %v8301_v8  ;;  %7756 = vmatpush3.bf16.msra.mxu0 %v8301_v8  ;;  %1001 = vst [vmem:[#allocation2 + $0xc4] sm:$0xf] %v8554_v32  ;;  %1002 = vst [vmem:[#allocation2 + $0xc8] sm:$0x1] %v8554_v32  ;;  %v8345_v6 = vld [vmem:[%s10213_s5 + $0x40] sm:$0xff]   ;;  %v8740_v8 = vld [vmem:[%s10213_s5 + $0xb8] sm:$0xff]  }
  0x2a   : > { %7789 = vmatprep.subr.bf16.mxu1 %v8304_v10  ;;  %1003 = vst [vmem:[#allocation2 + $0xcc] sm:$0xf] %v8554_v32  ;;  %1004 = vst [vmem:[#allocation2 + $0xd0] sm:$0xf] %v8554_v32  ;;  %7837 = vmatprep.subr.bf16.mxu0 %v8326_v33  ;;  %vm1411_vm4 = vsmask.f32 7938 }
  0x2b   : > { %1005 = vst [vmem:[#allocation2 + $0xd4] sm:$0x1] %v8554_v32  ;;  %1563 = vst [vmem:[#allocation3] sm:$0xff] %v1527_v43   ;;  %vm1086_vm5 = vsmask.f32 256  ;;  %v8792_v51 = vld [vmem:[%s10213_s5 + $0xf8] sm:$0xff]  }
  0x2c   : > { %7774 = vmatmul.mubr.bf16.vlgmr.msra.gmra.mxu1 %v8303_v11  ;;  %7758 = vmatmul.mubr.bf16.vlgmr.msra.gmra.mxu0 %v8319_v14  ;;  %vm8726_vm2 = vmor %vm1653_vm0, %vm1654_vm1  ;;  %vm1087_vm6 = vsmask.f32 4368  ;;  %v1422_v46 = vld [vmem:[#allocation2 + $0x18] sm:$0xf]  ;;  %v1413_v56 = vld [vmem:[#allocation2 + $0xc] sm:$0xf] }
  0x2d   : > { %7790 = vmatpush3.bf16.msra.mxu1 %v8304_v10  ;;  %7777 = vmatprep.mubr.bf16.mxu1 %v8306_v13  ;;  %v1679_v5 = vsel %vm8726_vm2, %v1674_v0, %v1678_v1  ;;  %vm8784_vm7 = vmand %vm1410_vm3, %vm1411_vm4 }
  0x2e   : > { %7791 = vmatprep.subr.bf16.mxu1 %v8305_v12  ;;  %7761 = vmatprep.mubr.bf16.mxu0 %v8320_v15  ;;  %2126 = vst [vmem:[#allocation3 + $0x94] sm:$0xf] %v1679_v5  ;;  %vm8800_vm9 = vmor %vm1086_vm5, %vm1087_vm6  ;;  %v1426_v5 = vld [vmem:[#allocation2 + $0x20] sm:$0x1] }
  0x2f   : > { %7838 = vmatpush3.bf16.msra.mxu0 %v8326_v33  ;;  %vm8806_vm10 = vmand %vm1417_vm8, %vm1086_vm5 }
  0x30   : > { %7839 = vmatprep.subr.bf16.mxu0 %v8327_v34  ;;  %vm9092_vm13 = vmor %vm2269_vm11, %vm2270_vm12 }
  0x31   : > { %7792 = vmatpush3.bf16.msra.mxu1 %v8305_v12 }
  0x32   : > { %7793 = vmatprep.subr.bf16.mxu1 %v8308_v16  ;;  %v8340_v62 = vld [vmem:[#allocation3] sm:$0xff]  }
  0x33   : > { %7840 = vmatpush3.bf16.msra.mxu0 %v8327_v34 }
  0x34   : > { %7778 = vmatmul.mubr.bf16.gmra.mxu1 %v8307_v17  ;;  %7762 = vmatmul.mubr.bf16.gmra.mxu0 %v8321_v20 }
  0x35   : > { %7794 = vmatpush3.bf16.msra.mxu1 %v8308_v16  ;;  %7781 = vmatprep.mubr.bf16.mxu1 %v8310_v18 }
  0x36   : > { %7795 = vmatprep.subr.bf16.mxu1 %v8309_v19  ;;  %7765 = vmatprep.mubr.bf16.mxu0 %v8322_v21 }
  0x37   : > { %7841 = vmatprep.subr.bf16.mxu0 %v8328_v35 }
  0x38   : > { %7842 = vmatpush3.bf16.msra.mxu0 %v8328_v35 }
  0x39   : > { %7796 = vmatpush3.bf16.msra.mxu1 %v8309_v19  ;;  %7843 = vmatprep.subr.bf16.mxu0 %v8330_v37 }
  0x3a   : > { %7797 = vmatprep.subr.bf16.mxu1 %v8312_v22 }
  0x3c   : > { %7782 = vmatmul.mubr.bf16.gmra.mxu1 %v8311_v23  ;;  %7766 = vmatmul.mubr.bf16.gmra.mxu0 %v8323_v26 }
  0x3d   : > { %7798 = vmatpush3.bf16.msra.mxu1 %v8312_v22  ;;  %7785 = vmatprep.mubr.bf16.mxu1 %v8314_v24 }
  0x3e   : > { %7799 = vmatprep.subr.bf16.mxu1 %v8313_v25  ;;  %7769 = vmatprep.mubr.bf16.mxu0 %v8324_v27 }
  0x3f   : > { %7844 = vmatpush3.bf16.msra.mxu0 %v8330_v37 }
  0x40   : > { %7845 = vmatprep.subr.bf16.mxu0 %v8332_v39 }
  0x41   : > { %7800 = vmatpush3.bf16.msra.mxu1 %v8313_v25  ;;  %v8778_v25 = vld [vmem:[%s10210_s2] ss:$0 sm:$0xff] }
  0x42   : > { %7801 = vmatprep.subr.bf16.mxu1 %v8316_v28 }
  0x43   : > { %7846 = vmatpush3.bf16.msra.mxu0 %v8332_v39 }
  0x44   : > { %7786 = vmatmul.mubr.bf16.gmra.mxu1 %v8315_v29  ;;  %7770 = vmatmul.mubr.bf16.gmra.mxu0 %v8325_v31 }
  0x45   : > { %7802 = vmatpush3.bf16.msra.mxu1 %v8316_v28  ;;  %7805 = vmatprep.mubr.bf16.mxu1 %v8318_v9 }
  0x46   : > { %7803 = vmatprep.subr.bf16.mxu1 %v8317_v30  ;;  %7847 = vmatprep.subr.bf16.mxu0 %v8334_v41 }
  0x47   : > { %7848 = vmatpush3.bf16.msra.mxu0 %v8334_v41  ;;  %7853 = vmatprep.mubr.bf16.mxu0 %v8340_v62 }
  0x48   : > { %7849 = vmatprep.subr.bf16.mxu0 %v8336_v44 }
  0x49   : > { %7804 = vmatpush3.bf16.msra.mxu1 %v8317_v30 }
  0x4a   : > { %7885 = vmatprep.subr.bf16.mxu1 %v8329_v36 }
  0x4b   : > { %7850 = vmatpush3.bf16.msra.mxu0 %v8336_v44 }
  0x4c   : > { %7806 = vmatmul.mubr.bf16.vlgmr.msra.gmra.mxu1 %v8319_v14  ;;  %7851 = vmatprep.subr.bf16.mxu0 %v8338_v55 }
  0x4d   : > { %7809 = vmatprep.mubr.bf16.mxu1 %v8320_v15  ;;  %7886 = vmatpush3.bf16.msra.mxu1 %v8329_v36 }
  0x4e   : > { %7887 = vmatprep.subr.bf16.mxu1 %v8331_v38 }
  0x4f   : > { %7852 = vmatpush3.bf16.msra.mxu0 %v8338_v55 }
  0x50   : > { %7933 = vmatprep.subr.bf16.mxu0 %v8740_v8 }
  0x51   : > { %7888 = vmatpush3.bf16.msra.mxu1 %v8331_v38 }
  0x52   : > { %7889 = vmatprep.subr.bf16.mxu1 %v8333_v40 }
  0x54   : > { %7810 = vmatmul.mubr.bf16.gmra.mxu1 %v8321_v20 }
  0x55   : > { %7813 = vmatprep.mubr.bf16.mxu1 %v8322_v21  ;;  %7890 = vmatpush3.bf16.msra.mxu1 %v8333_v40 }
  0x56   : > { %7891 = vmatprep.subr.bf16.mxu1 %v8335_v42 }
  0x59   : > { %7892 = vmatpush3.bf16.msra.mxu1 %v8335_v42 }
  0x5a   : > { %7893 = vmatprep.subr.bf16.mxu1 %v8337_v47 }
  0x5c   : > { %7814 = vmatmul.mubr.bf16.gmra.mxu1 %v8323_v26 }
  0x5d   : > { %7817 = vmatprep.mubr.bf16.mxu1 %v8324_v27  ;;  %7894 = vmatpush3.bf16.msra.mxu1 %v8337_v47 }
  0x5e   : > { %7895 = vmatprep.subr.bf16.mxu1 %v8339_v58 }
  0x61   : > { %7896 = vmatpush3.bf16.msra.mxu1 %v8339_v58 }
  0x62   : > { %7897 = vmatprep.subr.bf16.mxu1 %v8344_v2 }
  0x64   : > { %7818 = vmatmul.mubr.bf16.gmra.mxu1 %v8325_v31 }
  0x65   : > { %7821 = vmatprep.mubr.bf16.mxu1 %v8626_v4  ;;  %v1669_v4 = vsel %vm8726_vm2, %v1664_v63, %v1668_v54  ;;  %7898 = vmatpush3.bf16.msra.mxu1 %v8344_v2 }
  0x66   : > { %2125 = vst [vmem:[#allocation3 + $0x90] sm:$0xf] %v1669_v4  ;;  %7899 = vmatprep.subr.bf16.mxu1 %v8345_v6 }
  0x69   : > { %7900 = vmatpush3.bf16.msra.mxu1 %v8345_v6 }
  0x6a   : > { %7981 = vmatprep.subr.bf16.mxu1 %v8792_v51 }
  0x6c   : > { %7822 = vmatmul.mubr.bf16.gmra.mxu1 %v8303_v11 }
  0x6d   : > { %7825 = vmatprep.mubr.bf16.mxu1 %v8306_v13  ;;  %v8347_v7 = vld [vmem:[#allocation3 + $0x90] sm:$0xff]  }
  0x74   : > { %7826 = vmatmul.mubr.bf16.gmra.mxu1 %v8307_v17 }
  0x75   : > { %7829 = vmatprep.mubr.bf16.mxu1 %v8310_v18 }
  0x7c   : > { %7830 = vmatmul.mubr.bf16.gmra.mxu1 %v8311_v23 }
  0x7d   : > { %7833 = vmatprep.mubr.bf16.mxu1 %v8314_v24 }
  0x84   : > { %7834 = vmatmul.mubr.bf16.gmra.mxu1 %v8315_v29 }
  0x85   : > { %7901 = vmatprep.mubr.bf16.mxu1 %v8347_v7 }
  0xec   : > { %v8743_v9 = vpop.f32.mrf.mxu1 }
  0xee   : > { %v8745_v10 = vpop.f32.mrf.mxu1 }
  0xf0   : > { %v8747_v11 = vpop.f32.mrf.mxu1 }
  0xf2   : > { %v8749_v12 = vpop.f32.mrf.mxu1 }
  0xf4   : > { %v8751_v13 = vpop.f32.mrf.mxu1 }
  0xf6   : > { %v8753_v14 = vpop.f32.mrf.mxu1 }
  0xf8   : > { %v8755_v15 = vpop.f32.mrf.mxu1 }
  0xfa   : > { %v8757_v16 = vpop.f32.mrf.mxu1 }
  0xfc   : > { %v8759_v17 = vpop.f32.mrf.mxu1 }
  0xfe   : > { %v8761_v18 = vpop.f32.mrf.mxu1 }
 0x100   : > { %v8763_v19 = vpop.f32.mrf.mxu1 }
 0x102   : > { %v8765_v20 = vpop.f32.mrf.mxu1 }
 0x104   : > { %v8767_v21 = vpop.f32.mrf.mxu1 }
 0x106   : > { %v8769_v22 = vpop.f32.mrf.mxu1 }
 0x108   : > { %v8771_v23 = vpop.f32.mrf.mxu1 }
 0x10a   : > { %v8773_v24 = vpop.f32.mrf.mxu1 }
 0x10c   : > { %v7807_v26 = vpop.f32.mrf.mxu1 }
 0x10d   : > { %v786_v27 = vadd.f32 %v7807_v26, %v8778_v25 }
 0x10e   : > { %v777_v28 = vpop.f32.mrf.mxu1 }
 0x10f   : > { %v906_v29 = vmax.f32 %v786_v27, 0.0  ;;  %v778_v30 = vadd.f32 %v8778_v25, %v777_v28 }
 0x110   : > { %v7808_v31 = vpop.f32.mrf.mxu1 }
 0x111   : > { %v7320_v32 = vpack.c.bf16 %v906_v29, %v906_v29  ;;  %v904_v33 = vmax.f32 %v778_v30, 0.0  ;;  %v789_v34 = vadd.f32 %v7808_v31, %v8778_v25 }
 0x112   : > { %v780_v35 = vpop.f32.mrf.mxu1 }
 0x113   : > { %v1107_v36 = vshrl.u32 %v7320_v32, 16  ;;  %v7318_v37 = vpack.c.bf16 %v904_v33, %v904_v33  ;;  %v907_v38 = vmax.f32 %v789_v34, 0.0  ;;  %v781_v39 = vadd.f32 %v8778_v25, %v780_v35 }
 0x114   : > { %v7811_v40 = vpop.f32.mrf.mxu1  ;;  %v1110_v42 = vshll.u32 %v7320_v32, 16 }
 0x115   : > { %v1109_v41 = vrot.slane %v1107_v36, 7  ;;  %v1090_v43 = vshrl.u32 %v7318_v37, 16  ;;  %v7321_v44 = vpack.c.bf16 %v907_v38, %v907_v38  ;;  %v1093_v47 = vshll.u32 %v7318_v37, 16 }
 0x116   : > { %v905_v48 = vmax.f32 %v781_v39, 0.0  ;;  %v802_v49 = vadd.f32 %v7811_v40, %v8778_v25  ;;  %v793_v50 = vpop.f32.mrf.mxu1  ;;  %v1419_v40 = vld [vmem:[#allocation2 + $0x14] sm:$0x1] }
 0x117   : > { %v1112_v52 = vor.u32 %v1110_v42, %v1109_v41  ;;  %v1113_v53 = vrot.slane %v1109_v41, 4  ;;  %v1092_v54 = vrot.slane %v1090_v43, 7  ;;  %v1115_v55 = vshrl.u32 %v7321_v44, 16 }
 0x118   : > { %v1118_v57 = vshll.u32 %v7321_v44, 16  ;;  %v7319_v58 = vpack.c.bf16 %v905_v48, %v905_v48  ;;  %v910_v59 = vmax.f32 %v802_v49, 0.0  ;;  %v794_v60 = vadd.f32 %v8778_v25, %v793_v50  ;;  %v7812_v61 = vpop.f32.mrf.mxu1  ;;  %v1436_v49 = vld [vmem:[#allocation2 + $0x30] sm:$0xf] }
 0x119   : > { %v1423_v62 = vsel %vm8784_vm7, %v1112_v52, %v1422_v46  ;;  %v1095_v63 = vor.u32 %v1093_v47, %v1092_v54  ;;  %v1096_v0 = vrot.slane %v1092_v54, 4  ;;  %v1117_v2 = vrot.slane %v1115_v55, 7 }
 0x11a   : > { %1424 = vst [vmem:[#allocation2 + $0x18] sm:$0xf] %v1423_v62  ;;  %v1098_v6 = vshrl.u32 %v7319_v58, 16  ;;  %v1101_v7 = vshll.u32 %v7319_v58, 16  ;;  %v7324_v26 = vpack.c.bf16 %v910_v59, %v910_v59  ;;  %v908_v27 = vmax.f32 %v794_v60, 0.0  ;;  %v796_v28 = vpop.f32.mrf.mxu1 }
 0x11b   : > { %v1414_v29 = vsel %vm8784_vm7, %v1095_v63, %v1413_v56  ;;  %v1120_v30 = vor.u32 %v1118_v57, %v1117_v2  ;;  %v1122_v31 = vrot.slane %v1117_v2, 4  ;;  %v805_v32 = vadd.f32 %v7812_v61, %v8778_v25 }
 0x11c   : > { %1415 = vst [vmem:[#allocation2 + $0xc] sm:$0xf] %v1414_v29  ;;  %v1100_v33 = vrot.slane %v1098_v6, 7  ;;  %v1141_v34 = vshrl.u32 %v7324_v26, 16  ;;  %v1144_v35 = vshll.u32 %v7324_v26, 16  ;;  %v7322_v36 = vpack.c.bf16 %v908_v27, %v908_v27  ;;  %v7815_v37 = vpop.f32.mrf.mxu1 }
 0x11d   : > { %v1121_v38 = vsel %vm8800_vm9, %v1113_v53, %v1120_v30  ;;  %v1427_v39 = vsel %vm8806_vm10, %v1122_v31, %v1426_v5  ;;  %v911_v41 = vmax.f32 %v805_v32, 0.0  ;;  %v797_v42 = vadd.f32 %v8778_v25, %v796_v28 }
 0x11e   : > { %1425 = vst [vmem:[#allocation2 + $0x1c] sm:$0xf] %v1121_v38  ;;  %1428 = vst [vmem:[#allocation2 + $0x20] sm:$0x1] %v1427_v39  ;;  %v1103_v43 = vor.u32 %v1101_v7, %v1100_v33  ;;  %v1105_v44 = vrot.slane %v1100_v33, 4  ;;  %v8818_v46 = vrot.slane %v1141_v34, 7  ;;  %v809_v48 = vpop.f32.mrf.mxu1  ;;  %v818_v56 = vadd.f32 %v7815_v37, %v8778_v25 }
 0x11f   : > { %v1124_v47 = vshrl.u32 %v7322_v36, 16  ;;  %v7325_v50 = vpack.c.bf16 %v911_v41, %v911_v41  ;;  %v909_v52 = vmax.f32 %v797_v42, 0.0  ;;  %v1127_v59 = vshll.u32 %v7322_v36, 16  ;;  %v1440_v41 = vld [vmem:[#allocation2 + $0x38] sm:$0x1] }
 0x120   : > { %v1104_v53 = vsel %vm8800_vm9, %v1096_v0, %v1103_v43  ;;  %v1420_v54 = vsel %vm8806_vm10, %v1105_v44, %v1419_v40  ;;  %v1146_v55 = vor.u32 %v1144_v35, %v8818_v46  ;;  %v7816_v57 = vpop.f32.mrf.mxu1  ;;  %v1147_v62 = vrot.slane %v8818_v46, 4  ;;  %v1429_v0 = vld [vmem:[#allocation2 + $0x24] sm:$0xf] }
 0x121   : > { %1416 = vst [vmem:[#allocation2 + $0x10] sm:$0xf] %v1104_v53  ;;  %1421 = vst [vmem:[#allocation2 + $0x14] sm:$0x1] %v1420_v54  ;;  %v8826_v58 = vrot.slane %v1124_v47, 7  ;;  %v1149_v60 = vshrl.u32 %v7325_v50, 16  ;;  %v7323_v61 = vpack.c.bf16 %v909_v52, %v909_v52  ;;  %v810_v35 = vadd.f32 %v8778_v25, %v809_v48 }
 0x122   : > { %v1437_v63 = vsel %vm8784_vm7, %v1146_v55, %v1436_v49  ;;  %v812_v2 = vpop.f32.mrf.mxu1  ;;  %v1152_v29 = vshll.u32 %v7325_v50, 16  ;;  %v914_v30 = vmax.f32 %v818_v56, 0.0  ;;  %v821_v55 = vadd.f32 %v7816_v57, %v8778_v25 }
 0x123   : > { %v1529_v5 = vld [vmem:[#allocation2 + $0xc] sm:$0xf]  ;;  %1438 = vst [vmem:[#allocation2 + $0x30] sm:$0xf] %v1437_v63  ;;  %v1129_v26 = vor.u32 %v1127_v59, %v8826_v58  ;;  %v1151_v33 = vrot.slane %v1149_v60, 7  ;;  %v1132_v34 = vshrl.u32 %v7323_v61, 16  ;;  %v813_v56 = vadd.f32 %v8778_v25, %v812_v2 }
 0x124   : > { %v1602_v6 = vld [vmem:[#allocation2 + $0xc] sm:$0xf]  ;;  %1565 = vst [vmem:[#allocation3 + $0x8] sm:$0xf] %v1529_v5  ;;  %v7819_v31 = vpop.f32.mrf.mxu1  ;;  %v1130_v40 = vrot.slane %v8826_v58, 4  ;;  %v1135_v49 = vshll.u32 %v7323_v61, 16  ;;  %v7328_v54 = vpack.c.bf16 %v914_v30, %v914_v30 }
 0x125   : > { %v8831_v7 = vld [vmem:[#allocation2 + $0xc] sm:$0xe]  ;;  %v1681_v27 = vshrl.u32 %v1602_v6, 16  ;;  %v1684_v28 = vshll.u32 %v1602_v6, 16  ;;  %v1430_v32 = vsel %vm8784_vm7, %v1129_v26, %v1429_v0  ;;  %v1531_v36 = vld [vmem:[#allocation2 + $0x18] sm:$0xff]   ;;  %v1154_v44 = vor.u32 %v1152_v29, %v1151_v33 }
 0x126   : > { %1431 = vst [vmem:[#allocation2 + $0x24] sm:$0xf] %v1430_v32  ;;  %v825_v42 = vpop.f32.mrf.mxu1  ;;  %1567 = vst [vmem:[#allocation3 + $0x10] sm:$0xff] %v1531_v36   ;;  %v8839_v43 = vld [vmem:[#allocation2 + $0x1c] sm:$0xf]  ;;  %v1156_v46 = vrot.slane %v1151_v33, 4  ;;  %v834_v57 = vadd.f32 %v7819_v31, %v8778_v25 }
 0x127   : > { %v1683_v37 = vrot.slane %v1681_v27, 4  ;;  %v1686_v38 = vrot.slane %v1684_v28, 5  ;;  %v1134_v47 = vrot.slane %v1132_v34, 7  ;;  %v1155_v63 = vsel %vm8800_vm9, %v1147_v62, %v1154_v44  ;;  %v1433_v26 = vld [vmem:[#allocation2 + $0x2c] sm:$0x1] }
 0x128   : > { %v1530_v52 = vld [vmem:[#allocation2 + $0x10] sm:$0xf]  ;;  %v1604_v53 = vld [vmem:[#allocation2 + $0x14] sm:$0x1]  ;;  %v8843_v58 = vpop.f32.mrf.mxu1  ;;  %v912_v0 = vmax.f32 %v810_v35, 0.0  ;;  %v1718_v61 = vshrl.u32 %v8839_v43, 16  ;;  %v1441_v5 = vsel %vm8806_vm10, %v1156_v46, %v1440_v41  ;;  %v826_v62 = vadd.f32 %v8778_v25, %v825_v42 }
 0x129   : > { %v1687_v50 = vor.u32 %v1686_v38, %v1683_v37  ;;  %v1603_v48 = vld [vmem:[#allocation2 + $0x10] sm:$0xf]  ;;  %1566 = vst [vmem:[#allocation3 + $0xc] sm:$0xf] %v1530_v52  ;;  %1439 = vst [vmem:[#allocation2 + $0x34] sm:$0xf] %v1155_v63  ;;  %v1137_v6 = vor.u32 %v1135_v49, %v1134_v47 }
 0x12a   : > { %v1690_v59 = vshll.u32 %v1603_v48, 16  ;;  %v1694_v60 = vshrl.u32 %v1603_v48, 16  ;;  %v8851_v2 = vpop.f32.mrf.mxu1  ;;  %v1700_v29 = vshll.u32 %v1604_v53, 16  ;;  %1442 = vst [vmem:[#allocation2 + $0x38] sm:$0x1] %v1441_v5  ;;  %v1139_v34 = vrot.slane %v1134_v47, 4 }
 0x12b   : > { %v8856_v30 = vrot.slane %v1687_v50, 4  ;;  %v8858_v32 = vld [vmem:[#allocation2 + $0x10] sm:$0xf]  ;;  %v1138_v33 = vsel %vm8800_vm9, %v1130_v40, %v1137_v6  ;;  %v1175_v35 = vshrl.u32 %v7328_v54, 16  ;;  %v1178_v37 = vshll.u32 %v7328_v54, 16 }
 0x12c   : > { %v8853_v27 = vrot.slane %v1690_v59, 5  ;;  %v1696_v28 = vrot.slane %v1694_v60, 4  ;;  %v8862_v36 = vpop.f32.mrf.mxu1  ;;  %1432 = vst [vmem:[#allocation2 + $0x28] sm:$0xf] %v1138_v33  ;;  %v7326_v38 = vpack.c.bf16 %v912_v0, %v912_v0  ;;  %v915_v41 = vmax.f32 %v821_v55, 0.0 }
 0x12d   : > { %v1434_v42 = vsel %vm8806_vm10, %v1139_v34, %v1433_v26  ;;  %v1177_v44 = vrot.slane %v1175_v35, 7  ;;  %v913_v46 = vmax.f32 %v813_v56, 0.0  ;;  %v918_v49 = vmax.f32 %v834_v57, 0.0  ;;  %v1450_v47 = vld [vmem:[#allocation2 + $0x48] sm:$0xf]  ;;  %v8348_v56 = vld [vmem:[%s10213_s5 + $0xb0] sm:$0xff]  }
 0x12e   : > { %v1697_v31 = vor.u32 %v1696_v28, %v8853_v27  ;;  %v8867_v50 = vpop.f32.mrf.mxu1  ;;  %v8869_v52 = vrot.slane %v1700_v29, 5  ;;  %1435 = vst [vmem:[#allocation2 + $0x2c] sm:$0x1] %v1434_v42  ;;  %v1158_v48 = vshrl.u32 %v7326_v38, 16  ;;  %v7329_v53 = vpack.c.bf16 %v915_v41, %v915_v41  ;;  %v8343_v28 = vld [vmem:[#allocation3 + $0x10] sm:$0xff]  }
 0x12f   : > { %v1180_v54 = vor.u32 %v1178_v37, %v1177_v44  ;;  %v7327_v55 = vpack.c.bf16 %v913_v46, %v913_v46  ;;  %v7332_v60 = vpack.c.bf16 %v918_v49, %v918_v49  ;;  %v1161_v6 = vshll.u32 %v7326_v38, 16  ;;  %v1443_v34 = vld [vmem:[#allocation2 + $0x3c] sm:$0xf]  ;;  %v1454_v46 = vld [vmem:[#allocation2 + $0x50] sm:$0x1] }
 0x130   : > { %v8872_v59 = vrot.slane %v1697_v31, 4  ;;  %v8874_v63 = vpop.f32.mrf.mxu1  ;;  %v8341_v0 = vld [vmem:[#allocation3 + $0x8] sm:$0xff]   ;;  %v1160_v5 = vrot.slane %v1158_v48, 7  ;;  %v1183_v26 = vshrl.u32 %v7329_v53, 16  ;;  %v916_v57 = vmax.f32 %v826_v62, 0.0  ;;  %v1535_v37 = vld [vmem:[#allocation2 + $0x30] sm:$0xff]  }
 0x131   : > { %v1181_v29 = vrot.slane %v1177_v44, 4  ;;  %v1451_v33 = vsel %vm8784_vm7, %v1180_v54, %v1450_v47  ;;  %v1186_v35 = vshll.u32 %v7329_v53, 16  ;;  %v1166_v31 = vshrl.u32 %v7327_v55, 16  ;;  %7854 = vmatmul.mubr.bf16.vlgmr.msra.gmra.mxu0 %v8341_v0  ;;  %1571 = vst [vmem:[#allocation3 + $0x20] sm:$0xff] %v1535_v37   ;;  %v1447_v38 = vld [vmem:[#allocation2 + $0x44] sm:$0x1] }
 0x132   : > { %1452 = vst [vmem:[#allocation2 + $0x48] sm:$0xf] %v1451_v33  ;;  %v1163_v41 = vor.u32 %v1161_v6, %v1160_v5  ;;  %v1185_v42 = vrot.slane %v1183_v26, 7  ;;  %v1169_v49 = vshll.u32 %v7327_v55, 16  ;;  %v1209_v39 = vshrl.u32 %v7332_v60, 16  ;;  %v844_v48 = vpop.f32.mrf.mxu1  ;;  %7857 = vmatprep.mubr.bf16.mxu0 %v8343_v28  ;;  %7934 = vmatpush3.bf16.msra.mxu0 %v8740_v8  ;;  %v8353_v0 = vld [vmem:[%s10213_s5 + $0xa8] sm:$0xff]  }
 0x133   : > { %v1168_v62 = vrot.slane %v1166_v31, 7  ;;  %v1212_v44 = vshll.u32 %v7332_v60, 16  ;;  %v7330_v47 = vpack.c.bf16 %v916_v57, %v916_v57  ;;  %v837_v53 = vadd.f32 %v8843_v58, %v8778_v25  ;;  %v1533_v54 = vld [vmem:[#allocation2 + $0x24] sm:$0xff]   ;;  %7935 = vmatprep.subr.bf16.mxu0 %v8348_v56  ;;  %v1464_v33 = vld [vmem:[#allocation2 + $0x60] sm:$0xf] }
 0x134   : > { %v1444_v55 = vsel %vm8784_vm7, %v1163_v41, %v1443_v34  ;;  %v1188_v6 = vor.u32 %v1186_v35, %v1185_v42  ;;  %v1190_v26 = vrot.slane %v1185_v42, 4  ;;  %v8889_v8 = vrot.slane %v1209_v39, 7  ;;  %1569 = vst [vmem:[#allocation3 + $0x18] sm:$0xff] %v1533_v54   ;;  %v7827_v35 = vpop.f32.mrf.mxu1 }
 0x135   : > { %v1164_v28 = vrot.slane %v1160_v5, 4  ;;  %1445 = vst [vmem:[#allocation2 + $0x3c] sm:$0xf] %v1444_v55  ;;  %v1171_v60 = vor.u32 %v1169_v49, %v1168_v62  ;;  %v1173_v57 = vrot.slane %v1168_v62, 4  ;;  %v1192_v58 = vshrl.u32 %v7330_v47, 16 }
 0x136   : > { %v1189_v31 = vsel %vm8800_vm9, %v1181_v29, %v1188_v6  ;;  %v1455_v37 = vsel %vm8806_vm10, %v1190_v26, %v1454_v46  ;;  %v1214_v40 = vor.u32 %v1212_v44, %v8889_v8  ;;  %v1195_v34 = vshll.u32 %v7330_v47, 16  ;;  %7936 = vmatpush3.bf16.msra.mxu0 %v8348_v56  ;;  %v8358_v29 = vld [vmem:[%s10213_s5 + $0xa0] sm:$0xff]   ;;  %v1457_v46 = vld [vmem:[#allocation2 + $0x54] sm:$0xf]  ;;  %v857_v26 = vpop.f32.mrf.mxu1 }
 0x137   : > { %1453 = vst [vmem:[#allocation2 + $0x4c] sm:$0xf] %v1189_v31  ;;  %1456 = vst [vmem:[#allocation2 + $0x50] sm:$0x1] %v1455_v37  ;;  %v1172_v39 = vsel %vm8800_vm9, %v1164_v28, %v1171_v60  ;;  %v1448_v5 = vsel %vm8806_vm10, %v1173_v57, %v1447_v38  ;;  %v8900_v41 = vrot.slane %v1192_v58, 7  ;;  %v919_v42 = vmax.f32 %v837_v53, 0.0  ;;  %7937 = vmatprep.subr.bf16.mxu0 %v8353_v0 }
 0x138   : > { %1446 = vst [vmem:[#allocation2 + $0x40] sm:$0xf] %v1172_v39  ;;  %1449 = vst [vmem:[#allocation2 + $0x44] sm:$0x1] %v1448_v5  ;;  %v1465_v56 = vsel %vm8784_vm7, %v1214_v40, %v1464_v33  ;;  %v829_v49 = vadd.f32 %v8778_v25, %v8851_v2  ;;  %v850_v62 = vadd.f32 %v8862_v36, %v8778_v25  ;;  %v1215_v44 = vrot.slane %v8889_v8, 4  ;;  %v8363_v36 = vld [vmem:[%s10213_s5 + $0x98] sm:$0xff]  }
 0x139   : > { %v842_v38 = vadd.f32 %v8778_v25, %v8867_v50  ;;  %1466 = vst [vmem:[#allocation2 + $0x60] sm:$0xf] %v1465_v56  ;;  %v1197_v47 = vor.u32 %v1195_v34, %v8900_v41  ;;  %v7333_v53 = vpack.c.bf16 %v919_v42, %v919_v42  ;;  %v853_v54 = vadd.f32 %v8874_v63, %v8778_v25  ;;  %v8349_v31 = vld [vmem:[#allocation3 + $0x20] sm:$0xff]   ;;  %v1468_v39 = vld [vmem:[#allocation2 + $0x68] sm:$0x1] }
 0x13a   : > { %v917_v40 = vmax.f32 %v829_v49, 0.0  ;;  %v922_v55 = vmax.f32 %v850_v62, 0.0  ;;  %v845_v2 = vadd.f32 %v8778_v25, %v844_v48  ;;  %7938 = vmatpush3.bf16.msra.mxu0 %v8353_v0  ;;  %v1198_v50 = vrot.slane %v8900_v41, 4 }
 0x13b   : > { %v920_v6 = vmax.f32 %v842_v38, 0.0  ;;  %v1458_v8 = vsel %vm8784_vm7, %v1197_v47, %v1457_v46  ;;  %v1217_v28 = vshrl.u32 %v7333_v53, 16  ;;  %v923_v60 = vmax.f32 %v853_v54, 0.0  ;;  %v8346_v57 = vld [vmem:[#allocation3 + $0x18] sm:$0xff]   ;;  %7939 = vmatprep.subr.bf16.mxu0 %v8358_v29  ;;  %v7828_v46 = vpop.f32.mrf.mxu1 }
 0x13c   : > { %1459 = vst [vmem:[#allocation2 + $0x54] sm:$0xf] %v1458_v8  ;;  %v1220_v63 = vshll.u32 %v7333_v53, 16  ;;  %v7331_v33 = vpack.c.bf16 %v917_v40, %v917_v40  ;;  %v7336_v58 = vpack.c.bf16 %v922_v55, %v922_v55  ;;  %v921_v34 = vmax.f32 %v845_v2, 0.0  ;;  %7858 = vmatmul.mubr.bf16.gmra.mxu0 %v8346_v57  ;;  %v8368_v40 = vld [vmem:[%s10213_s5 + $0x90] sm:$0xff]  }
 0x13d   : > { %v7334_v48 = vpack.c.bf16 %v920_v6, %v920_v6  ;;  %v1219_v0 = vrot.slane %v1217_v28, 7  ;;  %v7337_v37 = vpack.c.bf16 %v923_v60, %v923_v60  ;;  %v866_v42 = vadd.f32 %v7827_v35, %v8778_v25  ;;  %7861 = vmatprep.mubr.bf16.mxu0 %v8349_v31  ;;  %v1461_v8 = vld [vmem:[#allocation2 + $0x5c] sm:$0x1]  ;;  %v1478_v28 = vld [vmem:[#allocation2 + $0x78] sm:$0xf] }
 0x13e   : > { %v1200_v5 = vshrl.u32 %v7331_v33, 16  ;;  %v1243_v41 = vshrl.u32 %v7336_v58, 16  ;;  %v8926_v56 = vadd.f32 %v8778_v25, %v857_v26  ;;  %7940 = vmatpush3.bf16.msra.mxu0 %v8358_v29  ;;  %v1203_v38 = vshll.u32 %v7331_v33, 16  ;;  %v1539_v54 = vld [vmem:[#allocation2 + $0x48] sm:$0xff]  }
 0x13f   : > { %v1222_v49 = vor.u32 %v1220_v63, %v1219_v0  ;;  %v1224_v62 = vrot.slane %v1219_v0, 4  ;;  %v1226_v47 = vshrl.u32 %v7334_v48, 16  ;;  %v1537_v53 = vld [vmem:[#allocation2 + $0x3c] sm:$0xff]   ;;  %7941 = vmatprep.subr.bf16.mxu0 %v8363_v36  ;;  %v1246_v35 = vshll.u32 %v7336_v58, 16  ;;  %1575 = vst [vmem:[#allocation3 + $0x30] sm:$0xff] %v1539_v54  }
 0x140   : > { %v1202_v55 = vrot.slane %v1200_v5, 7  ;;  %v1245_v6 = vrot.slane %v1243_v41, 7  ;;  %v1251_v2 = vshrl.u32 %v7337_v37, 16  ;;  %1573 = vst [vmem:[#allocation3 + $0x28] sm:$0xff] %v1537_v53   ;;  %v1229_v57 = vshll.u32 %v7334_v48, 16  ;;  %v860_v5 = vpop.f32.mrf.mxu1 }
 0x141   : > { %v1223_v29 = vsel %vm8800_vm9, %v1215_v44, %v1222_v49  ;;  %v1469_v26 = vsel %vm8806_vm10, %v1224_v62, %v1468_v39  ;;  %v8935_v60 = vrot.slane %v1226_v47, 7  ;;  %v1471_v58 = vld [vmem:[#allocation2 + $0x6c] sm:$0xf]  ;;  %v1254_v0 = vshll.u32 %v7337_v37, 16 }
 0x142   : > { %1467 = vst [vmem:[#allocation2 + $0x64] sm:$0xf] %v1223_v29  ;;  %1470 = vst [vmem:[#allocation2 + $0x68] sm:$0x1] %v1469_v26  ;;  %v1205_v63 = vor.u32 %v1203_v38, %v1202_v55  ;;  %v1207_v33 = vrot.slane %v1202_v55, 4  ;;  %v1248_v31 = vor.u32 %v1246_v35, %v1245_v6  ;;  %7942 = vmatpush3.bf16.msra.mxu0 %v8363_v36  ;;  %v1249_v41 = vrot.slane %v1245_v6, 4 }
 0x143   : > { %v1231_v44 = vor.u32 %v1229_v57, %v8935_v60  ;;  %v1253_v49 = vrot.slane %v1251_v2, 7  ;;  %v7335_v53 = vpack.c.bf16 %v921_v34, %v921_v34  ;;  %7943 = vmatprep.subr.bf16.mxu0 %v8368_v40  ;;  %v8375_v39 = vld [vmem:[%s10213_s5 + $0x88] sm:$0xff]   ;;  %v1482_v36 = vld [vmem:[#allocation2 + $0x80] sm:$0x1]  ;;  %v926_v38 = vmax.f32 %v866_v42, 0.0 }
 0x144   : > { %v1206_v48 = vsel %vm8800_vm9, %v1198_v50, %v1205_v63  ;;  %v1462_v62 = vsel %vm8806_vm10, %v1207_v33, %v1461_v8  ;;  %v1479_v37 = vsel %vm8784_vm7, %v1248_v31, %v1478_v28  ;;  %v8952_v50 = vld [vmem:[%s10213_s5 + $0x80] sm:$0xff]   ;;  %v8954_v6 = vld [vmem:[#allocation2 + $0x14] sm:$0x1]  ;;  %v924_v29 = vmax.f32 %v8926_v56, 0.0  ;;  %v7831_v8 = vpop.f32.mrf.mxu1 }
 0x145   : > { %1460 = vst [vmem:[#allocation2 + $0x58] sm:$0xf] %v1206_v48  ;;  %1463 = vst [vmem:[#allocation2 + $0x5c] sm:$0x1] %v1462_v62  ;;  %v1472_v34 = vsel %vm8784_vm7, %v1231_v44, %v1471_v58  ;;  %v1256_v47 = vor.u32 %v1254_v0, %v1253_v49  ;;  %v1258_v54 = vrot.slane %v1253_v49, 4  ;;  %v1234_v55 = vshrl.u32 %v7335_v53, 16 }
 0x146   : > { %1480 = vst [vmem:[#allocation2 + $0x78] sm:$0xf] %v1479_v37  ;;  %1473 = vst [vmem:[#allocation2 + $0x6c] sm:$0xf] %v1472_v34  ;;  %v1237_v35 = vshll.u32 %v7335_v53, 16  ;;  %v7340_v42 = vpack.c.bf16 %v926_v38, %v926_v38  ;;  %v869_v26 = vadd.f32 %v7828_v46, %v8778_v25  ;;  %7944 = vmatpush3.bf16.msra.mxu0 %v8368_v40  ;;  %v1232_v58 = vrot.slane %v8935_v60, 4 }
 0x147   : > { %v1475_v2 = vld [vmem:[#allocation2 + $0x74] sm:$0x1]  ;;  %v1257_v28 = vsel %vm8800_vm9, %v1249_v41, %v1256_v47  ;;  %v1483_v57 = vsel %vm8806_vm10, %v1258_v54, %v1482_v36  ;;  %v1236_v63 = vrot.slane %v1234_v55, 7  ;;  %v861_v33 = vadd.f32 %v8778_v25, %v860_v5  ;;  %v8352_v31 = vld [vmem:[#allocation3 + $0x28] sm:$0xff]   ;;  %7945 = vmatprep.subr.bf16.mxu0 %v8375_v39  ;;  %v8354_v44 = vld [vmem:[#allocation3 + $0x30] sm:$0xff]   ;;  %v8971_v36 = vpop.f32.mrf.mxu1 }
 0x148   : > { %1481 = vst [vmem:[#allocation2 + $0x7c] sm:$0xf] %v1257_v28  ;;  %1484 = vst [vmem:[#allocation2 + $0x80] sm:$0x1] %v1483_v57  ;;  %v1277_v56 = vshrl.u32 %v7340_v42, 16  ;;  %v7338_v0 = vpack.c.bf16 %v924_v29, %v924_v29  ;;  %v927_v46 = vmax.f32 %v869_v26, 0.0  ;;  %v1693_v48 = vsel %vm8726_vm2, %v8856_v30, %v8853_v27  ;;  %7862 = vmatmul.mubr.bf16.gmra.mxu0 %v8352_v31 }
 0x149   : > { %v1239_v40 = vor.u32 %v1237_v35, %v1236_v63  ;;  %v1241_v49 = vrot.slane %v1236_v63, 4  ;;  %v1492_v53 = vld [vmem:[#allocation2 + $0x90] sm:$0xf]  ;;  %v925_v41 = vmax.f32 %v861_v33, 0.0  ;;  %v2284_v5 = vrot.slane %v8954_v6, 5  ;;  %7865 = vmatprep.mubr.bf16.mxu0 %v8354_v44  ;;  %v1543_v38 = vld [vmem:[#allocation2 + $0x60] sm:$0xff]   ;;  %v7832_v44 = vpop.f32.mrf.mxu1 }
 0x14a   : > { %v8969_v62 = vrot.slane %v1277_v56, 7  ;;  %v1280_v60 = vshll.u32 %v7340_v42, 16  ;;  %v1260_v37 = vshrl.u32 %v7338_v0, 16  ;;  %2127 = vst [vmem:[#allocation3 + $0x98] sm:$0xf] %v1693_v48  ;;  %7946 = vmatpush3.bf16.msra.mxu0 %v8375_v39  ;;  %v7341_v27 = vpack.c.bf16 %v927_v46, %v927_v46  ;;  %1579 = vst [vmem:[#allocation3 + $0x40] sm:$0xff] %v1543_v38  }
 0x14b   : > { %v1240_v34 = vsel %vm8800_vm9, %v1232_v58, %v1239_v40  ;;  %v1476_v47 = vsel %vm8806_vm10, %v1241_v49, %v1475_v2  ;;  %v7339_v30 = vpack.c.bf16 %v925_v41, %v925_v41  ;;  %7947 = vmatprep.subr.bf16.mxu0 %v8952_v50  ;;  %v8389_v54 = vld [vmem:[%s10213_s5 + $0x138] sm:$0xff]   ;;  %v1263_v42 = vshll.u32 %v7338_v0, 16  ;;  %v1485_v28 = vld [vmem:[#allocation2 + $0x84] sm:$0xf]  ;;  %v1489_v40 = vld [vmem:[#allocation2 + $0x8c] sm:$0x1] }
 0x14c   : > { %v1605_v55 = vld [vmem:[#allocation2 + $0x18] sm:$0xf]  ;;  %1474 = vst [vmem:[#allocation2 + $0x70] sm:$0xf] %v1240_v34  ;;  %1477 = vst [vmem:[#allocation2 + $0x74] sm:$0x1] %v1476_v47  ;;  %v1282_v39 = vor.u32 %v1280_v60, %v8969_v62  ;;  %v1703_v2 = vsel %vm8726_vm2, %v8872_v59, %v8869_v52  ;;  %v882_v46 = vadd.f32 %v7831_v8, %v8778_v25 }
 0x14d   : > { %v1262_v35 = vrot.slane %v1260_v37, 7  ;;  %v1541_v29 = vld [vmem:[#allocation2 + $0x54] sm:$0xff]   ;;  %v1283_v26 = vrot.slane %v8969_v62, 4  ;;  %v1285_v57 = vshrl.u32 %v7341_v27, 16  ;;  %v1288_v63 = vshll.u32 %v7341_v27, 16 }
 0x14e   : > { %v1268_v33 = vshrl.u32 %v7339_v30, 16  ;;  %2128 = vst [vmem:[#allocation3 + $0x9c] sm:$0xf] %v1703_v2  ;;  %1577 = vst [vmem:[#allocation3 + $0x38] sm:$0xff] %v1541_v29   ;;  %v1493_v31 = vsel %vm8784_vm7, %v1282_v39, %v1492_v53  ;;  %v1496_v56 = vld [vmem:[#allocation2 + $0x98] sm:$0x1]  ;;  %7948 = vmatpush3.bf16.msra.mxu0 %v8952_v50 }
 0x14f   : > { %v1265_v58 = vor.u32 %v1263_v42, %v1262_v35  ;;  %v1271_v0 = vshll.u32 %v7339_v30, 16  ;;  %1494 = vst [vmem:[#allocation2 + $0x90] sm:$0xf] %v1493_v31  ;;  %v1287_v52 = vrot.slane %v1285_v57, 7  ;;  %v1705_v49 = vshrl.u32 %v1605_v55, 16  ;;  %8029 = vmatprep.subr.bf16.mxu0 %v8389_v54  ;;  %v1547_v38 = vld [vmem:[#allocation2 + $0x78] sm:$0xff]  }
 0x150   : > { %v1270_v59 = vrot.slane %v1268_v33, 7  ;;  %v1708_v41 = vshll.u32 %v1605_v55, 16  ;;  %v1266_v48 = vrot.slane %v1262_v35, 4  ;;  %v930_v53 = vmax.f32 %v882_v46, 0.0  ;;  %v1607_v60 = vld [vmem:[#allocation2 + $0x20] sm:$0x1]  ;;  %v876_v35 = vpop.f32.mrf.mxu1 }
 0x151   : > { %v1486_v62 = vsel %vm8784_vm7, %v1265_v58, %v1485_v28  ;;  %v1714_v37 = vshll.u32 %v8839_v43, 16  ;;  %v8994_v8 = vld [vmem:[#allocation2 + $0x24] sm:$0xf]  ;;  %v1290_v50 = vor.u32 %v1288_v63, %v1287_v52  ;;  %v1292_v34 = vrot.slane %v1287_v52, 4  ;;  %1583 = vst [vmem:[#allocation3 + $0x50] sm:$0xff] %v1547_v38   ;;  %v8373_v42 = vld [vmem:[%s10213_s5 + $0xf0] sm:$0xff]  }
 0x152   : > { %1487 = vst [vmem:[#allocation2 + $0x84] sm:$0xf] %v1486_v62  ;;  %v1273_v47 = vor.u32 %v1271_v0, %v1270_v59  ;;  %v1275_v27 = vrot.slane %v1270_v59, 4  ;;  %v7344_v30 = vpack.c.bf16 %v930_v53, %v930_v53  ;;  %v1707_v55 = vrot.slane %v1705_v49, 4  ;;  %v8999_v2 = vld [vmem:[#allocation2 + $0x34] sm:$0xf] }
 0x153   : > { %v1710_v54 = vrot.slane %v1708_v41, 5  ;;  %v1716_v39 = vrot.slane %v1714_v37, 5  ;;  %v1291_v29 = vsel %vm8800_vm9, %v1283_v26, %v1290_v50  ;;  %v1497_v28 = vsel %vm8806_vm10, %v1292_v34, %v1496_v56  ;;  %v1545_v33 = vld [vmem:[#allocation2 + $0x6c] sm:$0xff]   ;;  %v8359_v43 = vld [vmem:[#allocation3 + $0x40] sm:$0xff]  }
 0x154   : > { %v1274_v57 = vsel %vm8800_vm9, %v1266_v48, %v1273_v47  ;;  %v1490_v63 = vsel %vm8806_vm10, %v1275_v27, %v1489_v40  ;;  %1495 = vst [vmem:[#allocation2 + $0x94] sm:$0xf] %v1291_v29  ;;  %1498 = vst [vmem:[#allocation2 + $0x98] sm:$0x1] %v1497_v28  ;;  %v1311_v58 = vshrl.u32 %v7344_v30, 16  ;;  %v1314_v0 = vshll.u32 %v7344_v30, 16  ;;  %v7835_v29 = vpop.f32.mrf.mxu1 }
 0x155   : > { %1488 = vst [vmem:[#allocation2 + $0x88] sm:$0xf] %v1274_v57  ;;  %1491 = vst [vmem:[#allocation2 + $0x8c] sm:$0x1] %v1490_v63  ;;  %v8350_v31 = vld [vmem:[#allocation3 + $0x98] sm:$0xff]   ;;  %v1711_v46 = vor.u32 %v1710_v54, %v1707_v55  ;;  %v1720_v26 = vrot.slane %v1718_v61, 4  ;;  %v874_v52 = vadd.f32 %v8778_v25, %v8971_v36  ;;  %v885_v59 = vadd.f32 %v7832_v44, %v8778_v25 }
 0x156   : > { %1581 = vst [vmem:[#allocation3 + $0x48] sm:$0xff] %v1545_v33   ;;  %v1724_v56 = vshll.u32 %v1607_v60, 16  ;;  %v877_v40 = vadd.f32 %v8778_v25, %v876_v35  ;;  %v8357_v49 = vld [vmem:[#allocation3 + $0x38] sm:$0xff]   ;;  %7902 = vmatmul.mubr.bf16.vlgmr.msra.gmra.mxu1 %v8350_v31  ;;  %v9015_v41 = vrot.slane %v1311_v58, 7  ;;  %v1506_v48 = vld [vmem:[#allocation2 + $0xa8] sm:$0xf] }
 0x157   : > { %v1712_v62 = vrot.slane %v1711_v46, 4  ;;  %v1721_v53 = vor.u32 %v1720_v26, %v1716_v39  ;;  %v1729_v37 = vshrl.u32 %v8994_v8, 16  ;;  %v1766_v61 = vshrl.u32 %v8999_v2, 16  ;;  %v9019_v36 = vld [vmem:[#allocation2 + $0x28] sm:$0xf]  ;;  %7866 = vmatmul.mubr.bf16.gmra.mxu0 %v8357_v49  ;;  %7982 = vmatpush3.bf16.msra.mxu1 %v8792_v51  ;;  %v9037_v63 = vld [vmem:[%s10213_s5 + $0xe0] sm:$0xff]  }
 0x158   : > { %v928_v60 = vmax.f32 %v874_v52, 0.0  ;;  %v931_v38 = vmax.f32 %v885_v59, 0.0  ;;  %v929_v50 = vmax.f32 %v877_v40, 0.0  ;;  %v1316_v25 = vor.u32 %v1314_v0, %v9015_v41  ;;  %7869 = vmatprep.mubr.bf16.mxu0 %v8359_v43  ;;  %7983 = vmatprep.subr.bf16.mxu1 %v8373_v42  ;;  %v8378_v27 = vld [vmem:[%s10213_s5 + $0xe8] sm:$0xff]   ;;  %v1499_v26 = vld [vmem:[#allocation2 + $0x9c] sm:$0xf] }
 0x159   : > { %v1717_v44 = vsel %vm8726_vm2, %v1712_v62, %v1716_v39  ;;  %v1722_v34 = vrot.slane %v1721_v53, 4  ;;  %v1726_v47 = vrot.slane %v1724_v56, 5  ;;  %v1731_v35 = vrot.slane %v1729_v37, 4  ;;  %v9040_v46 = vld [vmem:[#allocation2 + $0x2c] sm:$0x1]  ;;  %v889_v37 = vpop.f32.mrf.mxu1 }
 0x15a   : > { %2129 = vst [vmem:[#allocation3 + $0xa0] sm:$0xf] %v1717_v44  ;;  %v7342_v30 = vpack.c.bf16 %v928_v60, %v928_v60  ;;  %v7345_v55 = vpack.c.bf16 %v931_v38, %v931_v38  ;;  %v7343_v54 = vpack.c.bf16 %v929_v50, %v929_v50  ;;  %v1507_v51 = vsel %vm8784_vm7, %v1316_v25, %v1506_v48  ;;  %v1503_v62 = vld [vmem:[#allocation2 + $0xa4] sm:$0x1]  ;;  %v9047_v38 = vld [vmem:[%s10210_s2] ss:$0 sm:$0xff] }
 0x15b   : > { %v1727_v39 = vsel %vm8726_vm2, %v1722_v34, %v1726_v47  ;;  %v1732_v28 = vshll.u32 %v8994_v8, 16  ;;  %v1738_v57 = vshll.u32 %v9019_v36, 16  ;;  %v1317_v33 = vrot.slane %v9015_v41, 4  ;;  %1508 = vst [vmem:[#allocation2 + $0xa8] sm:$0xf] %v1507_v51  ;;  %7984 = vmatpush3.bf16.msra.mxu1 %v8373_v42  ;;  %v1551_v34 = vld [vmem:[#allocation2 + $0x90] sm:$0xff]  }
 0x15c   : > { %2130 = vst [vmem:[#allocation3 + $0xa4] sm:$0xf] %v1727_v39  ;;  %v1294_v31 = vshrl.u32 %v7342_v30, 16  ;;  %v1297_v58 = vshll.u32 %v7342_v30, 16  ;;  %v1319_v0 = vshrl.u32 %v7345_v55, 16  ;;  %v1322_v56 = vshll.u32 %v7345_v55, 16  ;;  %7985 = vmatprep.subr.bf16.mxu1 %v8378_v27 }
 0x15d   : > { %v1510_v8 = vld [vmem:[#allocation2 + $0xb0] sm:$0x1]  ;;  %v1302_v52 = vshrl.u32 %v7343_v54, 16  ;;  %v1305_v59 = vshll.u32 %v7343_v54, 16  ;;  %v1734_v40 = vrot.slane %v1732_v28, 5  ;;  %v1740_v53 = vrot.slane %v1738_v57, 5 }
 0x15e   : > { %v1296_v49 = vrot.slane %v1294_v31, 7  ;;  %v1321_v48 = vrot.slane %v1319_v0, 7  ;;  %v1742_v41 = vshrl.u32 %v9019_v36, 16  ;;  %v1748_v42 = vshll.u32 %v9040_v46, 16  ;;  %v8362_v25 = vld [vmem:[#allocation3 + $0x48] sm:$0xff]   ;;  %v8364_v51 = vld [vmem:[#allocation3 + $0x50] sm:$0xff]  }
 0x15f   : > { %v1304_v43 = vrot.slane %v1302_v52, 7  ;;  %v1735_v60 = vor.u32 %v1734_v40, %v1731_v35  ;;  %v898_v50 = vadd.f32 %v9047_v38, %v7835_v29  ;;  %v1549_v44 = vld [vmem:[#allocation2 + $0x84] sm:$0xff]   ;;  %v1611_v47 = vld [vmem:[#allocation2 + $0x30] sm:$0xf]  ;;  %1587 = vst [vmem:[#allocation3 + $0x60] sm:$0xff] %v1551_v34   ;;  %7986 = vmatpush3.bf16.msra.mxu1 %v8378_v27  ;;  %7870 = vmatmul.mubr.bf16.gmra.mxu0 %v8362_v25  ;;  %v8384_v29 = vld [vmem:[%s10213_s5 + $0xd8] sm:$0xff]  }
 0x160   : > { %v1299_v30 = vor.u32 %v1297_v58, %v1296_v49  ;;  %v1300_v36 = vrot.slane %v1296_v49, 4  ;;  %v1324_v55 = vor.u32 %v1322_v56, %v1321_v48  ;;  %v1326_v54 = vrot.slane %v1321_v48, 4  ;;  %1585 = vst [vmem:[#allocation3 + $0x58] sm:$0xff] %v1549_v44   ;;  %7987 = vmatprep.subr.bf16.mxu1 %v9037_v63  ;;  %v7836_v56 = vpop.f32.mrf.mxu1  ;;  %7873 = vmatprep.mubr.bf16.mxu0 %v8364_v51  ;;  %v9078_v34 = vld [vmem:[#allocation2 + $0x4c] sm:$0xf] }
 0x161   : > { %v1307_v35 = vor.u32 %v1305_v59, %v1304_v43  ;;  %v1309_v39 = vrot.slane %v1304_v43, 4  ;;  %v1736_v28 = vrot.slane %v1735_v60, 4  ;;  %v1744_v57 = vrot.slane %v1742_v41, 4  ;;  %v9070_v60 = vld [vmem:[#allocation2 + $0x3c] sm:$0xf] }
 0x162   : > { %v10224_v31 = vrot.slane %v8858_v32, 5  ;;  %v1500_v0 = vsel %vm8784_vm7, %v1299_v30, %v1499_v26  ;;  %v1325_v27 = vsel %vm8800_vm9, %v1317_v33, %v1324_v55  ;;  %v1511_v46 = vsel %vm8806_vm10, %v1326_v54, %v1510_v8  ;;  %v1613_v8 = vld [vmem:[#allocation2 + $0x38] sm:$0x1]  ;;  %v892_v55 = vpop.f32.mrf.mxu1 }
 0x163   : > { %v8351_v52 = vld [vmem:[#allocation3 + $0xa0] sm:$0xff]   ;;  %1501 = vst [vmem:[#allocation2 + $0x9c] sm:$0xf] %v1500_v0  ;;  %1509 = vst [vmem:[#allocation2 + $0xac] sm:$0xf] %v1325_v27  ;;  %v1308_v59 = vsel %vm8800_vm9, %v1300_v36, %v1307_v35  ;;  %v1504_v40 = vsel %vm8806_vm10, %v1309_v39, %v1503_v62  ;;  %v1741_v26 = vsel %vm8726_vm2, %v1736_v28, %v1740_v53  ;;  %v934_v33 = vmax.f32 %v898_v50, 0.0 }
 0x164   : > { %v2283_v58 = vrot.slane %v10224_v31, 4  ;;  %1512 = vst [vmem:[#allocation2 + $0xb0] sm:$0x1] %v1511_v46  ;;  %v1745_v49 = vor.u32 %v1744_v57, %v1740_v53  ;;  %1502 = vst [vmem:[#allocation2 + $0xa0] sm:$0xf] %v1308_v59  ;;  %v1753_v48 = vshrl.u32 %v1611_v47, 16  ;;  %7988 = vmatpush3.bf16.msra.mxu1 %v9037_v63  ;;  %7905 = vmatprep.mubr.bf16.mxu1 %v8351_v52 }
 0x165   : > { %1505 = vst [vmem:[#allocation2 + $0xa4] sm:$0x1] %v1504_v40  ;;  %2131 = vst [vmem:[#allocation3 + $0xa8] sm:$0xf] %v1741_v26  ;;  %v1756_v41 = vshll.u32 %v1611_v47, 16  ;;  %v1762_v43 = vshll.u32 %v8999_v2, 16  ;;  %v890_v53 = vadd.f32 %v9047_v38, %v889_v37  ;;  %7989 = vmatprep.subr.bf16.mxu1 %v8384_v29  ;;  %v7348_v47 = vpack.c.bf16 %v934_v33, %v934_v33 }
 0x166   : > { %v1746_v25 = vrot.slane %v1745_v49, 4  ;;  %v1750_v62 = vrot.slane %v1748_v42, 5  ;;  %v1768_v44 = vrot.slane %v1766_v61, 4  ;;  %v8386_v50 = vld [vmem:[%s10213_s5 + $0xd0] sm:$0xff]   ;;  %v1755_v30 = vrot.slane %v1753_v48, 4  ;;  %v9086_v37 = vld [vmem:[%s10213_s5 + $0xc8] sm:$0xff]  }
 0x167   : > { %v1758_v63 = vrot.slane %v1756_v41, 5  ;;  %v1764_v36 = vrot.slane %v1762_v43, 5  ;;  %v1772_v54 = vshll.u32 %v1613_v8, 16  ;;  %v932_v2 = vmax.f32 %v890_v53, 0.0  ;;  %v8367_v57 = vld [vmem:[#allocation3 + $0x58] sm:$0xff]   ;;  %v8369_v31 = vld [vmem:[#allocation3 + $0x60] sm:$0xff]  }
 0x168   : > { %v1751_v42 = vsel %vm8726_vm2, %v1746_v25, %v1750_v62  ;;  %v901_v61 = vadd.f32 %v9047_v38, %v7836_v56  ;;  %v1345_v51 = vshrl.u32 %v7348_v47, 16  ;;  %v1348_v35 = vshll.u32 %v7348_v47, 16  ;;  %7990 = vmatpush3.bf16.msra.mxu1 %v8384_v29  ;;  %v1520_v40 = vld [vmem:[#allocation2 + $0xc0] sm:$0xf]  ;;  %7874 = vmatmul.mubr.bf16.gmra.mxu0 %v8367_v57 }
 0x169   : > { %2132 = vst [vmem:[#allocation3 + $0xac] sm:$0xf] %v1751_v42  ;;  %v1759_v39 = vor.u32 %v1758_v63, %v1755_v30  ;;  %v1769_v28 = vor.u32 %v1768_v44, %v1764_v36  ;;  %v7346_v0 = vpack.c.bf16 %v932_v2, %v932_v2  ;;  %v893_v46 = vadd.f32 %v9047_v38, %v892_v55  ;;  %v1615_v44 = vld [vmem:[#allocation2 + $0x40] sm:$0xf]  ;;  %v1513_v30 = vld [vmem:[#allocation2 + $0xb4] sm:$0xf] }
 0x16a   : > { %v935_v27 = vmax.f32 %v901_v61, 0.0  ;;  %v1777_v52 = vshrl.u32 %v9070_v60, 16  ;;  %7991 = vmatprep.subr.bf16.mxu1 %v8386_v50  ;;  %v9096_v59 = vrot.slane %v1345_v51, 7  ;;  %v10227_v29 = vrot.slane %v8858_v32, 5  ;;  %7877 = vmatprep.mubr.bf16.mxu0 %v8369_v31  ;;  %v1555_v53 = vld [vmem:[#allocation2 + $0xa8] sm:$0xff]   ;;  %v8502_v56 = vld [vmem:[%s10213_s5 + $0x220] sm:$0xff]  }
 0x16b   : > { %v1760_v26 = vrot.slane %v1759_v39, 4  ;;  %v10228_v49 = vrot.slane %v8831_v7, 9  ;;  %v2285_v33 = vsel %vm9092_vm13, %v2283_v58, %v2284_v5  ;;  %v1814_v8 = vshrl.u32 %v9078_v34, 16  ;;  %v1553_v6 = vld [vmem:[#allocation2 + $0x9c] sm:$0xff]   ;;  %1591 = vst [vmem:[#allocation3 + $0x70] sm:$0xff] %v1555_v53  }
 0x16c   : > { %v1770_v48 = vrot.slane %v1769_v28, 4  ;;  %v1774_v41 = vrot.slane %v1772_v54, 5  ;;  %v1328_v43 = vshrl.u32 %v7346_v0, 16  ;;  %2438 = vst [vmem:[#allocation3 + $0x12c] sm:$0xf] %v2285_v33  ;;  %v1350_v32 = vor.u32 %v1348_v35, %v9096_v59  ;;  %7992 = vmatpush3.bf16.msra.mxu1 %v8386_v50  ;;  %1589 = vst [vmem:[#allocation3 + $0x68] sm:$0xff] %v1553_v6  }
 0x16d   : > { %v2282_v38 = vsel %vm9092_vm13, %v10228_v49, %v10227_v29  ;;  %v1765_v7 = vsel %vm8726_vm2, %v1760_v26, %v1764_v36  ;;  %v1331_v25 = vshll.u32 %v7346_v0, 16  ;;  %v7349_v62 = vpack.c.bf16 %v935_v27, %v935_v27  ;;  %7993 = vmatprep.subr.bf16.mxu1 %v9086_v37  ;;  %v8394_v36 = vld [vmem:[%s10213_s5 + $0xc0] sm:$0xff]   ;;  %v1617_v55 = vld [vmem:[#allocation2 + $0x48] sm:$0xf]  ;;  %v8419_v29 = vld [vmem:[%s10213_s5 + $0x178] sm:$0xff]  }
 0x16e   : > { %2437 = vst [vmem:[#allocation3 + $0x128] sm:$0xf] %v2282_v38  ;;  %v1351_v5 = vrot.slane %v9096_v59, 4  ;;  %v1775_v58 = vsel %vm8726_vm2, %v1770_v48, %v1774_v41  ;;  %2133 = vst [vmem:[#allocation3 + $0xb0] sm:$0xf] %v1765_v7  ;;  %v9115_v47 = vrot.slane %v1328_v43, 7  ;;  %v1521_v50 = vsel %vm8784_vm7, %v1350_v32, %v1520_v40 }
 0x16f   : > { %v933_v63 = vmax.f32 %v893_v46, 0.0  ;;  %2134 = vst [vmem:[#allocation3 + $0xb4] sm:$0xf] %v1775_v58  ;;  %v1353_v42 = vshrl.u32 %v7349_v62, 16  ;;  %v1616_v54 = vld [vmem:[#allocation2 + $0x44] sm:$0x1] }
 0x170   : > { %v1779_v2 = vrot.slane %v1777_v52, 4  ;;  %v1780_v61 = vshll.u32 %v9070_v60, 16  ;;  %v8355_v51 = vld [vmem:[#allocation3 + $0xa8] sm:$0xff]   ;;  %1522 = vst [vmem:[#allocation2 + $0xc0] sm:$0xf] %v1521_v50  ;;  %v1333_v35 = vor.u32 %v1331_v25, %v9115_v47  ;;  %v1356_v39 = vshll.u32 %v7349_v62, 16  ;;  %7994 = vmatpush3.bf16.msra.mxu1 %v9086_v37 }
 0x171   : > { %v1524_v28 = vld [vmem:[#allocation2 + $0xc8] sm:$0x1]  ;;  %v7347_v57 = vpack.c.bf16 %v933_v63, %v933_v63  ;;  %v1786_v31 = vshll.u32 %v1615_v44, 16  ;;  %v1334_v0 = vrot.slane %v9115_v47, 4  ;;  %v1355_v27 = vrot.slane %v1353_v42, 7  ;;  %7906 = vmatmul.mubr.bf16.gmra.mxu1 %v8355_v51  ;;  %7995 = vmatprep.subr.bf16.mxu1 %v8394_v36 }
 0x172   : > { %v1782_v46 = vrot.slane %v1780_v61, 5  ;;  %v1790_v59 = vshrl.u32 %v1615_v44, 16  ;;  %v1514_v52 = vsel %vm8784_vm7, %v1333_v35, %v1513_v30  ;;  %v1796_v26 = vshll.u32 %v1616_v54, 16  ;;  %v1517_v33 = vld [vmem:[#allocation2 + $0xbc] sm:$0x1] }
 0x173   : > { %v1336_v60 = vshrl.u32 %v7347_v57, 16  ;;  %v1788_v40 = vrot.slane %v1786_v31, 5  ;;  %1515 = vst [vmem:[#allocation2 + $0xb4] sm:$0xf] %v1514_v52  ;;  %v1358_v49 = vor.u32 %v1356_v39, %v1355_v27  ;;  %v1360_v38 = vrot.slane %v1355_v27, 4  ;;  %v8374_v47 = vld [vmem:[#allocation3 + $0x68] sm:$0xff]  }
 0x174   : > { %v1783_v48 = vor.u32 %v1782_v46, %v1779_v2  ;;  %v1792_v41 = vrot.slane %v1790_v59, 4  ;;  %v1339_v37 = vshll.u32 %v7347_v57, 16  ;;  %v9132_v32 = vld [vmem:[#allocation2 + $0x50] sm:$0x1]  ;;  %v1801_v45 = vshrl.u32 %v1617_v55, 16  ;;  %7996 = vmatpush3.bf16.msra.mxu1 %v8394_v36  ;;  %7878 = vmatmul.mubr.bf16.gmra.mxu0 %v8374_v47  ;;  %v8376_v31 = vld [vmem:[#allocation3 + $0x70] sm:$0xff]  }
 0x175   : > { %v1338_v43 = vrot.slane %v1336_v60, 7  ;;  %v1804_v7 = vshll.u32 %v1617_v55, 16  ;;  %v1620_v25 = vld [vmem:[#allocation2 + $0x54] sm:$0xf]  ;;  %v1359_v62 = vsel %vm8800_vm9, %v1351_v5, %v1358_v49  ;;  %v1525_v44 = vsel %vm8806_vm10, %v1360_v38, %v1524_v28  ;;  %v1621_v58 = vld [vmem:[#allocation2 + $0x58] sm:$0xf]  ;;  %8077 = vmatprep.subr.bf16.mxu1 %v8419_v29  ;;  %7881 = vmatprep.mubr.bf16.mxu0 %v8376_v31 }
 0x176   : > { %v1784_v6 = vrot.slane %v1783_v48, 4  ;;  %v1793_v53 = vor.u32 %v1792_v41, %v1788_v40  ;;  %v8356_v30 = vld [vmem:[#allocation3 + $0xb0] sm:$0xff]   ;;  %1523 = vst [vmem:[#allocation2 + $0xc4] sm:$0xf] %v1359_v62  ;;  %1526 = vst [vmem:[#allocation2 + $0xc8] sm:$0x1] %v1525_v44 }
 0x177   : > { %v1341_v63 = vor.u32 %v1339_v37, %v1338_v43  ;;  %v1343_v50 = vrot.slane %v1338_v43, 4  ;;  %v1803_v42 = vrot.slane %v1801_v45, 4  ;;  %v1806_v54 = vrot.slane %v1804_v7, 5  ;;  %v9138_v55 = vld [vmem:[#allocation2 + $0x64] sm:$0xf]  ;;  %7909 = vmatprep.mubr.bf16.mxu1 %v8356_v30 }
 0x178   : > { %v1789_v5 = vsel %vm8726_vm2, %v1784_v6, %v1788_v40  ;;  %v1794_v2 = vrot.slane %v1793_v53, 4  ;;  %v1798_v61 = vrot.slane %v1796_v26, 5  ;;  %v1810_v51 = vshll.u32 %v9078_v34, 16  ;;  %v1622_v35 = vld [vmem:[#allocation2 + $0x5c] sm:$0x1] }
 0x179   : > { %v9143_v36 = vld [vmem:[#allocation2 + $0x7c] sm:$0xf]  ;;  %v1342_v39 = vsel %vm8800_vm9, %v1334_v0, %v1341_v63  ;;  %v1518_v28 = vsel %vm8806_vm10, %v1343_v50, %v1517_v33  ;;  %2135 = vst [vmem:[#allocation3 + $0xb8] sm:$0xf] %v1789_v5  ;;  %v1807_v57 = vor.u32 %v1806_v54, %v1803_v42  ;;  %v1816_v59 = vrot.slane %v1814_v8, 4 }
 0x17a   : > { %1516 = vst [vmem:[#allocation2 + $0xb8] sm:$0xf] %v1342_v39  ;;  %1519 = vst [vmem:[#allocation2 + $0xbc] sm:$0x1] %v1518_v28  ;;  %v1799_v27 = vsel %vm8726_vm2, %v1794_v2, %v1798_v61  ;;  %v1812_v46 = vrot.slane %v1810_v51, 5  ;;  %v1820_v52 = vshll.u32 %v9132_v32, 16 }
 0x17b   : > { %v9154_v60 = vld [vmem:[#allocation2 + $0x94] sm:$0xf]  ;;  %2136 = vst [vmem:[#allocation3 + $0xbc] sm:$0xf] %v1799_v27  ;;  %v1808_v1 = vrot.slane %v1807_v57, 4  ;;  %v1825_v4 = vshrl.u32 %v1620_v25, 16 }
 0x17c   : > { %v1828_v0 = vshll.u32 %v1620_v25, 16  ;;  %v1834_v40 = vshll.u32 %v1621_v58, 16  ;;  %v9156_v26 = vld [vmem:[#allocation2 + $0xac] sm:$0xf]  ;;  %v9158_v29 = vld [vmem:[#allocation2 + $0xc0] sm:$0xe]  ;;  %v1817_v49 = vor.u32 %v1816_v59, %v1812_v46 }
 0x17d   : > { %v1838_v38 = vshrl.u32 %v1621_v58, 16  ;;  %v1844_v33 = vshll.u32 %v1622_v35, 16  ;;  %v1623_v48 = vld [vmem:[#allocation2 + $0x60] sm:$0xf]  ;;  %v1862_v34 = vshrl.u32 %v9138_v55, 16  ;;  %v1813_v8 = vsel %vm8726_vm2, %v1808_v1, %v1812_v46 }
 0x17e   : > { %v1827_v41 = vrot.slane %v1825_v4, 4  ;;  %v1830_v43 = vrot.slane %v1828_v0, 5  ;;  %v1910_v37 = vshrl.u32 %v9143_v36, 16  ;;  %v1958_v32 = vshrl.u32 %v9154_v60, 16  ;;  %2137 = vst [vmem:[#allocation3 + $0xc0] sm:$0xf] %v1813_v8 }
 0x17f   : > { %v1836_v45 = vrot.slane %v1834_v40, 5  ;;  %v1625_v7 = vld [vmem:[#allocation2 + $0x68] sm:$0x1]  ;;  %v1626_v25 = vld [vmem:[#allocation2 + $0x6c] sm:$0xf]  ;;  %v2006_v62 = vshrl.u32 %v9156_v26, 16 }
 0x180   : > { %v6935_v44 = vrot.slane %v9158_v29, 9  ;;  %v1818_v6 = vrot.slane %v1817_v49, 4  ;;  %v1822_v53 = vrot.slane %v1820_v52, 5  ;;  %v1831_v58 = vor.u32 %v1830_v43, %v1827_v41  ;;  %v1627_v2 = vld [vmem:[#allocation2 + $0x70] sm:$0xf] }
 0x181   : > { %v1840_v47 = vrot.slane %v1838_v38, 4  ;;  %v1846_v30 = vrot.slane %v1844_v33, 5  ;;  %v1849_v63 = vshrl.u32 %v1623_v48, 16  ;;  %v1852_v42 = vshll.u32 %v1623_v48, 16  ;;  %v1557_v61 = vld [vmem:[#allocation2 + $0xb4] sm:$0xff]  }
 0x182   : > { %v1823_v50 = vsel %vm8726_vm2, %v1818_v6, %v1822_v53  ;;  %v1858_v54 = vshll.u32 %v9138_v55, 16  ;;  %v1864_v5 = vrot.slane %v1862_v34, 4  ;;  %v8360_v51 = vld [vmem:[#allocation3 + $0xb8] sm:$0xff]   ;;  %v1832_v35 = vrot.slane %v1831_v58, 4  ;;  %1593 = vst [vmem:[#allocation3 + $0x78] sm:$0xff] %v1557_v61  }
 0x183   : > { %2138 = vst [vmem:[#allocation3 + $0xc4] sm:$0xf] %v1823_v50  ;;  %v1841_v39 = vor.u32 %v1840_v47, %v1836_v45  ;;  %v1851_v28 = vrot.slane %v1849_v63, 4  ;;  %v1868_v57 = vshll.u32 %v1625_v7, 16  ;;  %v1854_v31 = vrot.slane %v1852_v42, 5  ;;  %7910 = vmatmul.mubr.bf16.gmra.mxu1 %v8360_v51 }
 0x184   : > { %v1860_v27 = vrot.slane %v1858_v54, 5  ;;  %v1628_v46 = vld [vmem:[#allocation2 + $0x74] sm:$0x1]  ;;  %v1873_v59 = vshrl.u32 %v1626_v25, 16  ;;  %v1876_v52 = vshll.u32 %v1626_v25, 16  ;;  %v1837_v55 = vsel %vm8726_vm2, %v1832_v35, %v1836_v45 }
 0x185   : > { %v1629_v1 = vld [vmem:[#allocation2 + $0x78] sm:$0xf]  ;;  %v1842_v4 = vrot.slane %v1841_v39, 4  ;;  %v1870_v0 = vrot.slane %v1868_v57, 5  ;;  %v1882_v40 = vshll.u32 %v1627_v2, 16  ;;  %v1855_v49 = vor.u32 %v1854_v31, %v1851_v28 }
 0x186   : > { %2139 = vst [vmem:[#allocation3 + $0xc8] sm:$0xf] %v1837_v55  ;;  %v1865_v38 = vor.u32 %v1864_v5, %v1860_v27  ;;  %v1875_v33 = vrot.slane %v1873_v59, 4  ;;  %v1878_v48 = vrot.slane %v1876_v52, 5  ;;  %v1632_v34 = vld [vmem:[#allocation2 + $0x84] sm:$0xf] }
 0x187   : > { %v1847_v8 = vsel %vm8726_vm2, %v1842_v4, %v1846_v30  ;;  %v1884_v41 = vrot.slane %v1882_v40, 5  ;;  %v1886_v43 = vshrl.u32 %v1627_v2, 16  ;;  %v1892_v7 = vshll.u32 %v1628_v46, 16  ;;  %v1631_v25 = vld [vmem:[#allocation2 + $0x80] sm:$0x1] }
 0x188   : > { %2140 = vst [vmem:[#allocation3 + $0xcc] sm:$0xf] %v1847_v8  ;;  %v1856_v6 = vrot.slane %v1855_v49, 4  ;;  %v1866_v53 = vrot.slane %v1865_v38, 4  ;;  %v1879_v45 = vor.u32 %v1878_v48, %v1875_v33  ;;  %v1897_v58 = vshrl.u32 %v1629_v1, 16 }
 0x189   : > { %v1633_v47 = vld [vmem:[#allocation2 + $0x88] sm:$0xf]  ;;  %v1888_v63 = vrot.slane %v1886_v43, 4  ;;  %v1894_v50 = vrot.slane %v1892_v7, 5  ;;  %v1900_v42 = vshll.u32 %v1629_v1, 16  ;;  %v1906_v54 = vshll.u32 %v9143_v36, 16 }
 0x18a   : > { %v8361_v5 = vld [vmem:[#allocation3 + $0xc0] sm:$0xff]   ;;  %v1861_v61 = vsel %vm8726_vm2, %v1856_v6, %v1860_v27  ;;  %v1871_v30 = vsel %vm8726_vm2, %v1866_v53, %v1870_v0  ;;  %v1880_v2 = vrot.slane %v1879_v45, 4  ;;  %v1899_v51 = vrot.slane %v1897_v58, 4  ;;  %v8381_v35 = vld [vmem:[#allocation3 + $0x78] sm:$0xff]   ;;  %v1634_v59 = vld [vmem:[#allocation2 + $0x8c] sm:$0x1] }
 0x18b   : > { %v1635_v39 = vld [vmem:[#allocation2 + $0x90] sm:$0xf]  ;;  %2141 = vst [vmem:[#allocation3 + $0xd0] sm:$0xf] %v1861_v61  ;;  %2142 = vst [vmem:[#allocation3 + $0xd4] sm:$0xf] %v1871_v30  ;;  %v1889_v28 = vor.u32 %v1888_v63, %v1884_v41  ;;  %7913 = vmatprep.mubr.bf16.mxu1 %v8361_v5  ;;  %7882 = vmatmul.mubr.bf16.gmra.mxu0 %v8381_v35 }
 0x18c   : > { %v1902_v57 = vrot.slane %v1900_v42, 5  ;;  %v1908_v31 = vrot.slane %v1906_v54, 5  ;;  %v1912_v46 = vrot.slane %v1910_v37, 4  ;;  %v1885_v27 = vsel %vm8726_vm2, %v1880_v2, %v1884_v41  ;;  %v1637_v53 = vld [vmem:[#allocation2 + $0x98] sm:$0x1] }
 0x18d   : > { %v1916_v52 = vshll.u32 %v1631_v25, 16  ;;  %v1921_v1 = vshrl.u32 %v1632_v34, 16  ;;  %v1924_v55 = vshll.u32 %v1632_v34, 16  ;;  %v1890_v4 = vrot.slane %v1889_v28, 4  ;;  %2143 = vst [vmem:[#allocation3 + $0xd8] sm:$0xf] %v1885_v27 }
 0x18e   : > { %v1903_v0 = vor.u32 %v1902_v57, %v1899_v51  ;;  %v1913_v40 = vor.u32 %v1912_v46, %v1908_v31  ;;  %v1930_v49 = vshll.u32 %v1633_v47, 16  ;;  %v1934_v8 = vshrl.u32 %v1633_v47, 16  ;;  %v1638_v58 = vld [vmem:[#allocation2 + $0x9c] sm:$0xf]  ;;  %v1639_v54 = vld [vmem:[#allocation2 + $0xa0] sm:$0xf] }
 0x18f   : > { %v1918_v38 = vrot.slane %v1916_v52, 5  ;;  %v1923_v33 = vrot.slane %v1921_v1, 4  ;;  %v1926_v48 = vrot.slane %v1924_v55, 5  ;;  %v8365_v36 = vld [vmem:[#allocation3 + $0xc8] sm:$0xff]   ;;  %v1895_v37 = vsel %vm8726_vm2, %v1890_v4, %v1894_v50 }
 0x190   : > { %v1904_v43 = vrot.slane %v1903_v0, 4  ;;  %v1914_v7 = vrot.slane %v1913_v40, 4  ;;  %v1932_v41 = vrot.slane %v1930_v49, 5  ;;  %2144 = vst [vmem:[#allocation3 + $0xdc] sm:$0xf] %v1895_v37  ;;  %v1936_v34 = vrot.slane %v1934_v8, 4  ;;  %7914 = vmatmul.mubr.bf16.gmra.mxu1 %v8365_v36 }
 0x191   : > { %v1927_v25 = vor.u32 %v1926_v48, %v1923_v33  ;;  %v1940_v6 = vshll.u32 %v1634_v59, 16  ;;  %v1945_v45 = vshrl.u32 %v1635_v39, 16  ;;  %v1948_v42 = vshll.u32 %v1635_v39, 16  ;;  %v1640_v27 = vld [vmem:[#allocation2 + $0xa4] sm:$0x1] }
 0x192   : > { %v1909_v63 = vsel %vm8726_vm2, %v1904_v43, %v1908_v31  ;;  %v1919_v47 = vsel %vm8726_vm2, %v1914_v7, %v1918_v38  ;;  %v1954_v50 = vshll.u32 %v9154_v60, 16  ;;  %v8366_v5 = vld [vmem:[#allocation3 + $0xd0] sm:$0xff]   ;;  %v1937_v30 = vor.u32 %v1936_v34, %v1932_v41  ;;  %v1559_v4 = vld [vmem:[#allocation2 + $0xc0] sm:$0xff]   ;;  %v1643_v36 = vld [vmem:[#allocation2 + $0xb0] sm:$0x1] }
 0x193   : > { %2145 = vst [vmem:[#allocation3 + $0xe0] sm:$0xf] %v1909_v63  ;;  %2146 = vst [vmem:[#allocation3 + $0xe4] sm:$0xf] %v1919_v47  ;;  %v1928_v61 = vrot.slane %v1927_v25, 4  ;;  %v1942_v2 = vrot.slane %v1940_v6, 5  ;;  %7917 = vmatprep.mubr.bf16.mxu1 %v8366_v5 }
 0x194   : > { %v1947_v51 = vrot.slane %v1945_v45, 4  ;;  %v1950_v35 = vrot.slane %v1948_v42, 5  ;;  %v1956_v28 = vrot.slane %v1954_v50, 5  ;;  %v1938_v31 = vrot.slane %v1937_v30, 4  ;;  %v1641_v0 = vld [vmem:[#allocation2 + $0xa8] sm:$0xf] }
 0x195   : > { %v1933_v57 = vsel %vm8726_vm2, %v1928_v61, %v1932_v41  ;;  %v1960_v39 = vrot.slane %v1958_v32, 4  ;;  %v1964_v46 = vshll.u32 %v1637_v53, 16  ;;  %v1969_v52 = vshrl.u32 %v1638_v58, 16  ;;  %1595 = vst [vmem:[#allocation3 + $0x80] sm:$0xff] %v1559_v4   ;;  %v2161_v37 = vld [vmem:[#allocation2] sm:$0xe] }
 0x196   : > { %2147 = vst [vmem:[#allocation3 + $0xe8] sm:$0xf] %v1933_v57  ;;  %v1951_v59 = vor.u32 %v1950_v35, %v1947_v51  ;;  %v1972_v1 = vshll.u32 %v1638_v58, 16  ;;  %v1978_v55 = vshll.u32 %v1639_v54, 16  ;;  %v1943_v40 = vsel %vm8726_vm2, %v1938_v31, %v1942_v2  ;;  %v2162_v34 = vld [vmem:[#allocation2 + $0x4] sm:$0xf] }
 0x197   : > { %v1961_v49 = vor.u32 %v1960_v39, %v1956_v28  ;;  %v1966_v38 = vrot.slane %v1964_v46, 5  ;;  %v1982_v33 = vshrl.u32 %v1639_v54, 16  ;;  %v8370_v48 = vld [vmem:[#allocation3 + $0xd8] sm:$0xff]   ;;  %2148 = vst [vmem:[#allocation3 + $0xec] sm:$0xf] %v1943_v40  ;;  %v1971_v32 = vrot.slane %v1969_v52, 4 }
 0x198   : > { %v1952_v60 = vrot.slane %v1951_v59, 4  ;;  %v1974_v8 = vrot.slane %v1972_v1, 5  ;;  %v1980_v7 = vrot.slane %v1978_v55, 5  ;;  %v1988_v25 = vshll.u32 %v1640_v27, 16  ;;  %v2163_v6 = vld [vmem:[#allocation2 + $0x8] sm:$0x1]  ;;  %7918 = vmatmul.mubr.bf16.gmra.mxu1 %v8370_v48 }
 0x199   : > { %v1962_v43 = vrot.slane %v1961_v49, 4  ;;  %v1984_v41 = vrot.slane %v1982_v33, 4  ;;  %v1644_v53 = vld [vmem:[#allocation2 + $0xb4] sm:$0xf]  ;;  %v1993_v47 = vshrl.u32 %v1641_v0, 16  ;;  %v1996_v5 = vshll.u32 %v1641_v0, 16 }
 0x19a   : > { %v8372_v45 = vld [vmem:[#allocation3 + $0xe0] sm:$0xff]   ;;  %v1957_v58 = vsel %vm8726_vm2, %v1952_v60, %v1956_v28  ;;  %v1975_v63 = vor.u32 %v1974_v8, %v1971_v32  ;;  %v1990_v54 = vrot.slane %v1988_v25, 5  ;;  %v2002_v2 = vshll.u32 %v9156_v26, 16  ;;  %v2169_v32 = vld [vmem:[#allocation2 + $0x20] sm:$0x1] }
 0x19b   : > { %v1967_v42 = vsel %vm8726_vm2, %v1962_v43, %v1966_v38  ;;  %2149 = vst [vmem:[#allocation3 + $0xf0] sm:$0xf] %v1957_v58  ;;  %v1985_v50 = vor.u32 %v1984_v41, %v1980_v7  ;;  %7921 = vmatprep.mubr.bf16.mxu1 %v8372_v45  ;;  %v1995_v30 = vrot.slane %v1993_v47, 4  ;;  %v2008_v51 = vrot.slane %v2006_v62, 4  ;;  %v1645_v35 = vld [vmem:[#allocation2 + $0xb8] sm:$0xf] }
 0x19c   : > { %2150 = vst [vmem:[#allocation3 + $0xf4] sm:$0xf] %v1967_v42  ;;  %v1976_v61 = vrot.slane %v1975_v63, 4  ;;  %v1998_v57 = vrot.slane %v1996_v5, 5  ;;  %v2012_v31 = vshll.u32 %v1643_v36, 16  ;;  %v6919_v39 = vrot.slane %v2161_v37, 9 }
 0x19d   : > { %v1986_v28 = vrot.slane %v1985_v50, 4  ;;  %v2004_v59 = vrot.slane %v2002_v2, 5  ;;  %v2274_v27 = vrot.slane %v2162_v34, 5  ;;  %v2277_v52 = vrot.slane %v2163_v6, 5  ;;  %v1646_v1 = vld [vmem:[#allocation2 + $0xbc] sm:$0x1] }
 0x19e   : > { %v1981_v46 = vsel %vm8726_vm2, %v1976_v61, %v1980_v7  ;;  %v2167_v55 = vld [vmem:[#allocation2 + $0x18] sm:$0xe]  ;;  %v8377_v4 = vld [vmem:[#allocation3 + $0xe8] sm:$0xff]   ;;  %v1999_v26 = vor.u32 %v1998_v57, %v1995_v30  ;;  %v2014_v62 = vrot.slane %v2012_v31, 5  ;;  %v2017_v40 = vshrl.u32 %v1644_v53, 16 }
 0x19f   : > { %v1991_v0 = vsel %vm8726_vm2, %v1986_v28, %v1990_v54  ;;  %2151 = vst [vmem:[#allocation3 + $0xf8] sm:$0xf] %v1981_v46  ;;  %v2168_v49 = vld [vmem:[#allocation2 + $0x1c] sm:$0xf]  ;;  %v2009_v38 = vor.u32 %v2008_v51, %v2004_v59  ;;  %v2275_v33 = vsel %vm9092_vm13, %v6919_v39, %v2274_v27  ;;  %v2276_v48 = vrot.slane %v2274_v27, 4 }
 0x1a0   : > { %2152 = vst [vmem:[#allocation3 + $0xfc] sm:$0xf] %v1991_v0  ;;  %v2020_v60 = vshll.u32 %v1644_v53, 16  ;;  %v2170_v8 = vld [vmem:[#allocation2 + $0x24] sm:$0xe]  ;;  %v2000_v37 = vrot.slane %v1999_v26, 4  ;;  %7922 = vmatmul.mubr.bf16.gmra.mxu1 %v8377_v4 }
 0x1a1   : > { %v2171_v36 = vld [vmem:[#allocation2 + $0x28] sm:$0xf]  ;;  %2435 = vst [vmem:[#allocation3 + $0x120] sm:$0xf] %v2275_v33  ;;  %v2019_v43 = vrot.slane %v2017_v40, 4  ;;  %v2026_v7 = vshll.u32 %v1645_v35, 16  ;;  %v2278_v6 = vsel %vm9092_vm13, %v2276_v48, %v2277_v52 }
 0x1a2   : > { %v2030_v41 = vshrl.u32 %v1645_v35, 16  ;;  %v2172_v25 = vld [vmem:[#allocation2 + $0x2c] sm:$0x1]  ;;  %v2010_v34 = vrot.slane %v2009_v38, 4  ;;  %v2022_v45 = vrot.slane %v2020_v60, 5  ;;  %v2036_v58 = vshll.u32 %v1646_v1, 16 }
 0x1a3   : > { %v2173_v63 = vld [vmem:[#allocation2 + $0x30] sm:$0xe]  ;;  %v8379_v47 = vld [vmem:[#allocation3 + $0xf0] sm:$0xff]   ;;  %v2005_v53 = vsel %vm8726_vm2, %v2000_v37, %v2004_v59  ;;  %2436 = vst [vmem:[#allocation3 + $0x124] sm:$0xf] %v2278_v6  ;;  %v2028_v42 = vrot.slane %v2026_v7, 5 }
 0x1a4   : > { %v2032_v50 = vrot.slane %v2030_v41, 4  ;;  %v6921_v54 = vrot.slane %v2167_v55, 9  ;;  %v2174_v5 = vld [vmem:[#allocation2 + $0x34] sm:$0xf]  ;;  %v9213_v61 = vld [vmem:[#allocation2 + $0x38] sm:$0x1]  ;;  %v2015_v30 = vsel %vm8726_vm2, %v2010_v34, %v2014_v62  ;;  %v2023_v2 = vor.u32 %v2022_v45, %v2019_v43  ;;  %7925 = vmatprep.mubr.bf16.mxu1 %v8379_v47 }
 0x1a5   : > { %2153 = vst [vmem:[#allocation3 + $0x100] sm:$0xf] %v2005_v53  ;;  %v2038_v51 = vrot.slane %v2036_v58, 5  ;;  %v2288_v35 = vrot.slane %v2168_v49, 5  ;;  %v2176_v28 = vld [vmem:[#allocation2 + $0x3c] sm:$0xe] }
 0x1a6   : > { %v2177_v57 = vld [vmem:[#allocation2 + $0x40] sm:$0xf]  ;;  %2154 = vst [vmem:[#allocation3 + $0x104] sm:$0xf] %v2015_v30  ;;  %v2033_v31 = vor.u32 %v2032_v50, %v2028_v42  ;;  %v2291_v39 = vrot.slane %v2169_v32, 5  ;;  %v6922_v46 = vrot.slane %v2170_v8, 9 }
 0x1a7   : > { %v2295_v59 = vrot.slane %v2171_v36, 5  ;;  %v2178_v27 = vld [vmem:[#allocation2 + $0x44] sm:$0x1]  ;;  %v2179_v52 = vld [vmem:[#allocation2 + $0x48] sm:$0xe]  ;;  %v2024_v1 = vrot.slane %v2023_v2, 4  ;;  %v2289_v55 = vsel %vm9092_vm13, %v6921_v54, %v2288_v35 }
 0x1a8   : > { %v2290_v4 = vrot.slane %v2288_v35, 4  ;;  %v2298_v0 = vrot.slane %v2172_v25, 5  ;;  %v2180_v26 = vld [vmem:[#allocation2 + $0x4c] sm:$0xf]  ;;  %v9219_v62 = vld [vmem:[#allocation2 + $0x50] sm:$0x1] }
 0x1a9   : > { %v8383_v40 = vld [vmem:[#allocation3 + $0xf8] sm:$0xff]   ;;  %v2034_v49 = vrot.slane %v2033_v31, 4  ;;  %2439 = vst [vmem:[#allocation3 + $0x130] sm:$0xf] %v2289_v55  ;;  %v2296_v38 = vsel %vm9092_vm13, %v6922_v46, %v2295_v59  ;;  %v2297_v33 = vrot.slane %v2295_v59, 4  ;;  %v6923_v48 = vrot.slane %v2173_v63, 9 }
 0x1aa   : > { %v2182_v60 = vld [vmem:[#allocation2 + $0x54] sm:$0xe]  ;;  %v2183_v32 = vld [vmem:[#allocation2 + $0x58] sm:$0xf]  ;;  %v9223_v8 = vld [vmem:[#allocation2 + $0x5c] sm:$0x1]  ;;  %v2029_v36 = vsel %vm8726_vm2, %v2024_v1, %v2028_v42  ;;  %v2292_v37 = vsel %vm9092_vm13, %v2290_v4, %v2291_v39  ;;  %7926 = vmatmul.mubr.bf16.gmra.mxu1 %v8383_v40 }
 0x1ab   : > { %2441 = vst [vmem:[#allocation3 + $0x138] sm:$0xf] %v2296_v38  ;;  %v2302_v43 = vrot.slane %v2174_v5, 5  ;;  %v2305_v7 = vrot.slane %v9213_v61, 5  ;;  %v9230_v41 = vld [vmem:[#allocation2 + $0x60] sm:$0xe]  ;;  %v2039_v25 = vsel %vm8726_vm2, %v2034_v49, %v2038_v51  ;;  %v2299_v34 = vsel %vm9092_vm13, %v2297_v33, %v2298_v0 }
 0x1ac   : > { %2155 = vst [vmem:[#allocation3 + $0x108] sm:$0xf] %v2029_v36  ;;  %2440 = vst [vmem:[#allocation3 + $0x134] sm:$0xf] %v2292_v37  ;;  %v9239_v6 = vld [vmem:[%s10213_s5 + $0x130] sm:$0xff]   ;;  %v6924_v45 = vrot.slane %v2176_v28, 9 }
 0x1ad   : > { %v2309_v58 = vrot.slane %v2177_v57, 5  ;;  %v2186_v63 = vld [vmem:[#allocation2 + $0x64] sm:$0xf]  ;;  %v9241_v47 = vld [vmem:[#allocation2 + $0x68] sm:$0x1]  ;;  %v8387_v53 = vld [vmem:[#allocation3 + $0x120] sm:$0xff]   ;;  %v2303_v42 = vsel %vm9092_vm13, %v6923_v48, %v2302_v43 }
 0x1ae   : > { %2156 = vst [vmem:[#allocation3 + $0x10c] sm:$0xf] %v2039_v25  ;;  %2442 = vst [vmem:[#allocation3 + $0x13c] sm:$0xf] %v2299_v34  ;;  %v2304_v50 = vrot.slane %v2302_v43, 4  ;;  %v2312_v54 = vrot.slane %v2178_v27, 5  ;;  %7949 = vmatprep.mubr.bf16.mxu0 %v8387_v53 }
 0x1af   : > { %v6925_v5 = vrot.slane %v2179_v52, 9  ;;  %v2188_v61 = vld [vmem:[#allocation2 + $0x6c] sm:$0xe]  ;;  %v2189_v30 = vld [vmem:[#allocation2 + $0x70] sm:$0xf]  ;;  %v8388_v51 = vld [vmem:[#allocation3 + $0x128] sm:$0xff]   ;;  %v2310_v35 = vsel %vm9092_vm13, %v6924_v45, %v2309_v58 }
 0x1b0   : > { %v9245_v2 = vld [vmem:[#allocation2 + $0x74] sm:$0x1]  ;;  %2443 = vst [vmem:[#allocation3 + $0x140] sm:$0xf] %v2303_v42  ;;  %v2311_v28 = vrot.slane %v2309_v58, 4  ;;  %v2316_v57 = vrot.slane %v2180_v26, 5  ;;  %v2306_v46 = vsel %vm9092_vm13, %v2304_v50, %v2305_v7  ;;  %7950 = vmatmul.mubr.bf16.vlgmr.msra.gmra.mxu0 %v8388_v51 }
 0x1b1   : > { %v2319_v31 = vrot.slane %v9219_v62, 5  ;;  %v8385_v39 = vld [vmem:[#allocation3 + $0x100] sm:$0xff]   ;;  %2445 = vst [vmem:[#allocation3 + $0x148] sm:$0xf] %v2310_v35  ;;  %v6926_v59 = vrot.slane %v2182_v60, 9  ;;  %v2323_v27 = vrot.slane %v2183_v32, 5 }
 0x1b2   : > { %v2326_v52 = vrot.slane %v9223_v8, 5  ;;  %2444 = vst [vmem:[#allocation3 + $0x144] sm:$0xf] %v2306_v46  ;;  %v2313_v1 = vsel %vm9092_vm13, %v2311_v28, %v2312_v54  ;;  %v2317_v55 = vsel %vm9092_vm13, %v6925_v5, %v2316_v57  ;;  %v2318_v4 = vrot.slane %v2316_v57, 4  ;;  %v2191_v26 = vld [vmem:[#allocation2 + $0x78] sm:$0xe]  ;;  %7929 = vmatprep.mubr.bf16.mxu1 %v8385_v39 }
 0x1b3   : > { %v6927_v0 = vrot.slane %v9230_v41, 9  ;;  %v2192_v62 = vld [vmem:[#allocation2 + $0x7c] sm:$0xf]  ;;  %2446 = vst [vmem:[#allocation3 + $0x14c] sm:$0xf] %v2313_v1  ;;  %v2324_v49 = vsel %vm9092_vm13, %v6926_v59, %v2323_v27  ;;  %v2325_v38 = vrot.slane %v2323_v27, 4 }
 0x1b4   : > { %v8543_v40 = vld [vmem:[%s10213_s5 + $0x138] sm:$0xff]   ;;  %2447 = vst [vmem:[#allocation3 + $0x150] sm:$0xf] %v2317_v55  ;;  %v2330_v33 = vrot.slane %v2186_v63, 5  ;;  %v2333_v48 = vrot.slane %v9241_v47, 5  ;;  %v8401_v36 = vld [vmem:[%s10213_s5 + $0x128] sm:$0xff]   ;;  %v2320_v37 = vsel %vm9092_vm13, %v2318_v4, %v2319_v31 }
 0x1b5   : > { %8030 = vmatpush3.bf16.msra.mxu0 %v8543_v40  ;;  %v9264_v60 = vld [vmem:[#allocation2 + $0x80] sm:$0x1]  ;;  %v2194_v32 = vld [vmem:[#allocation2 + $0x84] sm:$0xe]  ;;  %v2195_v8 = vld [vmem:[#allocation2 + $0x88] sm:$0xf]  ;;  %v2327_v63 = vsel %vm9092_vm13, %v2325_v38, %v2326_v52 }
 0x1b6   : > { %8031 = vmatprep.subr.bf16.mxu0 %v9239_v6  ;;  %2449 = vst [vmem:[#allocation3 + $0x158] sm:$0xf] %v2324_v49  ;;  %v6928_v43 = vrot.slane %v2188_v61, 9  ;;  %v2337_v7 = vrot.slane %v2189_v30, 5  ;;  %v2340_v41 = vrot.slane %v9245_v2, 5  ;;  %v8391_v45 = vld [vmem:[#allocation3 + $0x130] sm:$0xff]   ;;  %v2331_v47 = vsel %vm9092_vm13, %v6927_v0, %v2330_v33 }
 0x1b7   : > { %v2197_v25 = vld [vmem:[#allocation2 + $0x90] sm:$0xe]  ;;  %v2198_v34 = vld [vmem:[#allocation2 + $0x94] sm:$0xf]  ;;  %v8393_v58 = vld [vmem:[#allocation3 + $0x8] sm:$0xff]   ;;  %v2332_v53 = vrot.slane %v2330_v33, 4  ;;  %7953 = vmatprep.mubr.bf16.mxu0 %v8391_v45 }
 0x1b8   : > { %2448 = vst [vmem:[#allocation3 + $0x154] sm:$0xf] %v2320_v37  ;;  %v2196_v42 = vld [vmem:[#allocation2 + $0x8c] sm:$0x1]  ;;  %v8390_v50 = vld [vmem:[#allocation3 + $0x108] sm:$0xff]   ;;  %v2338_v5 = vsel %vm9092_vm13, %v6928_v43, %v2337_v7  ;;  %v2339_v61 = vrot.slane %v2337_v7, 4 }
 0x1b9   : > { %2450 = vst [vmem:[#allocation3 + $0x15c] sm:$0xf] %v2327_v63  ;;  %v9280_v54 = vld [vmem:[%s10213_s5 + $0x120] sm:$0xff]   ;;  %2451 = vst [vmem:[#allocation3 + $0x160] sm:$0xf] %v2331_v47  ;;  %8032 = vmatpush3.bf16.msra.mxu0 %v9239_v6  ;;  %v2334_v2 = vsel %vm9092_vm13, %v2332_v53, %v2333_v48  ;;  %v6929_v51 = vrot.slane %v2191_v26, 9  ;;  %7930 = vmatmul.mubr.bf16.gmra.mxu1 %v8390_v50  ;;  %v9311_v50 = vpop.f32.mrf.mxu0 }
 0x1ba   : > { %v2199_v30 = vld [vmem:[#allocation2 + $0x98] sm:$0x1]  ;;  %2453 = vst [vmem:[#allocation3 + $0x168] sm:$0xf] %v2338_v5  ;;  %v2344_v35 = vrot.slane %v2192_v62, 5  ;;  %v8395_v39 = vld [vmem:[#allocation3 + $0x138] sm:$0xff]   ;;  %8033 = vmatprep.subr.bf16.mxu0 %v8401_v36  ;;  %v2341_v46 = vsel %vm9092_vm13, %v2339_v61, %v2340_v41  ;;  %7997 = vmatprep.mubr.bf16.mxu1 %v8393_v58 }
 0x1bb   : > { %v2200_v28 = vld [vmem:[#allocation2 + $0x9c] sm:$0xe]  ;;  %v2201_v57 = vld [vmem:[#allocation2 + $0xa0] sm:$0xf]  ;;  %v9287_v31 = vld [vmem:[#allocation2 + $0xc4] sm:$0xf]  ;;  %7954 = vmatmul.mubr.bf16.gmra.mxu0 %v8395_v39 }
 0x1bc   : > { %2452 = vst [vmem:[#allocation3 + $0x164] sm:$0xf] %v2334_v2  ;;  %v2347_v59 = vrot.slane %v9264_v60, 5  ;;  %v6930_v6 = vrot.slane %v2194_v32, 9  ;;  %v2351_v27 = vrot.slane %v2195_v8, 5  ;;  %v8397_v1 = vld [vmem:[#allocation3 + $0x140] sm:$0xff]   ;;  %v2345_v55 = vsel %vm9092_vm13, %v6929_v51, %v2344_v35 }
 0x1bd   : > { %v2202_v52 = vld [vmem:[#allocation2 + $0xa4] sm:$0x1]  ;;  %2454 = vst [vmem:[#allocation3 + $0x16c] sm:$0xf] %v2341_v46  ;;  %v2346_v4 = vrot.slane %v2344_v35, 4  ;;  %v6931_v0 = vrot.slane %v2197_v25, 9  ;;  %7957 = vmatprep.mubr.bf16.mxu0 %v8397_v1  ;;  %8034 = vmatpush3.bf16.msra.mxu0 %v8401_v36 }
 0x1be   : > { %v2358_v26 = vrot.slane %v2198_v34, 5  ;;  %v2203_v62 = vld [vmem:[#allocation2 + $0xa8] sm:$0xe]  ;;  %v2204_v40 = vld [vmem:[#allocation2 + $0xac] sm:$0xf]  ;;  %v9297_v49 = vld [vmem:[%s10213_s5 + $0x118] sm:$0xff]   ;;  %v2352_v38 = vsel %vm9092_vm13, %v6930_v6, %v2351_v27  ;;  %8035 = vmatprep.subr.bf16.mxu0 %v9280_v54 }
 0x1bf   : > { %2455 = vst [vmem:[#allocation3 + $0x170] sm:$0xf] %v2345_v55  ;;  %v2353_v33 = vrot.slane %v2351_v27, 4  ;;  %v2354_v48 = vrot.slane %v2196_v42, 5  ;;  %v2206_v60 = vld [vmem:[#allocation2 + $0xb4] sm:$0xe]  ;;  %v2348_v8 = vsel %vm9092_vm13, %v2346_v4, %v2347_v59 }
 0x1c0   : > { %v2207_v32 = vld [vmem:[#allocation2 + $0xb8] sm:$0xf]  ;;  %2457 = vst [vmem:[#allocation3 + $0x178] sm:$0xf] %v2352_v38  ;;  %v2359_v37 = vsel %vm9092_vm13, %v6931_v0, %v2358_v26  ;;  %v2360_v43 = vrot.slane %v2358_v26, 4  ;;  %v2361_v7 = vrot.slane %v2199_v30, 5 }
 0x1c1   : > { %v2205_v41 = vld [vmem:[#allocation2 + $0xb0] sm:$0x1]  ;;  %v8398_v25 = vld [vmem:[#allocation3 + $0x10] sm:$0xff]   ;;  %2456 = vst [vmem:[#allocation3 + $0x174] sm:$0xf] %v2348_v8  ;;  %v2355_v34 = vsel %vm9092_vm13, %v2353_v33, %v2354_v48  ;;  %v6932_v45 = vrot.slane %v2200_v28, 9  ;;  %8036 = vmatpush3.bf16.msra.mxu0 %v9280_v54 }
 0x1c2   : > { %2459 = vst [vmem:[#allocation3 + $0x180] sm:$0xf] %v2359_v37  ;;  %v2365_v36 = vrot.slane %v2201_v57, 5  ;;  %v2208_v58 = vld [vmem:[#allocation2 + $0xbc] sm:$0x1]  ;;  %v2386_v63 = vrot.slane %v9287_v31, 5  ;;  %v2362_v53 = vsel %vm9092_vm13, %v2360_v43, %v2361_v7  ;;  %7998 = vmatmul.mubr.bf16.vlgmr.msra.gmra.mxu1 %v8398_v25  ;;  %8037 = vmatprep.subr.bf16.mxu0 %v9297_v49 }
 0x1c3   : > { %v8399_v47 = vld [vmem:[#allocation3 + $0x18] sm:$0xff]   ;;  %2458 = vst [vmem:[#allocation3 + $0x17c] sm:$0xf] %v2355_v34  ;;  %v2368_v42 = vrot.slane %v2202_v52, 5  ;;  %v1647_v5 = vld [vmem:[#allocation2 + $0xc0] sm:$0xf] }
 0x1c4   : > { %v8416_v61 = vld [vmem:[%s10213_s5 + $0x110] sm:$0xff]   ;;  %2460 = vst [vmem:[#allocation3 + $0x184] sm:$0xf] %v2362_v53  ;;  %v2366_v2 = vsel %vm9092_vm13, %v6932_v45, %v2365_v36  ;;  %v2367_v51 = vrot.slane %v2365_v36, 4  ;;  %v6933_v35 = vrot.slane %v2203_v62, 9  ;;  %v2372_v28 = vrot.slane %v2204_v40, 5  ;;  %8001 = vmatprep.mubr.bf16.mxu1 %v8399_v47  ;;  %v9335_v62 = vpop.f32.mrf.mxu0 }
 0x1c5   : > { %v8421_v30 = vld [vmem:[%s10213_s5 + $0x170] sm:$0xff]   ;;  %v8400_v57 = vld [vmem:[#allocation3 + $0x148] sm:$0xff]   ;;  %v8402_v39 = vld [vmem:[#allocation3 + $0x150] sm:$0xff]   ;;  %2461 = vst [vmem:[#allocation3 + $0x188] sm:$0xf] %v2366_v2  ;;  %v6934_v46 = vrot.slane %v2206_v60, 9  ;;  %v2387_v38 = vsel %vm9092_vm13, %v6935_v44, %v2386_v63  ;;  %8038 = vmatpush3.bf16.msra.mxu0 %v9297_v49 }
 0x1c6   : > { %v2379_v59 = vrot.slane %v2207_v32, 5  ;;  %v2369_v6 = vsel %vm9092_vm13, %v2367_v51, %v2368_v42  ;;  %v2373_v27 = vsel %vm9092_vm13, %v6933_v35, %v2372_v28  ;;  %v2374_v52 = vrot.slane %v2372_v28, 4  ;;  %v8426_v55 = vld [vmem:[%s10213_s5 + $0x168] sm:$0xff]   ;;  %v8544_v54 = vld [vmem:[%s10213_s5 + $0x178] sm:$0xff]   ;;  %7958 = vmatmul.mubr.bf16.gmra.mxu0 %v8400_v57  ;;  %2467 = vst [vmem:[#allocation3 + $0x1a0] sm:$0xf] %v2387_v38  ;;  %8039 = vmatprep.subr.bf16.mxu0 %v8416_v61  ;;  %v9354_v49 = vpop.f32.mrf.mxu0 }
 0x1c7   : > { %v2375_v1 = vrot.slane %v2205_v41, 5  ;;  %8078 = vmatpush3.bf16.msra.mxu1 %v8544_v54  ;;  %2462 = vst [vmem:[#allocation3 + $0x18c] sm:$0xf] %v2369_v6  ;;  %2463 = vst [vmem:[#allocation3 + $0x190] sm:$0xf] %v2373_v27  ;;  %v2382_v26 = vrot.slane %v2208_v58, 5  ;;  %7961 = vmatprep.mubr.bf16.mxu0 %v8402_v39 }
 0x1c8   : > { %v2380_v4 = vsel %vm9092_vm13, %v6934_v46, %v2379_v59  ;;  %v2381_v0 = vrot.slane %v2379_v59, 4  ;;  %8079 = vmatprep.subr.bf16.mxu1 %v8421_v30  ;;  %v2041_v48 = vshrl.u32 %v1647_v5, 16  ;;  %v8403_v60 = vld [vmem:[#allocation3 + $0x20] sm:$0xff]   ;;  %v8423_v32 = vld [vmem:[%s10213_s5 + $0x108] sm:$0xff]   ;;  %v2044_v29 = vshll.u32 %v1647_v5, 16  ;;  %v8404_v8 = vld [vmem:[#allocation3 + $0x28] sm:$0xff]   ;;  %v9361_v45 = vpop.f32.mrf.mxu0 }
 0x1c9   : > { %v2376_v40 = vsel %vm9092_vm13, %v2374_v52, %v2375_v1  ;;  %2465 = vst [vmem:[#allocation3 + $0x198] sm:$0xf] %v2380_v4  ;;  %v8428_v44 = vld [vmem:[%s10213_s5 + $0x160] sm:$0xff]   ;;  %v8405_v7 = vld [vmem:[#allocation3 + $0x158] sm:$0xff]   ;;  %8040 = vmatpush3.bf16.msra.mxu0 %v8416_v61  ;;  %v8407_v25 = vld [vmem:[#allocation3 + $0x160] sm:$0xff]   ;;  %v2388_v39 = vrot.slane %v2386_v63, 4 }
 0x1ca   : > { %2464 = vst [vmem:[#allocation3 + $0x194] sm:$0xf] %v2376_v40  ;;  %v2383_v33 = vsel %vm9092_vm13, %v2381_v0, %v2382_v26  ;;  %v2043_v37 = vrot.slane %v2041_v48, 4  ;;  %v9356_v43 = vld [vmem:[#allocation2 + $0xc4] sm:$0xf]  ;;  %8002 = vmatmul.mubr.bf16.gmra.mxu1 %v8403_v60  ;;  %8041 = vmatprep.subr.bf16.mxu0 %v8423_v32  ;;  %v2046_v34 = vrot.slane %v2044_v29, 5 }
 0x1cb   : > { %2466 = vst [vmem:[#allocation3 + $0x19c] sm:$0xf] %v2383_v33  ;;  %8080 = vmatpush3.bf16.msra.mxu1 %v8421_v30  ;;  %v8430_v41 = vld [vmem:[%s10213_s5 + $0x100] sm:$0xff]   ;;  %8005 = vmatprep.mubr.bf16.mxu1 %v8404_v8  ;;  %v2211_v36 = vld [vmem:[#allocation2 + $0xc8] sm:$0x1]  ;;  %v8433_v58 = vld [vmem:[%s10213_s5 + $0x158] sm:$0xff]   ;;  %v9372_v30 = vpop.f32.mrf.mxu0 }
 0x1cc   : > { %8081 = vmatprep.subr.bf16.mxu1 %v8426_v55  ;;  %v2047_v47 = vor.u32 %v2046_v34, %v2043_v37  ;;  %v9369_v53 = vld [vmem:[%s10213_s5 + $0x1b8] sm:$0xff]   ;;  %v2050_v42 = vshll.u32 %v9356_v43, 16  ;;  %v8408_v5 = vld [vmem:[#allocation3 + $0x30] sm:$0xff]   ;;  %v8409_v61 = vld [vmem:[#allocation3 + $0x38] sm:$0xff]   ;;  %v2389_v35 = vrot.slane %v2211_v36, 5  ;;  %v2054_v4 = vshrl.u32 %v9356_v43, 16 }
 0x1cd   : > { %8042 = vmatpush3.bf16.msra.mxu0 %v8423_v32  ;;  %v8435_v2 = vld [vmem:[%s10213_s5 + $0x150] sm:$0xff]   ;;  %v8410_v57 = vld [vmem:[#allocation3 + $0x168] sm:$0xff]   ;;  %v8412_v46 = vld [vmem:[#allocation3 + $0x170] sm:$0xff]   ;;  %v9380_v59 = vpop.f32.mrf.mxu0 }
 0x1ce   : > { %7962 = vmatmul.mubr.bf16.gmra.mxu0 %v8405_v7  ;;  %8043 = vmatprep.subr.bf16.mxu0 %v8430_v41  ;;  %v2048_v51 = vrot.slane %v2047_v47, 4  ;;  %v2052_v28 = vrot.slane %v2050_v42, 5  ;;  %v8440_v27 = vld [vmem:[%s10213_s5 + $0x148] sm:$0xff]   ;;  %v2390_v52 = vsel %vm9092_vm13, %v2388_v39, %v2389_v35  ;;  %v8413_v31 = vld [vmem:[#allocation3 + $0x40] sm:$0xff]   ;;  %v8442_v1 = vld [vmem:[%s10213_s5 + $0x140] sm:$0xff]   ;;  %v2056_v33 = vrot.slane %v2054_v4, 4 }
 0x1cf   : > { %8082 = vmatpush3.bf16.msra.mxu1 %v8426_v55  ;;  %7965 = vmatprep.mubr.bf16.mxu0 %v8407_v25  ;;  %2468 = vst [vmem:[#allocation3 + $0x1a4] sm:$0xf] %v2390_v52  ;;  %v9389_v63 = vpop.f32.mrf.mxu0  ;;  %v8414_v55 = vld [vmem:[#allocation3 + $0x48] sm:$0xff]   ;;  %v8415_v54 = vld [vmem:[#allocation3 + $0x178] sm:$0xff]   ;;  %v8417_v0 = vld [vmem:[#allocation3 + $0x180] sm:$0xff]  }
 0x1d0   : > { %8083 = vmatprep.subr.bf16.mxu1 %v8428_v44  ;;  %v2053_v6 = vsel %vm8726_vm2, %v2048_v51, %v2052_v28  ;;  %v8418_v40 = vld [vmem:[#allocation3 + $0x50] sm:$0xff]   ;;  %v9402_v48 = vld [vmem:[%s10213_s5 + $0x1f8] sm:$0xff]   ;;  %v8420_v60 = vld [vmem:[#allocation3 + $0x58] sm:$0xff]  }
 0x1d1   : > { %8044 = vmatpush3.bf16.msra.mxu0 %v8430_v41  ;;  %2157 = vst [vmem:[#allocation3 + $0x110] sm:$0xf] %v2053_v6  ;;  %v9395_v26 = vpop.f32.mrf.mxu0  ;;  %v8422_v32 = vld [vmem:[#allocation3 + $0x188] sm:$0xff]   ;;  %v8424_v29 = vld [vmem:[#allocation3 + $0x190] sm:$0xff]   ;;  %v8425_v25 = vld [vmem:[#allocation3 + $0x60] sm:$0xff]  }
 0x1d2   : > { %8006 = vmatmul.mubr.bf16.gmra.mxu1 %v8408_v5  ;;  %8125 = vmatprep.subr.bf16.mxu0 %v9369_v53  ;;  %v1649_v37 = vld [vmem:[#allocation2 + $0xc8] sm:$0x1]  ;;  %v8427_v34 = vld [vmem:[#allocation3 + $0x68] sm:$0xff]   ;;  %v8432_v47 = vld [vmem:[#allocation3 + $0x98] sm:$0xff]  }
 0x1d3   : > { %8084 = vmatpush3.bf16.msra.mxu1 %v8428_v44  ;;  %8009 = vmatprep.mubr.bf16.mxu1 %v8409_v61  ;;  %v9397_v38 = vpop.f32.mrf.mxu0  ;;  %v2057_v44 = vor.u32 %v2056_v33, %v2052_v28  ;;  %v2060_v41 = vshll.u32 %v1649_v37, 16  ;;  %v8434_v51 = vld [vmem:[#allocation3 + $0x78] sm:$0xff]   ;;  %v8436_v35 = vld [vmem:[#allocation3 + $0xa0] sm:$0xff]   ;;  %v9429_v52 = vld [vmem:[%s10212_s4] ss:$0 sm:$0xff] }
 0x1d4   : > { %8085 = vmatprep.subr.bf16.mxu1 %v8433_v58  ;;  %v8444_v28 = vld [vmem:[%s10213_s5 + $0x1b0] sm:$0xff]   ;;  %v522_v4 = vadd.f32 %v9311_v50, %v9429_v52  ;;  %v514_v33 = vadd.f32 %v9429_v52, %v9335_v62  ;;  %v525_v37 = vadd.f32 %v9354_v49, %v9429_v52  ;;  %v8474_v49 = vld [vmem:[%s10213_s5 + $0x1e8] sm:$0xff]   ;;  %v8472_v3 = vld [vmem:[#allocation3 + $0x108] sm:$0xff]  }
 0x1d5   : > { %v9405_v8 = vpop.f32.mrf.mxu0  ;;  %v2058_v7 = vrot.slane %v2057_v44, 4  ;;  %v2062_v36 = vrot.slane %v2060_v41, 5  ;;  %v8469_v50 = vld [vmem:[%s10213_s5 + $0x1f0] sm:$0xff]   ;;  %v8448_v41 = vld [vmem:[#allocation3 + $0xc0] sm:$0xff]  }
 0x1d6   : > { %7966 = vmatmul.mubr.bf16.gmra.mxu0 %v8410_v57  ;;  %v8439_v57 = vld [vmem:[#allocation3 + $0xa8] sm:$0xff]  }
 0x1d7   : > { %8086 = vmatpush3.bf16.msra.mxu1 %v8433_v58  ;;  %7969 = vmatprep.mubr.bf16.mxu0 %v8412_v46  ;;  %v9407_v43 = vpop.f32.mrf.mxu0  ;;  %v8429_v58 = vld [vmem:[#allocation3 + $0x198] sm:$0xff]   ;;  %v2063_v5 = vsel %vm8726_vm2, %v2058_v7, %v2062_v36  ;;  %v8449_v46 = vld [vmem:[%s10213_s5 + $0x1a8] sm:$0xff]   ;;  %v8450_v36 = vld [vmem:[#allocation3 + $0xc8] sm:$0xff]  }
 0x1d8   : > { %8087 = vmatprep.subr.bf16.mxu1 %v8435_v2  ;;  %2158 = vst [vmem:[#allocation3 + $0x114] sm:$0xf] %v2063_v5  ;;  %v8451_v5 = vld [vmem:[#allocation3 + $0x140] sm:$0xff]  }
 0x1d9   : > { %v9409_v42 = vpop.f32.mrf.mxu0 }
 0x1da   : > { %8010 = vmatmul.mubr.bf16.gmra.mxu1 %v8413_v31  ;;  %v8441_v31 = vld [vmem:[#allocation3 + $0x128] sm:$0xff]  }
 0x1db   : > { %8088 = vmatpush3.bf16.msra.mxu1 %v8435_v2  ;;  %8013 = vmatprep.mubr.bf16.mxu1 %v8414_v55  ;;  %v9413_v61 = vpop.f32.mrf.mxu0  ;;  %v8431_v2 = vld [vmem:[#allocation3 + $0x70] sm:$0xff]   ;;  %v8445_v55 = vld [vmem:[#allocation3 + $0xb8] sm:$0xff]  }
 0x1dc   : > { %8089 = vmatprep.subr.bf16.mxu1 %v8440_v27 }
 0x1dd   : > { %v9418_v39 = vpop.f32.mrf.mxu0 }
 0x1de   : > { %7970 = vmatmul.mubr.bf16.gmra.mxu0 %v8415_v54 }
 0x1df   : > { %8090 = vmatpush3.bf16.msra.mxu1 %v8440_v27  ;;  %7973 = vmatprep.mubr.bf16.mxu0 %v8417_v0  ;;  %v9424_v6 = vpop.f32.mrf.mxu0  ;;  %v8438_v27 = vld [vmem:[#allocation3 + $0x80] sm:$0xff]  }
 0x1e0   : > { %8091 = vmatprep.subr.bf16.mxu1 %v8442_v1 }
 0x1e1   : > { %v9434_v54 = vpop.f32.mrf.mxu0 }
 0x1e2   : > { %8014 = vmatmul.mubr.bf16.gmra.mxu1 %v8418_v40  ;;  %v8446_v40 = vld [vmem:[#allocation3 + $0x130] sm:$0xff]  }
 0x1e3   : > { %8092 = vmatpush3.bf16.msra.mxu1 %v8442_v1  ;;  %8017 = vmatprep.mubr.bf16.mxu1 %v8420_v60  ;;  %v8443_v1 = vld [vmem:[#allocation3 + $0xb0] sm:$0xff]   ;;  %v8459_v60 = vld [vmem:[%s10213_s5 + $0x198] sm:$0xff]  }
 0x1e4   : > { %8173 = vmatprep.subr.bf16.mxu1 %v9402_v48 }
 0x1e6   : > { %7974 = vmatmul.mubr.bf16.gmra.mxu0 %v8422_v32 }
 0x1e7   : > { %7977 = vmatprep.mubr.bf16.mxu0 %v8424_v29  ;;  %v8447_v29 = vld [vmem:[#allocation3 + $0x138] sm:$0xff]  }
 0x1ea   : > { %8018 = vmatmul.mubr.bf16.gmra.mxu1 %v8425_v25  ;;  %v8464_v25 = vld [vmem:[%s10213_s5 + $0x190] sm:$0xff]  }
 0x1eb   : > { %8021 = vmatprep.mubr.bf16.mxu1 %v8427_v34 }
 0x1ee   : > { %7978 = vmatmul.mubr.bf16.gmra.mxu0 %v8429_v58 }
 0x1ef   : > { %8045 = vmatprep.mubr.bf16.mxu0 %v8432_v47  ;;  %v8471_v47 = vld [vmem:[%s10213_s5 + $0x188] sm:$0xff]  }
 0x1f1   : > { %v7855_v0 = vpop.f32.mrf.mxu0 }
 0x1f2   : > { %8022 = vmatmul.mubr.bf16.gmra.mxu1 %v8431_v2  ;;  %v9443_v32 = vadd.f32 %v7855_v0, %v522_v4  ;;  %v8452_v2 = vld [vmem:[#allocation3 + $0x148] sm:$0xff]   ;;  %v8456_v0 = vld [vmem:[#allocation3 + $0x150] sm:$0xff]  }
 0x1f3   : > { %8025 = vmatprep.mubr.bf16.mxu1 %v8434_v51  ;;  %v2729_v44 = vpop.f32.mrf.mxu0  ;;  %v8476_v51 = vld [vmem:[%s10213_s5 + $0x1e0] sm:$0xff]  }
 0x1f4   : > { %v9450_v7 = vadd.f32 %v2729_v44, %v514_v33  ;;  %v1651_v44 = vld [vmem:[#allocation2 + $0xd0] sm:$0xf] }
 0x1f5   : > { %v7856_v62 = vpop.f32.mrf.mxu0 }
 0x1f6   : > { %8046 = vmatmul.mubr.bf16.vlgmr.msra.gmra.mxu0 %v8436_v35  ;;  %v9455_v34 = vadd.f32 %v7856_v62, %v525_v37  ;;  %v8453_v35 = vld [vmem:[#allocation3 + $0xd0] sm:$0xff]   ;;  %v1652_v37 = vld [vmem:[#allocation2 + $0xd4] sm:$0x1]  ;;  %v8458_v62 = vld [vmem:[#allocation3 + $0xe0] sm:$0xff]  }
 0x1f7   : > { %8049 = vmatprep.mubr.bf16.mxu0 %v8439_v57  ;;  %8126 = vmatpush3.bf16.msra.mxu0 %v9369_v53  ;;  %v8454_v53 = vld [vmem:[%s10213_s5 + $0x1a0] sm:$0xff]   ;;  %v9461_v58 = vpop.f32.mrf.mxu0  ;;  %v530_v57 = vadd.f32 %v9429_v52, %v9380_v59  ;;  %v8481_v59 = vld [vmem:[%s10213_s5 + $0x1d8] sm:$0xff]  }
 0x1f8   : > { %8127 = vmatprep.subr.bf16.mxu0 %v8444_v28 }
 0x1fa   : > { %8026 = vmatmul.mubr.bf16.gmra.mxu1 %v8438_v27 }
 0x1fb   : > { %8128 = vmatpush3.bf16.msra.mxu0 %v8444_v28  ;;  %8093 = vmatprep.mubr.bf16.mxu1 %v8441_v31 }
 0x1fc   : > { %8129 = vmatprep.subr.bf16.mxu0 %v8449_v46  ;;  %v7859_v28 = vpop.f32.mrf.mxu0 }
 0x1fe   : > { %8050 = vmatmul.mubr.bf16.gmra.mxu0 %v8443_v1  ;;  %v2745_v31 = vpop.f32.mrf.mxu0  ;;  %v1561_v1 = vld [vmem:[#allocation2 + $0xcc] sm:$0xff]  }
 0x1ff   : > { %8053 = vmatprep.mubr.bf16.mxu0 %v8445_v55  ;;  %8130 = vmatpush3.bf16.msra.mxu0 %v8449_v46  ;;  %v8478_v46 = vld [vmem:[%s10213_s5 + $0x180] sm:$0xff]   ;;  %v9483_v55 = vadd.f32 %v2745_v31, %v530_v57  ;;  %1597 = vst [vmem:[#allocation3 + $0x88] sm:$0xff] %v1561_v1  }
 0x200   : > { %8131 = vmatprep.subr.bf16.mxu0 %v8454_v53  ;;  %v7860_v4 = vpop.f32.mrf.mxu0 }
 0x202   : > { %8094 = vmatmul.mubr.bf16.vlgmr.msra.gmra.mxu1 %v8446_v40  ;;  %v9488_v40 = vld [vmem:[%s10213_s5 + $0x238] sm:$0xff]  }
 0x203   : > { %8132 = vmatpush3.bf16.msra.mxu0 %v8454_v53  ;;  %8097 = vmatprep.mubr.bf16.mxu1 %v8447_v29  ;;  %v541_v53 = vadd.f32 %v9389_v63, %v9429_v52  ;;  %v8457_v63 = vld [vmem:[#allocation3 + $0x158] sm:$0xff]   ;;  %v1650_v29 = vld [vmem:[#allocation2 + $0xcc] sm:$0xf] }
 0x204   : > { %8133 = vmatprep.subr.bf16.mxu0 %v8459_v60  ;;  %8174 = vmatpush3.bf16.msra.mxu1 %v9402_v48  ;;  %v538_v48 = vadd.f32 %v9372_v30, %v9429_v52  ;;  %v8455_v30 = vld [vmem:[#allocation3 + $0xd8] sm:$0xff]  }
 0x205   : > { %8175 = vmatprep.subr.bf16.mxu1 %v8469_v50  ;;  %v9490_v33 = vadd.f32 %v7860_v4, %v541_v53 }
 0x206   : > { %8054 = vmatmul.mubr.bf16.gmra.mxu0 %v8448_v41  ;;  %v9476_v27 = vadd.f32 %v7859_v28, %v538_v48  ;;  %v2068_v41 = vshll.u32 %v1650_v29, 16  ;;  %v8460_v48 = vld [vmem:[#allocation3 + $0xe8] sm:$0xff]   ;;  %v8488_v28 = vld [vmem:[%s10213_s5 + $0x1c8] sm:$0xff]  }
 0x207   : > { %8057 = vmatprep.mubr.bf16.mxu0 %v8450_v36  ;;  %8134 = vmatpush3.bf16.msra.mxu0 %v8459_v60  ;;  %v8483_v60 = vld [vmem:[%s10213_s5 + $0x1d0] sm:$0xff]   ;;  %v2074_v36 = vshll.u32 %v1651_v44, 16 }
 0x208   : > { %8135 = vmatprep.subr.bf16.mxu0 %v8464_v25  ;;  %8176 = vmatpush3.bf16.msra.mxu1 %v8469_v50  ;;  %v2065_v50 = vshrl.u32 %v1650_v29, 16  ;;  %v8490_v29 = vld [vmem:[%s10213_s5 + $0x1c0] sm:$0xff]  }
 0x209   : > { %8177 = vmatprep.subr.bf16.mxu1 %v8474_v49 }
 0x20a   : > { %8098 = vmatmul.mubr.bf16.gmra.mxu1 %v8451_v5  ;;  %v2067_v5 = vrot.slane %v2065_v50, 4  ;;  %v8462_v50 = vld [vmem:[#allocation3 + $0x168] sm:$0xff]  }
 0x20b   : > { %8136 = vmatpush3.bf16.msra.mxu0 %v8464_v25  ;;  %8101 = vmatprep.mubr.bf16.mxu1 %v8452_v2  ;;  %v9495_v25 = vpop.f32.mrf.mxu0  ;;  %v2070_v2 = vrot.slane %v2068_v41, 5 }
 0x20c   : > { %8137 = vmatprep.subr.bf16.mxu0 %v8471_v47  ;;  %8178 = vmatpush3.bf16.msra.mxu1 %v8474_v49  ;;  %v2078_v49 = vshrl.u32 %v1651_v44, 16 }
 0x20d   : > { %8179 = vmatprep.subr.bf16.mxu1 %v8476_v51  ;;  %v2071_v57 = vor.u32 %v2070_v2, %v2067_v5  ;;  %v7863_v31 = vpop.f32.mrf.mxu0  ;;  %v8468_v5 = vld [vmem:[#allocation3 + $0x178] sm:$0xff]   ;;  %v8470_v2 = vld [vmem:[#allocation3 + $0x100] sm:$0xff]  }
 0x20e   : > { %8058 = vmatmul.mubr.bf16.gmra.mxu0 %v8453_v35  ;;  %v554_v35 = vadd.f32 %v9397_v38, %v9429_v52 }
 0x20f   : > { %8061 = vmatprep.mubr.bf16.mxu0 %v8455_v30  ;;  %8138 = vmatpush3.bf16.msra.mxu0 %v8471_v47  ;;  %v2084_v47 = vshll.u32 %v1652_v37, 16  ;;  %v546_v30 = vadd.f32 %v9429_v52, %v9405_v8  ;;  %v2072_v53 = vrot.slane %v2071_v57, 4  ;;  %v2761_v38 = vpop.f32.mrf.mxu0  ;;  %v562_v57 = vadd.f32 %v9429_v52, %v9418_v39 }
 0x210   : > { %8139 = vmatprep.subr.bf16.mxu0 %v8478_v46  ;;  %8180 = vmatpush3.bf16.msra.mxu1 %v8476_v51  ;;  %v2076_v51 = vrot.slane %v2074_v36, 5  ;;  %v9505_v1 = vadd.f32 %v7863_v31, %v554_v35  ;;  %v8465_v36 = vld [vmem:[#allocation3 + $0xf8] sm:$0xff]  }
 0x211   : > { %8181 = vmatprep.subr.bf16.mxu1 %v8481_v59  ;;  %v2086_v4 = vrot.slane %v2084_v47, 5  ;;  %v9512_v44 = vadd.f32 %v2761_v38, %v546_v30  ;;  %v7864_v41 = vpop.f32.mrf.mxu0  ;;  %v8466_v47 = vld [vmem:[#allocation3 + $0x170] sm:$0xff]   ;;  %v8473_v38 = vld [vmem:[#allocation3 + $0x180] sm:$0xff]  }
 0x212   : > { %8102 = vmatmul.mubr.bf16.gmra.mxu1 %v8456_v0  ;;  %v8461_v0 = vld [vmem:[#allocation3 + $0x160] sm:$0xff]   ;;  %v2077_v8 = vsel %vm8726_vm2, %v2072_v53, %v2076_v51 }
 0x213   : > { %8140 = vmatpush3.bf16.msra.mxu0 %v8478_v46  ;;  %8105 = vmatprep.mubr.bf16.mxu1 %v8457_v63  ;;  %v2080_v46 = vrot.slane %v2078_v49, 4  ;;  %v557_v63 = vadd.f32 %v9407_v43, %v9429_v52  ;;  %2159 = vst [vmem:[#allocation3 + $0x118] sm:$0xf] %v2077_v8  ;;  %v9520_v49 = vpop.f32.mrf.mxu0  ;;  %v586_v8 = vadd.f32 %v8743_v9, %v9429_v52 }
 0x214   : > { %8221 = vmatprep.subr.bf16.mxu0 %v9488_v40  ;;  %8182 = vmatpush3.bf16.msra.mxu1 %v8481_v59 }
 0x215   : > { %8183 = vmatprep.subr.bf16.mxu1 %v8483_v60  ;;  %v2081_v59 = vor.u32 %v2080_v46, %v2076_v51 }
 0x216   : > { %8062 = vmatmul.mubr.bf16.gmra.mxu0 %v8458_v62  ;;  %v9516_v62 = vadd.f32 %v7864_v41, %v557_v63  ;;  %v7903_v51 = vpop.f32.mrf.mxu1  ;;  %v8475_v63 = vld [vmem:[#allocation3 + $0x188] sm:$0xff]  }
 0x217   : > { %8065 = vmatprep.mubr.bf16.mxu0 %v8460_v48  ;;  %v2082_v37 = vrot.slane %v2081_v59, 4  ;;  %v570_v48 = vadd.f32 %v9413_v61, %v9429_v52  ;;  %v9525_v35 = vadd.f32 %v7903_v51, %v9443_v32  ;;  %v573_v61 = vadd.f32 %v9424_v6, %v9429_v52  ;;  %v8480_v6 = vld [vmem:[#allocation3 + $0x10] sm:$0xff]   ;;  %v2214_v51 = vld [vmem:[#allocation2 + $0xd4] sm:$0x1] }
 0x218   : > { %8184 = vmatpush3.bf16.msra.mxu1 %v8483_v60  ;;  %v8463_v60 = vld [vmem:[#allocation3 + $0xf0] sm:$0xff]   ;;  %v3179_v46 = vpop.f32.mrf.mxu1 }
 0x219   : > { %8185 = vmatprep.subr.bf16.mxu1 %v8488_v28  ;;  %v2087_v43 = vsel %vm8726_vm2, %v2082_v37, %v2086_v4  ;;  %v9532_v31 = vadd.f32 %v3179_v46, %v9450_v7  ;;  %v8477_v7 = vld [vmem:[#allocation3 + $0x110] sm:$0xff]   ;;  %v2396_v46 = vrot.slane %v2214_v51, 5 }
 0x21a   : > { %8106 = vmatmul.mubr.bf16.gmra.mxu1 %v8461_v0  ;;  %2160 = vst [vmem:[#allocation3 + $0x11c] sm:$0xf] %v2087_v43  ;;  %v7904_v59 = vpop.f32.mrf.mxu1 }
 0x21b   : > { %8109 = vmatprep.mubr.bf16.mxu1 %v8462_v50  ;;  %v9539_v32 = vadd.f32 %v7904_v59, %v9455_v34  ;;  %v578_v34 = vadd.f32 %v9429_v52, %v8745_v10  ;;  %v8492_v10 = vld [vmem:[%s10213_s5 + $0x230] sm:$0xff]  }
 0x21c   : > { %8186 = vmatpush3.bf16.msra.mxu1 %v8488_v28  ;;  %v7867_v28 = vpop.f32.mrf.mxu0 }
 0x21d   : > { %8187 = vmatprep.subr.bf16.mxu1 %v8490_v29  ;;  %v9529_v30 = vadd.f32 %v7867_v28, %v570_v48  ;;  %v2213_v48 = vld [vmem:[#allocation2 + $0xd0] sm:$0xf] }
 0x21e   : > { %8066 = vmatmul.mubr.bf16.gmra.mxu0 %v8463_v60  ;;  %v2777_v53 = vpop.f32.mrf.mxu0  ;;  %v589_v60 = vadd.f32 %v8747_v11, %v9429_v52  ;;  %v2393_v11 = vrot.slane %v2213_v48, 5 }
 0x21f   : > { %8069 = vmatprep.mubr.bf16.mxu0 %v8465_v36  ;;  %v9536_v4 = vadd.f32 %v2777_v53, %v562_v57  ;;  %v8479_v36 = vld [vmem:[#allocation3 + $0x190] sm:$0xff]   ;;  %v8487_v53 = vld [vmem:[#allocation3 + $0x20] sm:$0xff]  }
 0x220   : > { %8188 = vmatpush3.bf16.msra.mxu1 %v8490_v29  ;;  %v7868_v0 = vpop.f32.mrf.mxu0 }
 0x221   : > { %v9541_v39 = vadd.f32 %v7868_v0, %v573_v61  ;;  %v602_v61 = vadd.f32 %v8751_v13, %v9429_v52  ;;  %v2395_v0 = vrot.slane %v2393_v11, 4 }
 0x222   : > { %8110 = vmatmul.mubr.bf16.gmra.mxu1 %v8466_v47  ;;  %v9543_v29 = vpop.f32.mrf.mxu0  ;;  %v8482_v47 = vld [vmem:[#allocation3 + $0x198] sm:$0xff]  }
 0x223   : > { %8113 = vmatprep.mubr.bf16.mxu1 %v8468_v5  ;;  %v2397_v13 = vsel %vm9092_vm13, %v2395_v0, %v2396_v46  ;;  %v8496_v0 = vld [vmem:[#allocation3 + $0x38] sm:$0xff]  }
 0x224   : > { %v7871_v37 = vpop.f32.mrf.mxu0  ;;  %2470 = vst [vmem:[#allocation3 + $0x1ac] sm:$0xf] %v2397_v13  ;;  %v8517_v13 = vld [vmem:[%s10213_s5 + $0x208] sm:$0xff]  }
 0x225   : > { %v9549_v50 = vadd.f32 %v7871_v37, %v586_v8  ;;  %v8486_v37 = vld [vmem:[#allocation3 + $0x1a0] sm:$0xff]  }
 0x226   : > { %8070 = vmatmul.mubr.bf16.gmra.mxu0 %v8470_v2  ;;  %v2793_v41 = vpop.f32.mrf.mxu0  ;;  %v2212_v2 = vld [vmem:[#allocation2 + $0xcc] sm:$0xe] }
 0x227   : > { %8073 = vmatprep.mubr.bf16.mxu0 %v8472_v3  ;;  %v9553_v43 = vadd.f32 %v2793_v41, %v578_v34  ;;  %v8484_v3 = vld [vmem:[#allocation3 + $0x18] sm:$0xff]   ;;  %v6936_v57 = vrot.slane %v2212_v2, 9  ;;  %v9578_v34 = vpop.f32.mrf.mxu1 }
 0x228   : > { %v7872_v5 = vpop.f32.mrf.mxu0 }
 0x229   : > { %v9555_v9 = vadd.f32 %v7872_v5, %v589_v60  ;;  %v2394_v59 = vsel %vm9092_vm13, %v6936_v57, %v2393_v11  ;;  %v8493_v5 = vld [vmem:[#allocation3 + $0x30] sm:$0xff]   ;;  %v618_v57 = vadd.f32 %v8759_v17, %v9429_v52  ;;  %v8494_v11 = vld [vmem:[#allocation3 + $0xa8] sm:$0xff]   ;;  %v8498_v17 = vld [vmem:[#allocation3 + $0x40] sm:$0xff]  }
 0x22a   : > { %8114 = vmatmul.mubr.bf16.gmra.mxu1 %v8473_v38  ;;  %v9560_v28 = vpop.f32.mrf.mxu0  ;;  %2469 = vst [vmem:[#allocation3 + $0x1a8] sm:$0xf] %v2394_v59  ;;  %v610_v59 = vadd.f32 %v9429_v52, %v8761_v18 }
 0x22b   : > { %8117 = vmatprep.mubr.bf16.mxu1 %v8475_v63  ;;  %v594_v63 = vadd.f32 %v9429_v52, %v8753_v14  ;;  %v8489_v14 = vld [vmem:[#allocation3 + $0xa0] sm:$0xff]  }
 0x22c   : > { %v7875_v38 = vpop.f32.mrf.mxu0 }
 0x22d   : > { %v9572_v8 = vadd.f32 %v7875_v38, %v602_v61 }
 0x22e   : > { %8074 = vmatmul.mubr.bf16.gmra.mxu0 %v8477_v7  ;;  %v8497_v7 = vld [vmem:[%s10213_s5 + $0x228] sm:$0xff]  }
 0x22f   : > { %8141 = vmatprep.mubr.bf16.mxu0 %v8480_v6  ;;  %v2809_v6 = vpop.f32.mrf.mxu0 }
 0x230   : > { %v9580_v41 = vadd.f32 %v2809_v6, %v594_v63 }
 0x231   : > { %v7876_v60 = vpop.f32.mrf.mxu0 }
 0x232   : > { %8118 = vmatmul.mubr.bf16.gmra.mxu1 %v8479_v36  ;;  %v8491_v36 = vld [vmem:[#allocation3 + $0x28] sm:$0xff]  }
 0x233   : > { %8121 = vmatprep.mubr.bf16.mxu1 %v8482_v47  ;;  %v9590_v48 = vpop.f32.mrf.mxu0 }
 0x235   : > { %v7879_v61 = vpop.f32.mrf.mxu0 }
 0x236   : > { %8142 = vmatmul.mubr.bf16.vlgmr.msra.gmra.mxu0 %v8484_v3  ;;  %v8507_v3 = vld [vmem:[%s10213_s5 + $0x218] sm:$0xff]   ;;  %v9608_v38 = vadd.f32 %v7879_v61, %v618_v57  ;;  %v8506_v61 = vld [vmem:[#allocation3 + $0x58] sm:$0xff]  }
 0x237   : > { %8145 = vmatprep.mubr.bf16.mxu0 %v8487_v53  ;;  %8222 = vmatpush3.bf16.msra.mxu0 %v9488_v40  ;;  %v605_v40 = vadd.f32 %v8755_v15, %v9429_v52  ;;  %v7907_v15 = vpop.f32.mrf.mxu1  ;;  %v8495_v53 = vld [vmem:[#allocation3 + $0xb0] sm:$0xff]   ;;  %v2825_v63 = vpop.f32.mrf.mxu0 }
 0x238   : > { %8223 = vmatprep.subr.bf16.mxu0 %v8492_v10  ;;  %v9588_v2 = vadd.f32 %v7907_v15, %v9476_v27 }
 0x239   : > { %v9585_v47 = vadd.f32 %v7876_v60, %v605_v40  ;;  %v3195_v51 = vpop.f32.mrf.mxu1  ;;  %v7880_v18 = vpop.f32.mrf.mxu0  ;;  %v8499_v40 = vld [vmem:[#allocation3 + $0xb8] sm:$0xff]   ;;  %v8522_v60 = vld [vmem:[%s10213_s5 + $0x200] sm:$0xff]  }
 0x23a   : > { %8122 = vmatmul.mubr.bf16.gmra.mxu1 %v8486_v37  ;;  %v8500_v37 = vld [vmem:[#allocation3 + $0xc0] sm:$0xff]  }
 0x23b   : > { %8224 = vmatpush3.bf16.msra.mxu0 %v8492_v10  ;;  %8189 = vmatprep.mubr.bf16.mxu1 %v8489_v14  ;;  %v9596_v10 = vadd.f32 %v3195_v51, %v9483_v55  ;;  %v7908_v46 = vpop.f32.mrf.mxu1  ;;  %v8512_v55 = vld [vmem:[%s10213_s5 + $0x210] sm:$0xff]   ;;  %v8504_v51 = vld [vmem:[#allocation3 + $0xc8] sm:$0xff]   ;;  %v9630_v57 = vpop.f32.mrf.mxu0 }
 0x23c   : > { %8225 = vmatprep.subr.bf16.mxu0 %v8497_v7  ;;  %v9601_v27 = vadd.f32 %v7908_v46, %v9490_v33  ;;  %v621_v33 = vadd.f32 %v8763_v19, %v9429_v52  ;;  %v8501_v19 = vld [vmem:[#allocation3 + $0x48] sm:$0xff]  }
 0x23d   : > { %v9619_v14 = vpop.f32.mrf.mxu1 }
 0x23e   : > { %8146 = vmatmul.mubr.bf16.gmra.mxu0 %v8491_v36  ;;  %v9617_v6 = vadd.f32 %v7880_v18, %v621_v33  ;;  %v8503_v36 = vld [vmem:[#allocation3 + $0x50] sm:$0xff]   ;;  %v8509_v18 = vld [vmem:[#allocation3 + $0xd8] sm:$0xff]  }
 0x23f   : > { %8149 = vmatprep.mubr.bf16.mxu0 %v8493_v5  ;;  %8226 = vmatpush3.bf16.msra.mxu0 %v8497_v7  ;;  %v9612_v7 = vadd.f32 %v2825_v63, %v610_v59  ;;  %v8508_v59 = vld [vmem:[#allocation3 + $0x60] sm:$0xff]  }
 0x240   : > { %8227 = vmatprep.subr.bf16.mxu0 %v8502_v56 }
 0x242   : > { %8190 = vmatmul.mubr.bf16.vlgmr.msra.gmra.mxu1 %v8494_v11  ;;  %v8505_v11 = vld [vmem:[#allocation3 + $0xd0] sm:$0xff]  }
 0x243   : > { %8228 = vmatpush3.bf16.msra.mxu0 %v8502_v56  ;;  %8193 = vmatprep.mubr.bf16.mxu1 %v8495_v53  ;;  %v7911_v56 = vpop.f32.mrf.mxu1 }
 0x244   : > { %8229 = vmatprep.subr.bf16.mxu0 %v8507_v3  ;;  %v9625_v5 = vadd.f32 %v7911_v56, %v9505_v1  ;;  %v634_v1 = vadd.f32 %v8767_v21, %v9429_v52 }
 0x245   : > { %v3211_v15 = vpop.f32.mrf.mxu1 }
 0x246   : > { %8150 = vmatmul.mubr.bf16.gmra.mxu0 %v8496_v0 }
 0x247   : > { %8153 = vmatprep.mubr.bf16.mxu0 %v8498_v17  ;;  %8230 = vmatpush3.bf16.msra.mxu0 %v8507_v3  ;;  %v9628_v3 = vadd.f32 %v3211_v15, %v9512_v44  ;;  %v7912_v46 = vpop.f32.mrf.mxu1  ;;  %v626_v44 = vadd.f32 %v9429_v52, %v8769_v22  ;;  %v8511_v22 = vld [vmem:[#allocation3 + $0x68] sm:$0xff]  }
 0x248   : > { %8231 = vmatprep.subr.bf16.mxu0 %v8512_v55  ;;  %v9633_v53 = vadd.f32 %v7912_v46, %v9516_v62  ;;  %v637_v62 = vadd.f32 %v8771_v23, %v9429_v52 }
 0x24a   : > { %8194 = vmatmul.mubr.bf16.gmra.mxu1 %v8499_v40  ;;  %v8510_v40 = vld [vmem:[#allocation3 + $0xe0] sm:$0xff]  }
 0x24b   : > { %8232 = vmatpush3.bf16.msra.mxu0 %v8512_v55  ;;  %8197 = vmatprep.mubr.bf16.mxu1 %v8500_v37  ;;  %v7883_v0 = vpop.f32.mrf.mxu0  ;;  %v9639_v55 = vpop.f32.mrf.mxu1 }
 0x24c   : > { %8233 = vmatprep.subr.bf16.mxu0 %v8517_v13  ;;  %v9641_v17 = vadd.f32 %v7883_v0, %v634_v1  ;;  %v8516_v1 = vld [vmem:[#allocation3 + $0x78] sm:$0xff]  }
 0x24d   : > { %v2841_v63 = vpop.f32.mrf.mxu0 }
 0x24e   : > { %8154 = vmatmul.mubr.bf16.gmra.mxu0 %v8501_v19  ;;  %v9645_v33 = vadd.f32 %v2841_v63, %v626_v44 }
 0x24f   : > { %8157 = vmatprep.mubr.bf16.mxu0 %v8503_v36  ;;  %8234 = vmatpush3.bf16.msra.mxu0 %v8517_v13  ;;  %v7884_v21 = vpop.f32.mrf.mxu0  ;;  %v8513_v36 = vld [vmem:[#allocation3 + $0x70] sm:$0xff]  }
 0x250   : > { %8235 = vmatprep.subr.bf16.mxu0 %v8522_v60  ;;  %v7915_v13 = vpop.f32.mrf.mxu1  ;;  %v9647_v37 = vadd.f32 %v7884_v21, %v637_v62  ;;  %v8519_v62 = vld [vmem:[#allocation3 + $0xf8] sm:$0xff]   ;;  %v8520_v21 = vld [vmem:[#allocation3 + $0x100] sm:$0xff]  }
 0x251   : > { %v9650_v19 = vadd.f32 %v7915_v13, %v9529_v30  ;;  %v8515_v30 = vld [vmem:[#allocation3 + $0xf0] sm:$0xff]  }
 0x252   : > { %8198 = vmatmul.mubr.bf16.gmra.mxu1 %v8504_v51 }
 0x253   : > { %8236 = vmatpush3.bf16.msra.mxu0 %v8522_v60  ;;  %8201 = vmatprep.mubr.bf16.mxu1 %v8505_v11  ;;  %v3227_v60 = vpop.f32.mrf.mxu1  ;;  %v8514_v11 = vld [vmem:[#allocation3 + $0xe8] sm:$0xff]  }
 0x254   : > { %v9653_v56 = vadd.f32 %v3227_v60, %v9536_v4  ;;  %v8518_v4 = vld [vmem:[#allocation3 + $0x80] sm:$0xff]  }
 0x255   : > { %v7916_v23 = vpop.f32.mrf.mxu1 }
 0x256   : > { %8158 = vmatmul.mubr.bf16.gmra.mxu0 %v8506_v61  ;;  %v9656_v15 = vadd.f32 %v7916_v23, %v9541_v39 }
 0x257   : > { %8161 = vmatprep.mubr.bf16.mxu0 %v8508_v59  ;;  %v9658_v51 = vpop.f32.mrf.mxu1 }
 0x259   : > { %v7919_v46 = vpop.f32.mrf.mxu1 }
 0x25a   : > { %8202 = vmatmul.mubr.bf16.gmra.mxu1 %v8509_v18  ;;  %v9661_v61 = vadd.f32 %v7919_v46, %v9549_v50  ;;  %v8521_v18 = vld [vmem:[#allocation3 + $0x88] sm:$0xff]  }
 0x25b   : > { %8205 = vmatprep.mubr.bf16.mxu1 %v8510_v40  ;;  %v3243_v59 = vpop.f32.mrf.mxu1  ;;  %v8523_v46 = vld [vmem:[#allocation3 + $0x108] sm:$0xff]  }
 0x25c   : > { %v9664_v0 = vadd.f32 %v3243_v59, %v9553_v43  ;;  %v8524_v43 = vld [vmem:[#allocation3 + $0x130] sm:$0xff]  }
 0x25d   : > { %v7920_v44 = vpop.f32.mrf.mxu1  ;;  %v8525_v59 = vld [vmem:[#allocation3 + $0x110] sm:$0xff]  }
 0x25e   : > { %8162 = vmatmul.mubr.bf16.gmra.mxu0 %v8511_v22  ;;  %v9667_v39 = vadd.f32 %v7920_v44, %v9555_v9  ;;  %v597_v22 = vadd.f32 %v9429_v52, %v8757_v16  ;;  %v8528_v44 = vld [vmem:[#allocation3 + $0x140] sm:$0xff]  }
 0x25f   : > { %8165 = vmatprep.mubr.bf16.mxu0 %v8513_v36  ;;  %v9669_v63 = vpop.f32.mrf.mxu1 }
 0x260   : > { %v2877_v36 = vadd.f32 %v9590_v48, %v597_v22  ;;  %v613_v48 = vadd.f32 %v9429_v52, %v8765_v20 }
 0x261   : > { %v7923_v50 = vpop.f32.mrf.mxu1 }
 0x262   : > { %8206 = vmatmul.mubr.bf16.gmra.mxu1 %v8514_v11  ;;  %v9672_v13 = vadd.f32 %v7923_v50, %v9572_v8 }
 0x263   : > { %8209 = vmatprep.mubr.bf16.mxu1 %v8515_v30  ;;  %v3259_v40 = vpop.f32.mrf.mxu1  ;;  %v2844_v30 = vpop.f32.mrf.mxu0 }
 0x264   : > { %v9677_v60 = vadd.f32 %v3259_v40, %v9580_v41  ;;  %v8526_v41 = vld [vmem:[#allocation3 + $0x138] sm:$0xff]  }
 0x265   : > { %v7924_v9 = vpop.f32.mrf.mxu1 }
 0x266   : > { %8166 = vmatmul.mubr.bf16.gmra.mxu0 %v8516_v1  ;;  %v9681_v23 = vadd.f32 %v7924_v9, %v9585_v47 }
 0x267   : > { %8169 = vmatprep.mubr.bf16.mxu0 %v8518_v4  ;;  %v3262_v8 = vpop.f32.mrf.mxu1 }
 0x268   : > { %v9683_v11 = vadd.f32 %v3262_v8, %v2877_v36 }
 0x26a   : > { %8210 = vmatmul.mubr.bf16.gmra.mxu1 %v8519_v62  ;;  %v7927_v1 = vpop.f32.mrf.mxu1 }
 0x26b   : > { %8213 = vmatprep.mubr.bf16.mxu1 %v8520_v21  ;;  %v9686_v16 = vadd.f32 %v7927_v1, %v9608_v38  ;;  %v2881_v21 = vadd.f32 %v9630_v57, %v613_v48  ;;  %v8529_v1 = vld [vmem:[#allocation3 + $0x148] sm:$0xff]  }
 0x26c   : > { %v3275_v4 = vpop.f32.mrf.mxu1 }
 0x26d   : > { %v9691_v47 = vadd.f32 %v3275_v4, %v9612_v7 }
 0x26e   : > { %8170 = vmatmul.mubr.bf16.gmra.mxu0 %v8521_v18  ;;  %v517_v18 = vadd.f32 %v9429_v52, %v9361_v45  ;;  %v7928_v50 = vpop.f32.mrf.mxu1 }
 0x26f   : > { %8237 = vmatprep.mubr.bf16.mxu0 %v8524_v43  ;;  %v9698_v40 = vadd.f32 %v7928_v50, %v9617_v6  ;;  %v8527_v43 = vld [vmem:[#allocation3 + $0x118] sm:$0xff]  }
 0x270   : > { %v7951_v62 = vpop.f32.mrf.mxu0  ;;  %v2857_v20 = vadd.f32 %v9461_v58, %v517_v18  ;;  %v3278_v7 = vpop.f32.mrf.mxu1 }
 0x271   : > { %v3758_v38 = vadd.f32 %v7951_v62, %v9525_v35  ;;  %v9702_v36 = vadd.f32 %v3278_v7, %v2881_v21  ;;  %v8531_v7 = vld [vmem:[#allocation3 + $0x158] sm:$0xff]  }
 0x272   : > { %8214 = vmatmul.mubr.bf16.gmra.mxu1 %v8523_v46  ;;  %v3629_v22 = vpop.f32.mrf.mxu0  ;;  %v3307_v45 = vadd.f32 %v9578_v34, %v2857_v20  ;;  %v533_v34 = vadd.f32 %v9429_v52, %v9395_v26 }
 0x273   : > { %8217 = vmatprep.mubr.bf16.mxu1 %v8525_v59  ;;  %v3756_v9 = vadd.f32 %v3629_v22, %v9532_v31  ;;  %v629_v31 = vadd.f32 %v9429_v52, %v8773_v24 }
 0x274   : > { %v7952_v8 = vpop.f32.mrf.mxu0  ;;  %v2861_v62 = vadd.f32 %v9495_v25, %v533_v34 }
 0x275   : > { %v3759_v35 = vadd.f32 %v7952_v8, %v9539_v32  ;;  %v2885_v18 = vadd.f32 %v2844_v30, %v629_v31  ;;  %v8532_v30 = vld [vmem:[#allocation3 + $0x160] sm:$0xff]  }
 0x276   : > { %8238 = vmatmul.mubr.bf16.vlgmr.msra.gmra.mxu0 %v8526_v41  ;;  %v3632_v57 = vpop.f32.mrf.mxu0  ;;  %v8530_v41 = vld [vmem:[#allocation3 + $0x150] sm:$0xff]   ;;  %v3311_v26 = vadd.f32 %v9619_v14, %v2861_v62 }
 0x277   : > { %8241 = vmatprep.mubr.bf16.mxu0 %v8528_v44  ;;  %v3757_v59 = vadd.f32 %v3632_v57, %v3307_v45 }
 0x279   : > { %v7931_v46 = vpop.f32.mrf.mxu1 }
 0x27a   : > { %8218 = vmatmul.mubr.bf16.gmra.mxu1 %v8527_v43  ;;  %v9707_v6 = vadd.f32 %v7931_v46, %v9641_v17 }
 0x27b   : > { %v3291_v58 = vpop.f32.mrf.mxu1  ;;  %v7955_v4 = vpop.f32.mrf.mxu0 }
 0x27c   : > { %v9714_v32 = vadd.f32 %v3291_v58, %v9645_v33  ;;  %v3762_v44 = vadd.f32 %v7955_v4, %v9588_v2 }
 0x27d   : > { %v7932_v48 = vpop.f32.mrf.mxu1  ;;  %v3645_v17 = vpop.f32.mrf.mxu0 }
 0x27e   : > { %8242 = vmatmul.mubr.bf16.gmra.mxu0 %v8529_v1  ;;  %v9719_v50 = vadd.f32 %v7932_v48, %v9647_v37  ;;  %v3760_v21 = vadd.f32 %v3645_v17, %v9596_v10  ;;  %v549_v10 = vadd.f32 %v9429_v52, %v9409_v42 }
 0x27f   : > { %8245 = vmatprep.mubr.bf16.mxu0 %v8530_v41  ;;  %v3294_v24 = vpop.f32.mrf.mxu1  ;;  %v7956_v43 = vpop.f32.mrf.mxu0 }
 0x280   : > { %v9723_v22 = vadd.f32 %v3294_v24, %v2885_v18  ;;  %v3763_v33 = vadd.f32 %v7956_v43, %v9601_v27  ;;  %v2865_v1 = vadd.f32 %v9520_v49, %v549_v10  ;;  %v8534_v18 = vld [vmem:[#allocation3 + $0x170] sm:$0xff]   ;;  %v8536_v10 = vld [vmem:[#allocation3 + $0x180] sm:$0xff]  }
 0x281   : > { %v3648_v20 = vpop.f32.mrf.mxu0 }
 0x282   : > { %v7999_v2 = vpop.f32.mrf.mxu1  ;;  %v3761_v25 = vadd.f32 %v3648_v20, %v3311_v26  ;;  %v3315_v31 = vadd.f32 %v9639_v55, %v2865_v1 }
 0x283   : > { %v9726_v8 = vadd.f32 %v7999_v2, %v3758_v38 }
 0x284   : > { %v4080_v45 = vpop.f32.mrf.mxu1 }
 0x285   : > { %v9730_v46 = vadd.f32 %v4080_v45, %v3756_v9 }
 0x286   : > { %v7959_v37 = vpop.f32.mrf.mxu0  ;;  %8246 = vmatmul.mubr.bf16.gmra.mxu0 %v8531_v7  ;;  %v8000_v57 = vpop.f32.mrf.mxu1 }
 0x287   : > { %v3766_v14 = vadd.f32 %v7959_v37, %v9625_v5  ;;  %8249 = vmatprep.mubr.bf16.mxu0 %v8532_v30  ;;  %v9734_v41 = vadd.f32 %v8000_v57, %v3759_v35  ;;  %v8533_v5 = vld [vmem:[#allocation3 + $0x168] sm:$0xff]  }
 0x288   : > { %v3661_v27 = vpop.f32.mrf.mxu0  ;;  %v4083_v58 = vpop.f32.mrf.mxu1 }
 0x289   : > { %v3764_v38 = vadd.f32 %v3661_v27, %v9628_v3  ;;  %v9738_v34 = vadd.f32 %v4083_v58, %v3757_v59  ;;  %v565_v3 = vadd.f32 %v9429_v52, %v9434_v54 }
 0x28a   : > { %v7960_v4 = vpop.f32.mrf.mxu0  ;;  %v8003_v9 = vpop.f32.mrf.mxu1 }
 0x28b   : > { %v3767_v42 = vadd.f32 %v7960_v4, %v9633_v53  ;;  %v9741_v17 = vadd.f32 %v8003_v9, %v3762_v44  ;;  %v2869_v43 = vadd.f32 %v9543_v29, %v565_v3 }
 0x28c   : > { %v3664_v48 = vpop.f32.mrf.mxu0  ;;  %v4096_v49 = vpop.f32.mrf.mxu1 }
 0x28d   : > { %v3765_v62 = vadd.f32 %v3664_v48, %v3315_v31  ;;  %v9745_v24 = vadd.f32 %v4096_v49, %v3760_v21  ;;  %v3319_v7 = vadd.f32 %v9658_v51, %v2869_v43 }
 0x28e   : > { %v7963_v35 = vpop.f32.mrf.mxu0  ;;  %8250 = vmatmul.mubr.bf16.gmra.mxu0 %v8533_v5  ;;  %v8004_v59 = vpop.f32.mrf.mxu1 }
 0x28f   : > { %v3770_v55 = vadd.f32 %v7963_v35, %v9650_v19  ;;  %8253 = vmatprep.mubr.bf16.mxu0 %v8534_v18  ;;  %v9749_v26 = vadd.f32 %v8004_v59, %v3763_v33  ;;  %v8535_v19 = vld [vmem:[#allocation3 + $0x178] sm:$0xff]   ;;  %v8538_v35 = vld [vmem:[#allocation3 + $0x190] sm:$0xff]  }
 0x290   : > { %v3677_v53 = vpop.f32.mrf.mxu0  ;;  %v4099_v2 = vpop.f32.mrf.mxu1 }
 0x291   : > { %v3768_v44 = vadd.f32 %v3677_v53, %v9653_v56  ;;  %v9753_v30 = vadd.f32 %v4099_v2, %v3761_v25  ;;  %v8545_v56 = vld [vmem:[%s10212_s4] ss:$0 sm:$0xff] }
 0x292   : > { %v7964_v20 = vpop.f32.mrf.mxu0  ;;  %v8007_v54 = vpop.f32.mrf.mxu1  ;;  %v581_v51 = vadd.f32 %v8545_v56, %v8749_v12 }
 0x293   : > { %v3771_v52 = vadd.f32 %v7964_v20, %v9656_v15  ;;  %v9756_v45 = vadd.f32 %v8007_v54, %v3766_v14  ;;  %v8539_v54 = vld [vmem:[#allocation3 + $0x198] sm:$0xff]  }
 0x294   : > { %v3680_v21 = vpop.f32.mrf.mxu0  ;;  %v4112_v29 = vpop.f32.mrf.mxu1  ;;  %v2873_v14 = vadd.f32 %v9560_v28, %v581_v51 }
 0x295   : > { %v3769_v37 = vadd.f32 %v3680_v21, %v3319_v7  ;;  %v9762_v25 = vadd.f32 %v4112_v29, %v3764_v38  ;;  %v8540_v21 = vld [vmem:[#allocation3 + $0x1a0] sm:$0xff]  }
 0x296   : > { %v7967_v33 = vpop.f32.mrf.mxu0  ;;  %8254 = vmatmul.mubr.bf16.gmra.mxu0 %v8535_v19  ;;  %v8008_v57 = vpop.f32.mrf.mxu1  ;;  %v3323_v9 = vadd.f32 %v9669_v63, %v2873_v14 }
 0x297   : > { %v3774_v15 = vadd.f32 %v7967_v33, %v9661_v61  ;;  %8257 = vmatprep.mubr.bf16.mxu0 %v8536_v10  ;;  %v9766_v1 = vadd.f32 %v8008_v57, %v3767_v42  ;;  %v8537_v61 = vld [vmem:[#allocation3 + $0x188] sm:$0xff]  }
 0x298   : > { %v3693_v27 = vpop.f32.mrf.mxu0  ;;  %v4115_v4 = vpop.f32.mrf.mxu1 }
 0x299   : > { %v3772_v58 = vadd.f32 %v3693_v27, %v9664_v0  ;;  %v9770_v48 = vadd.f32 %v4115_v4, %v3765_v62 }
 0x29a   : > { %v7968_v31 = vpop.f32.mrf.mxu0  ;;  %v8011_v38 = vpop.f32.mrf.mxu1 }
 0x29b   : > { %v3775_v12 = vadd.f32 %v7968_v31, %v9667_v39  ;;  %v9773_v18 = vadd.f32 %v8011_v38, %v3770_v55 }
 0x29c   : > { %v3696_v5 = vpop.f32.mrf.mxu0  ;;  %v4128_v28 = vpop.f32.mrf.mxu1 }
 0x29d   : > { %v3773_v49 = vadd.f32 %v3696_v5, %v3323_v9  ;;  %v9775_v3 = vadd.f32 %v4128_v28, %v3768_v44 }
 0x29e   : > { %v7971_v42 = vpop.f32.mrf.mxu0  ;;  %8258 = vmatmul.mubr.bf16.gmra.mxu0 %v8537_v61  ;;  %v8012_v63 = vpop.f32.mrf.mxu1 }
 0x29f   : > { %v3778_v0 = vadd.f32 %v7971_v42, %v9672_v13  ;;  %8261 = vmatprep.mubr.bf16.mxu0 %v8538_v35  ;;  %v9778_v59 = vadd.f32 %v8012_v63, %v3771_v52 }
 0x2a0   : > { %v3709_v62 = vpop.f32.mrf.mxu0  ;;  %v4131_v53 = vpop.f32.mrf.mxu1 }
 0x2a1   : > { %v3776_v39 = vadd.f32 %v3709_v62, %v9677_v60  ;;  %v9781_v55 = vadd.f32 %v4131_v53, %v3769_v37 }
 0x2a2   : > { %v7972_v43 = vpop.f32.mrf.mxu0  ;;  %v8015_v20 = vpop.f32.mrf.mxu1 }
 0x2a3   : > { %v3779_v2 = vadd.f32 %v7972_v43, %v9681_v23  ;;  %v9784_v44 = vadd.f32 %v8015_v20, %v3774_v15  ;;  %v8541_v15 = vld [vmem:[#allocation3 + $0x1a8] sm:$0xff]  }
 0x2a4   : > { %v3712_v7 = vpop.f32.mrf.mxu0  ;;  %v4144_v19 = vpop.f32.mrf.mxu1 }
 0x2a5   : > { %v3777_v13 = vadd.f32 %v3712_v7, %v9683_v11  ;;  %v9787_v52 = vadd.f32 %v4144_v19, %v3772_v58 }
 0x2a6   : > { %v7975_v10 = vpop.f32.mrf.mxu0  ;;  %8262 = vmatmul.mubr.bf16.gmra.mxu0 %v8539_v54  ;;  %v8016_v37 = vpop.f32.mrf.mxu1 }
 0x2a7   : > { %v3782_v60 = vadd.f32 %v7975_v10, %v9686_v16  ;;  %8265 = vmatprep.mubr.bf16.mxu0 %v8540_v21  ;;  %v9790_v33 = vadd.f32 %v8016_v37, %v3775_v12 }
 0x2a8   : > { %v3725_v29 = vpop.f32.mrf.mxu0  ;;  %v4147_v56 = vpop.f32.mrf.mxu1 }
 0x2a9   : > { %v3780_v23 = vadd.f32 %v3725_v29, %v9691_v47  ;;  %v9793_v57 = vadd.f32 %v4147_v56, %v3773_v49 }
 0x2aa   : > { %v7976_v51 = vpop.f32.mrf.mxu0  ;;  %v8019_v27 = vpop.f32.mrf.mxu1 }
 0x2ab   : > { %v3783_v11 = vadd.f32 %v7976_v51, %v9698_v40  ;;  %v9796_v58 = vadd.f32 %v8019_v27, %v3778_v0 }
 0x2ac   : > { %v3728_v14 = vpop.f32.mrf.mxu0  ;;  %v4160_v4 = vpop.f32.mrf.mxu1 }
 0x2ad   : > { %v3781_v16 = vadd.f32 %v3728_v14, %v9702_v36  ;;  %v9799_v9 = vadd.f32 %v4160_v4, %v3776_v39 }
 0x2ae   : > { %v7979_v31 = vpop.f32.mrf.mxu0  ;;  %8266 = vmatmul.mubr.bf16.gmra.mxu0 %v8541_v15  ;;  %v8020_v12 = vpop.f32.mrf.mxu1 }
 0x2af   : > { %v3786_v47 = vadd.f32 %v7979_v31, %v9707_v6  ;;  %v9802_v5 = vadd.f32 %v8020_v12, %v3779_v2 }
 0x2b0   : > { %v3741_v38 = vpop.f32.mrf.mxu0  ;;  %v4163_v40 = vpop.f32.mrf.mxu1 }
 0x2b1   : > { %v3784_v61 = vadd.f32 %v3741_v38, %v9714_v32  ;;  %v9805_v35 = vadd.f32 %v4163_v40, %v3777_v13 }
 0x2b2   : > { %v7980_v49 = vpop.f32.mrf.mxu0  ;;  %v8023_v36 = vpop.f32.mrf.mxu1 }
 0x2b3   : > { %v3787_v28 = vadd.f32 %v7980_v49, %v9719_v50  ;;  %v9808_v0 = vadd.f32 %v8023_v36, %v3782_v60 }
 0x2b4   : > { %v3744_v42 = vpop.f32.mrf.mxu0  ;;  %v4176_v62 = vpop.f32.mrf.mxu1 }
 0x2b5   : > { %v3785_v63 = vadd.f32 %v3744_v42, %v9723_v22  ;;  %v9811_v39 = vadd.f32 %v4176_v62, %v3780_v23 }
 0x2b6   : > { %v8047_v6 = vpop.f32.mrf.mxu0  ;;  %v8024_v43 = vpop.f32.mrf.mxu1 }
 0x2b7   : > { %v4660_v53 = vadd.f32 %v8047_v6, %v9726_v8  ;;  %v9814_v2 = vadd.f32 %v8024_v43, %v3783_v11 }
 0x2b8   : > { %v4531_v32 = vpop.f32.mrf.mxu0  ;;  %v4179_v7 = vpop.f32.mrf.mxu1 }
 0x2b9   : > { %v4658_v20 = vadd.f32 %v4531_v32, %v9730_v46  ;;  %v9817_v54 = vadd.f32 %v4179_v7, %v3781_v16 }
 0x2ba   : > { %v8048_v50 = vpop.f32.mrf.mxu0  ;;  %v8027_v22 = vpop.f32.mrf.mxu1 }
 0x2bb   : > { %v9820_v13 = vadd.f32 %v8048_v50, %v9734_v41  ;;  %v9822_v19 = vadd.f32 %v8027_v22, %v3786_v47 }
 0x2bc   : > { %v4534_v21 = vpop.f32.mrf.mxu0  ;;  %v4192_v8 = vpop.f32.mrf.mxu1 }
 0x2bd   : > { %v9825_v10 = vadd.f32 %v4534_v21, %v9738_v34  ;;  %v9827_v37 = vadd.f32 %v4192_v8, %v3784_v61 }
 0x2be   : > { %v8051_v60 = vpop.f32.mrf.mxu0  ;;  %v8028_v29 = vpop.f32.mrf.mxu1 }
 0x2bf   : > { %v4664_v46 = vadd.f32 %v8051_v60, %v9741_v17  ;;  %v9830_v56 = vadd.f32 %v8028_v29, %v3787_v28 }
 0x2c0   : > { %v4547_v23 = vpop.f32.mrf.mxu0  ;;  %v4195_v51 = vpop.f32.mrf.mxu1 }
 0x2c1   : > { %v4662_v41 = vadd.f32 %v4547_v23, %v9745_v24  ;;  %v9833_v11 = vadd.f32 %v4195_v51, %v3785_v63 }
 0x2c2   : > { %v8052_v15 = vpop.f32.mrf.mxu0  ;;  %v8095_v34 = vpop.f32.mrf.mxu1 }
 0x2c3   : > { %v9836_v27 = vadd.f32 %v8052_v15, %v9749_v26  ;;  %v9838_v16 = vadd.f32 %v8095_v34, %v4660_v53 }
 0x2c4   : > { %v4550_v14 = vpop.f32.mrf.mxu0  ;;  %v4982_v17 = vpop.f32.mrf.mxu1 }
 0x2c5   : > { %v9841_v4 = vadd.f32 %v4550_v14, %v9753_v30  ;;  %v9843_v47 = vadd.f32 %v4982_v17, %v4658_v20 }
 0x2c6   : > { %v8055_v31 = vpop.f32.mrf.mxu0  ;;  %v9846_v12 = vpop.f32.mrf.mxu1 }
 0x2c7   : > { %v4668_v24 = vadd.f32 %v8055_v31, %v9756_v45 }
 0x2c8   : > { %v4563_v38 = vpop.f32.mrf.mxu0  ;;  %v9849_v26 = vpop.f32.mrf.mxu1 }
 0x2c9   : > { %v4666_v61 = vadd.f32 %v4563_v38, %v9762_v25 }
 0x2ca   : > { %v8056_v40 = vpop.f32.mrf.mxu0  ;;  %v8099_v28 = vpop.f32.mrf.mxu1 }
 0x2cb   : > { %v9852_v49 = vadd.f32 %v8056_v40, %v9766_v1  ;;  %v9854_v36 = vadd.f32 %v8099_v28, %v4664_v46 }
 0x2cc   : > { %v4566_v30 = vpop.f32.mrf.mxu0  ;;  %v4998_v63 = vpop.f32.mrf.mxu1 }
 0x2cd   : > { %v9857_v42 = vadd.f32 %v4566_v30, %v9770_v48  ;;  %v9859_v62 = vadd.f32 %v4998_v63, %v4662_v41 }
 0x2ce   : > { %v8059_v45 = vpop.f32.mrf.mxu0  ;;  %v9862_v25 = vpop.f32.mrf.mxu1 }
 0x2cf   : > { %v4672_v6 = vadd.f32 %v8059_v45, %v9773_v18 }
 0x2d0   : > { %v4579_v53 = vpop.f32.mrf.mxu0  ;;  %v9865_v1 = vpop.f32.mrf.mxu1 }
 0x2d1   : > { %v4670_v43 = vadd.f32 %v4579_v53, %v9775_v3 }
 0x2d2   : > { %v8060_v32 = vpop.f32.mrf.mxu0  ;;  %v8103_v7 = vpop.f32.mrf.mxu1 }
 0x2d3   : > { %v9868_v20 = vadd.f32 %v8060_v32, %v9778_v59  ;;  %v9870_v50 = vadd.f32 %v8103_v7, %v4668_v24 }
 0x2d4   : > { %v4582_v48 = vpop.f32.mrf.mxu0  ;;  %v5014_v21 = vpop.f32.mrf.mxu1 }
 0x2d5   : > { %v9873_v22 = vadd.f32 %v4582_v48, %v9781_v55  ;;  %v9875_v8 = vadd.f32 %v5014_v21, %v4666_v61 }
 0x2d6   : > { %v8063_v18 = vpop.f32.mrf.mxu0  ;;  %v9878_v3 = vpop.f32.mrf.mxu1 }
 0x2d7   : > { %v4676_v60 = vadd.f32 %v8063_v18, %v9784_v44 }
 0x2d8   : > { %v4595_v46 = vpop.f32.mrf.mxu0  ;;  %v9881_v59 = vpop.f32.mrf.mxu1 }
 0x2d9   : > { %v4674_v29 = vadd.f32 %v4595_v46, %v9787_v52 }
 0x2da   : > { %v8064_v23 = vpop.f32.mrf.mxu0  ;;  %v8107_v51 = vpop.f32.mrf.mxu1 }
 0x2db   : > { %v9884_v41 = vadd.f32 %v8064_v23, %v9790_v33  ;;  %v9886_v15 = vadd.f32 %v8107_v51, %v4672_v6 }
 0x2dc   : > { %v4598_v55 = vpop.f32.mrf.mxu0  ;;  %v5030_v14 = vpop.f32.mrf.mxu1 }
 0x2dd   : > { %v9889_v34 = vadd.f32 %v4598_v55, %v9793_v57  ;;  %v9891_v17 = vadd.f32 %v5030_v14, %v4670_v43 }
 0x2de   : > { %v8067_v44 = vpop.f32.mrf.mxu0  ;;  %v9894_v52 = vpop.f32.mrf.mxu1 }
 0x2df   : > { %10229 = vst [vmem:[#allocation5_spill] sm:$0xff] %v9889_v34  ;;  %v4680_v31 = vadd.f32 %v8067_v44, %v9796_v58 }
 0x2e0   : > { %v4611_v24 = vpop.f32.mrf.mxu0  ;;  %v9897_v33 = vpop.f32.mrf.mxu1 }
 0x2e1   : > { %v4678_v38 = vadd.f32 %v4611_v24, %v9799_v9 }
 0x2e2   : > { %v8068_v61 = vpop.f32.mrf.mxu0  ;;  %v8111_v28 = vpop.f32.mrf.mxu1 }
 0x2e3   : > { %v9900_v40 = vadd.f32 %v8068_v61, %v9802_v5  ;;  %v9902_v30 = vadd.f32 %v8111_v28, %v4676_v60 }
 0x2e4   : > { %v4614_v57 = vpop.f32.mrf.mxu0  ;;  %v5046_v45 = vpop.f32.mrf.mxu1 }
 0x2e5   : > { %10230 = vst [vmem:[#allocation6_spill] sm:$0xff] %v9900_v40  ;;  %v9905_v63 = vadd.f32 %v4614_v57, %v9805_v35  ;;  %v9907_v6 = vadd.f32 %v5046_v45, %v4674_v29 }
 0x2e6   : > { %v8071_v58 = vpop.f32.mrf.mxu0  ;;  %v9910_v9 = vpop.f32.mrf.mxu1 }
 0x2e7   : > { %10231 = vst [vmem:[#allocation7_spill] sm:$0xff] %v9905_v63  ;;  %v4684_v53 = vadd.f32 %v8071_v58, %v9808_v0 }
 0x2e8   : > { %v4627_v43 = vpop.f32.mrf.mxu0  ;;  %v9913_v5 = vpop.f32.mrf.mxu1 }
 0x2e9   : > { %v4682_v32 = vadd.f32 %v4627_v43, %v9811_v39  ;;  %10232 = vst [vmem:[#allocation8_spill] sm:$0xff] %v9913_v5 }
 0x2ea   : > { %v8072_v7 = vpop.f32.mrf.mxu0  ;;  %v8115_v21 = vpop.f32.mrf.mxu1 }
 0x2eb   : > { %v9916_v48 = vadd.f32 %v8072_v7, %v9814_v2  ;;  %v9918_v18 = vadd.f32 %v8115_v21, %v4680_v31 }
 0x2ec   : > { %v4630_v35 = vpop.f32.mrf.mxu0  ;;  %v5062_v46 = vpop.f32.mrf.mxu1 }
 0x2ed   : > { %10233 = vst [vmem:[#allocation9_spill] sm:$0xff] %v9916_v48  ;;  %v9921_v60 = vadd.f32 %v4630_v35, %v9817_v54  ;;  %v9923_v29 = vadd.f32 %v5062_v46, %v4678_v38 }
 0x2ee   : > { %v8075_v0 = vpop.f32.mrf.mxu0  ;;  %v9926_v39 = vpop.f32.mrf.mxu1 }
 0x2ef   : > { %10234 = vst [vmem:[#allocation10_spill] sm:$0xff] %v9921_v60  ;;  %v4688_v23 = vadd.f32 %v8075_v0, %v9822_v19  ;;  %10235 = vst [vmem:[#allocation11_spill] sm:$0xff] %v9926_v39 }
 0x2f0   : > { %v4643_v51 = vpop.f32.mrf.mxu0  ;;  %v9929_v2 = vpop.f32.mrf.mxu1 }
 0x2f1   : > { %v4686_v55 = vadd.f32 %v4643_v51, %v9827_v37  ;;  %10236 = vst [vmem:[#allocation12_spill] sm:$0xff] %v9929_v2 }
 0x2f2   : > { %v8076_v14 = vpop.f32.mrf.mxu0  ;;  %v8119_v31 = vpop.f32.mrf.mxu1 }
 0x2f3   : > { %v9932_v44 = vadd.f32 %v8076_v14, %v9830_v56  ;;  %v5135_v24 = vadd.f32 %v8119_v31, %v4684_v53 }
 0x2f4   : > { %v4646_v54 = vpop.f32.mrf.mxu0  ;;  %v5078_v38 = vpop.f32.mrf.mxu1 }
 0x2f5   : > { %10237 = vst [vmem:[#allocation13_spill] sm:$0xff] %v9932_v44  ;;  %v9935_v61 = vadd.f32 %v4646_v54, %v9833_v11  ;;  %v5133_v19 = vadd.f32 %v5078_v38, %v4682_v32 }
 0x2f6   : > { %v8143_v28 = vpop.f32.mrf.mxu0  ;;  %v9940_v45 = vpop.f32.mrf.mxu1 }
 0x2f7   : > { %10238 = vst [vmem:[#allocation14_spill] sm:$0xff] %v9935_v61  ;;  %v9938_v57 = vadd.f32 %v8143_v28, %v9838_v16  ;;  %10239 = vst [vmem:[#allocation15_spill] sm:$0xff] %v9940_v45 }
 0x2f8   : > { %v5433_v37 = vpop.f32.mrf.mxu0  ;;  %v9945_v56 = vpop.f32.mrf.mxu1 }
 0x2f9   : > { %v9943_v58 = vadd.f32 %v5433_v37, %v9843_v47  ;;  %10240 = vst [vmem:[#allocation16_spill] sm:$0xff] %v9945_v56 }
 0x2fa   : > { %v9947_v43 = vpop.f32.mrf.mxu0  ;;  %v8123_v53 = vpop.f32.mrf.mxu1 }
 0x2fb   : > { %v5139_v11 = vadd.f32 %v8123_v53, %v4688_v23 }
 0x2fc   : > { %v9949_v7 = vpop.f32.mrf.mxu0  ;;  %v5094_v21 = vpop.f32.mrf.mxu1 }
 0x2fd   : > { %v5137_v32 = vadd.f32 %v5094_v21, %v4686_v55 }
 0x2fe   : > { %v8147_v35 = vpop.f32.mrf.mxu0  ;;  %v9954_v46 = vpop.f32.mrf.mxu1 }
 0x2ff   : > { %v9952_v16 = vadd.f32 %v8147_v35, %v9854_v36  ;;  %10241 = vst [vmem:[#allocation17_spill] sm:$0xff] %v9954_v46 }
 0x300   : > { %v5449_v0 = vpop.f32.mrf.mxu0  ;;  %v9959_v51 = vpop.f32.mrf.mxu1 }
 0x301   : > { %v9957_v47 = vadd.f32 %v5449_v0, %v9859_v62  ;;  %10242 = vst [vmem:[#allocation18_spill] sm:$0xff] %v9959_v51 }
 0x302   : > { %v9961_v14 = vpop.f32.mrf.mxu0  ;;  %v8191_v31 = vpop.f32.mrf.mxu1 }
 0x304   : > { %v9963_v54 = vpop.f32.mrf.mxu0  ;;  %v5884_v23 = vpop.f32.mrf.mxu1 }
 0x306   : > { %v8151_v38 = vpop.f32.mrf.mxu0  ;;  %v8192_v36 = vpop.f32.mrf.mxu1 }
 0x307   : > { %v9966_v55 = vadd.f32 %v8151_v38, %v9870_v50 }
 0x308   : > { %v5465_v28 = vpop.f32.mrf.mxu0  ;;  %v5887_v53 = vpop.f32.mrf.mxu1 }
 0x309   : > { %v9969_v37 = vadd.f32 %v5465_v28, %v9875_v8 }
 0x30a   : > { %v9971_v62 = vpop.f32.mrf.mxu0  ;;  %v9973_v21 = vpop.f32.mrf.mxu1 }
 0x30c   : > { %v9975_v35 = vpop.f32.mrf.mxu0  ;;  %v9977_v0 = vpop.f32.mrf.mxu1 }
 0x30e   : > { %v8155_v51 = vpop.f32.mrf.mxu0  ;;  %v9982_v50 = vpop.f32.mrf.mxu1 }
 0x30f   : > { %v9980_v61 = vadd.f32 %v8155_v51, %v9886_v15 }
 0x310   : > { %v5481_v38 = vpop.f32.mrf.mxu0  ;;  %v9987_v8 = vpop.f32.mrf.mxu1 }
 0x311   : > { %v9985_v46 = vadd.f32 %v5481_v38, %v9891_v17 }
 0x312   : > { %v9989_v28 = vpop.f32.mrf.mxu0  ;;  %v9991_v44 = vpop.f32.mrf.mxu1 }
 0x314   : > { %v9993_v56 = vpop.f32.mrf.mxu0  ;;  %v9998_v15 = vpop.f32.mrf.mxu1 }
 0x316   : > { %v8159_v60 = vpop.f32.mrf.mxu0  ;;  %v10005_v38 = vpop.f32.mrf.mxu1 }
 0x317   : > { %v9996_v45 = vadd.f32 %v8159_v60, %v9902_v30 }
 0x318   : > { %v5497_v51 = vpop.f32.mrf.mxu0  ;;  %v10012_v40 = vpop.f32.mrf.mxu1 }
 0x319   : > { %10243 = vst [vmem:[#allocation19_spill] sm:$0xff] %v9996_v45  ;;  %v10001_v48 = vadd.f32 %v5497_v51, %v9907_v6 }
 0x31a   : > { %v10003_v17 = vpop.f32.mrf.mxu0  ;;  %v10019_v6 = vpop.f32.mrf.mxu1 }
 0x31b   : > { %10244 = vst [vmem:[#allocation20_spill] sm:$0xff] %v10001_v48  ;;  %10245 = vst [vmem:[#allocation21_spill] sm:$0xff] %v10003_v17 }
 0x31c   : > { %v10007_v2 = vpop.f32.mrf.mxu0 }
 0x31d   : > { %10246 = vst [vmem:[#allocation22_spill] sm:$0xff] %v10007_v2  ;;  %v10025_v2 = vpop.f32.mrf.mxu1 }
 0x31e   : > { %v8163_v63 = vpop.f32.mrf.mxu0 }
 0x31f   : > { %v10010_v39 = vadd.f32 %v8163_v63, %v9918_v18 }
 0x320   : > { %v5513_v30 = vpop.f32.mrf.mxu0 }
 0x321   : > { %10247 = vst [vmem:[#allocation23_spill] sm:$0xff] %v10010_v39  ;;  %v10015_v60 = vadd.f32 %v5513_v30, %v9923_v29  ;;  %v10031_v39 = vpop.f32.mrf.mxu1 }
 0x322   : > { %v10017_v5 = vpop.f32.mrf.mxu0 }
 0x323   : > { %10248 = vst [vmem:[#allocation24_spill] sm:$0xff] %v10015_v60  ;;  %10249 = vst [vmem:[#allocation25_spill] sm:$0xff] %v10017_v5  ;;  %v10037_v5 = vpop.f32.mrf.mxu1 }
 0x324   : > { %v10021_v51 = vpop.f32.mrf.mxu0 }
 0x325   : > { %10250 = vst [vmem:[#allocation26_spill] sm:$0xff] %v10021_v51 }
 0x326   : > { %v8167_v48 = vpop.f32.mrf.mxu0 }
 0x327   : > { %v10023_v17 = vadd.f32 %v8167_v48, %v5135_v24  ;;  %v10043_v24 = vpop.f32.mrf.mxu1 }
 0x328   : > { %v5529_v34 = vpop.f32.mrf.mxu0 }
 0x329   : > { %v10027_v63 = vadd.f32 %v5529_v34, %v5133_v19  ;;  %v5112_v19 = vadd.f32 %v9846_v12, %v9820_v13 }
 0x32a   : > { %v10029_v18 = vpop.f32.mrf.mxu0 }
 0x32b   : > { %10251 = vst [vmem:[#allocation27_spill] sm:$0xff] %v10027_v63  ;;  %v6013_v63 = vadd.f32 %v8191_v31, %v9938_v57 }
 0x32c   : > { %v10033_v29 = vpop.f32.mrf.mxu0 }
 0x32d   : > { %10252 = vst [vmem:[#allocation28_spill] sm:$0xff] %v10033_v29 }
 0x32e   : > { %v8171_v30 = vpop.f32.mrf.mxu0 }
 0x32f   : > { %v10035_v60 = vadd.f32 %v8171_v30, %v5139_v11  ;;  %v5110_v11 = vadd.f32 %v9849_v26, %v9825_v10  ;;  %v5563_v30 = vadd.f32 %v9947_v43, %v5112_v19 }
 0x330   : > { %v5545_v51 = vpop.f32.mrf.mxu0 }
 0x331   : > { %10253 = vst [vmem:[#allocation29_spill] sm:$0xff] %v10035_v60  ;;  %v10039_v45 = vadd.f32 %v5545_v51, %v5137_v32  ;;  %v6011_v32 = vadd.f32 %v5884_v23, %v9943_v58  ;;  %v5561_v13 = vadd.f32 %v9949_v7, %v5110_v11  ;;  %v6014_v12 = vadd.f32 %v8192_v36, %v5563_v30 }
 0x332   : > { %v10041_v48 = vpop.f32.mrf.mxu0  ;;  %v5116_v58 = vadd.f32 %v9862_v25, %v9836_v27 }
 0x333   : > { %10254 = vst [vmem:[#allocation30_spill] sm:$0xff] %v10039_v45  ;;  %10255 = vst [vmem:[#allocation31_spill] sm:$0xff] %v10041_v48  ;;  %v10054_v45 = vpop.f32.mrf.mxu1  ;;  %v6012_v60 = vadd.f32 %v5887_v53, %v5561_v13  ;;  %v5114_v53 = vadd.f32 %v9865_v1, %v9841_v4 }
 0x334   : > { %v10045_v34 = vpop.f32.mrf.mxu0 }
 0x335   : > { %10256 = vst [vmem:[#allocation32_spill] sm:$0xff] %v10045_v34  ;;  %v10059_v34 = vld [vmem:[%s10214_s6] ss:$0 sm:$0xff]  ;;  %v10065_v43 = vpop.f32.mrf.mxu1 }
 0x336   : > { %v8239_v29 = vpop.f32.mrf.mxu0 }
 0x337   : > { %v6464_v51 = vadd.f32 %v8239_v29, %v6013_v63  ;;  %v6017_v63 = vadd.f32 %v9973_v21, %v9952_v16  ;;  %v6015_v16 = vadd.f32 %v9977_v0, %v9957_v47  ;;  %v10078_v21 = vpop.f32.mrf.mxu1 }
 0x338   : > { %v6335_v48 = vpop.f32.mrf.mxu0 }
 0x339   : > { %v6462_v57 = vadd.f32 %v6335_v48, %v6011_v32  ;;  %v6567_v10 = vadd.f32 %v10059_v34, %v6464_v51  ;;  %v5567_v48 = vadd.f32 %v9961_v14, %v5116_v58  ;;  %v5565_v32 = vadd.f32 %v9963_v54, %v5114_v53 }
 0x33a   : > { %v8240_v31 = vpop.f32.mrf.mxu0 }
 0x33b   : > { %v6465_v26 = vadd.f32 %v8240_v31, %v6014_v12  ;;  %v6565_v29 = vadd.f32 %v10059_v34, %v6462_v57  ;;  %v6599_v11 = vmax.f32 %v6567_v10, 0.0  ;;  %v6018_v1 = vadd.f32 %v9982_v50, %v5567_v48  ;;  %v10093_v10 = vpop.f32.mrf.mxu1 }
 0x33c   : > { %v6338_v23 = vpop.f32.mrf.mxu0  ;;  %v6016_v47 = vadd.f32 %v9987_v8, %v5565_v32  ;;  %v5120_v31 = vadd.f32 %v9878_v3, %v9852_v49  ;;  %v6021_v50 = vadd.f32 %v9991_v44, %v9966_v55  ;;  %v6019_v49 = vadd.f32 %v9998_v15, %v9969_v37 }
 0x33d   : > { %v6568_v7 = vadd.f32 %v10059_v34, %v6465_v26  ;;  %v6463_v36 = vadd.f32 %v6338_v23, %v6012_v60  ;;  %v6597_v14 = vmax.f32 %v6565_v29, 0.0 }
 0x33e   : > { %v8243_v19 = vpop.f32.mrf.mxu0  ;;  %v5571_v29 = vadd.f32 %v9971_v62, %v5120_v31 }
 0x33f   : > { %v6600_v27 = vmax.f32 %v6568_v7, 0.0  ;;  %v6566_v25 = vadd.f32 %v10059_v34, %v6463_v36  ;;  %v6468_v30 = vadd.f32 %v8243_v19, %v6017_v63  ;;  %v5118_v63 = vadd.f32 %v9881_v59, %v9857_v42  ;;  %v10108_v19 = vpop.f32.mrf.mxu1 }
 0x340   : > { %v6351_v4 = vpop.f32.mrf.mxu0  ;;  %v6022_v48 = vadd.f32 %v10005_v38, %v5571_v29 }
 0x341   : > { %v7390_v60 = vpack.c.bf16 %v6600_v27, %v6599_v11  ;;  %v6598_v51 = vmax.f32 %v6566_v25, 0.0  ;;  %v6466_v54 = vadd.f32 %v6351_v4, %v6015_v16  ;;  %v6571_v12 = vadd.f32 %v10059_v34, %v6468_v30  ;;  %v10115_v38 = vpop.f32.mrf.mxu1 }
 0x342   : > { %v8244_v13 = vpop.f32.mrf.mxu0  ;;  %v5569_v53 = vadd.f32 %v9975_v35, %v5118_v63  ;;  %v5124_v35 = vadd.f32 %v9894_v52, %v9868_v20  ;;  %v6025_v4 = vadd.f32 %v10019_v6, %v9980_v61  ;;  %v6023_v20 = vadd.f32 %v10025_v2, %v9985_v46 }
 0x343   : > { %7462 = vst [vmem:[%s10085_s12 + $0x8] sm:$0xff] %v7390_v60   ;;  %v7385_v0 = vpack.c.bf16 %v6598_v51, %v6597_v14  ;;  %v6469_v57 = vadd.f32 %v8244_v13, %v6018_v1  ;;  %v6569_v58 = vadd.f32 %v10059_v34, %v6466_v54  ;;  %v6603_v7 = vmax.f32 %v6571_v12, 0.0  ;;  %v10130_v12 = vpop.f32.mrf.mxu1 }
 0x344   : > { %v6354_v26 = vpop.f32.mrf.mxu0  ;;  %v6020_v15 = vadd.f32 %v10012_v40, %v5569_v53  ;;  %v5122_v60 = vadd.f32 %v9897_v33, %v9873_v22  ;;  %v5575_v51 = vadd.f32 %v9989_v28, %v5124_v35  ;;  %v10261_v53 = vld [vmem:[#allocation20_spill] sm:$0xff] }
 0x345   : > { %7386 = vst [vmem:[%s10085_s12] sm:$0xff] %v7385_v0   ;;  %v6572_v23 = vadd.f32 %v10059_v34, %v6469_v57  ;;  %v6467_v8 = vadd.f32 %v6354_v26, %v6016_v47  ;;  %v6601_v59 = vmax.f32 %v6569_v58, 0.0 }
 0x346   : > { %v8247_v3 = vpop.f32.mrf.mxu0  ;;  %v5573_v47 = vadd.f32 %v9993_v56, %v5122_v60  ;;  %v6026_v0 = vadd.f32 %v10031_v39, %v5575_v51  ;;  %v5128_v56 = vadd.f32 %v9910_v9, %v9884_v41  ;;  %v8215_v39 = vpop.f32.mrf.mxu1  ;;  %v10264_v60 = vld [vmem:[#allocation11_spill] sm:$0xff] }
 0x347   : > { %v6604_v36 = vmax.f32 %v6572_v23, 0.0  ;;  %v6570_v44 = vadd.f32 %v10059_v34, %v6467_v8  ;;  %v6472_v55 = vadd.f32 %v8247_v3, %v6021_v50  ;;  %v10257_v8 = vld [vmem:[#allocation19_spill] sm:$0xff] }
 0x348   : > { %v6367_v42 = vpop.f32.mrf.mxu0  ;;  %v6024_v46 = vadd.f32 %v10037_v5, %v5573_v47  ;;  %v6029_v63 = vadd.f32 %v10043_v24, %v10257_v8  ;;  %v10258_v5 = vld [vmem:[#allocation5_spill] sm:$0xff]  ;;  %v10267_v47 = vld [vmem:[#allocation12_spill] sm:$0xff] }
 0x349   : > { %v7400_v62 = vpack.c.bf16 %v6604_v36, %v6603_v7  ;;  %v6602_v11 = vmax.f32 %v6570_v44, 0.0  ;;  %v6470_v27 = vadd.f32 %v6367_v42, %v6019_v49  ;;  %v6575_v30 = vadd.f32 %v10059_v34, %v6472_v55  ;;  %v10259_v7 = vld [vmem:[#allocation8_spill] sm:$0xff]  ;;  %v10260_v44 = vld [vmem:[#allocation21_spill] sm:$0xff] }
 0x34a   : > { %v8248_v37 = vpop.f32.mrf.mxu0  ;;  %v5126_v36 = vadd.f32 %v10259_v7, %v10258_v5  ;;  %v5579_v55 = vadd.f32 %v10260_v44, %v5128_v56 }
 0x34b   : > { %7464 = vst [vmem:[%s10085_s12 + $0x18] sm:$0xff] %v7400_v62   ;;  %v7395_v25 = vpack.c.bf16 %v6602_v11, %v6601_v59  ;;  %v6473_v32 = vadd.f32 %v8248_v37, %v6022_v48  ;;  %v6573_v1 = vadd.f32 %v10059_v34, %v6470_v27  ;;  %v6607_v54 = vmax.f32 %v6575_v30, 0.0  ;;  %v10262_v62 = vld [vmem:[#allocation22_spill] sm:$0xff]  ;;  %v5980_v37 = vpop.f32.mrf.mxu1 }
 0x34c   : > { %v6370_v16 = vpop.f32.mrf.mxu0  ;;  %v6027_v48 = vadd.f32 %v10054_v45, %v10261_v53  ;;  %v5577_v11 = vadd.f32 %v10262_v62, %v5126_v36  ;;  %v6030_v27 = vadd.f32 %v10065_v43, %v5579_v55  ;;  %v10271_v55 = vld [vmem:[#allocation9_spill] sm:$0xff]  ;;  %v10272_v53 = vld [vmem:[#allocation15_spill] sm:$0xff]  ;;  %v10273_v62 = vld [vmem:[#allocation10_spill] sm:$0xff] }
 0x34d   : > { %7463 = vst [vmem:[%s10085_s12 + $0x10] sm:$0xff] %v7395_v25   ;;  %v6576_v14 = vadd.f32 %v10059_v34, %v6473_v32  ;;  %v6471_v40 = vadd.f32 %v6370_v16, %v6020_v15  ;;  %v6605_v33 = vmax.f32 %v6573_v1, 0.0 }
 0x34e   : > { %v8251_v52 = vpop.f32.mrf.mxu0  ;;  %v6028_v45 = vadd.f32 %v10078_v21, %v5577_v11  ;;  %v10266_v21 = vld [vmem:[#allocation7_spill] sm:$0xff] }
 0x34f   : > { %v6608_v13 = vmax.f32 %v6576_v14, 0.0  ;;  %v6574_v61 = vadd.f32 %v10059_v34, %v6471_v40  ;;  %v6476_v6 = vadd.f32 %v8251_v52, %v6025_v4  ;;  %v10263_v40 = vld [vmem:[#allocation6_spill] sm:$0xff]  ;;  %v10265_v52 = vld [vmem:[#allocation23_spill] sm:$0xff] }
 0x350   : > { %v6383_v22 = vpop.f32.mrf.mxu0  ;;  %v5132_v51 = vadd.f32 %v10264_v60, %v10263_v40 }
 0x351   : > { %v7410_v28 = vpack.c.bf16 %v6608_v13, %v6607_v54  ;;  %v6606_v57 = vmax.f32 %v6574_v61, 0.0  ;;  %v6474_v31 = vadd.f32 %v6383_v22, %v6023_v20  ;;  %v6579_v50 = vadd.f32 %v10059_v34, %v6476_v6  ;;  %v8216_v20 = vpop.f32.mrf.mxu1  ;;  %v10268_v22 = vld [vmem:[#allocation25_spill] sm:$0xff] }
 0x352   : > { %v8252_v2 = vpop.f32.mrf.mxu0  ;;  %v6033_v54 = vadd.f32 %v10093_v10, %v10265_v52 }
 0x353   : > { %7466 = vst [vmem:[%s10085_s12 + $0x28] sm:$0xff] %v7410_v28   ;;  %v7405_v26 = vpack.c.bf16 %v6606_v57, %v6605_v33  ;;  %v6477_v58 = vadd.f32 %v8252_v2, %v6026_v0  ;;  %v6577_v29 = vadd.f32 %v10059_v34, %v6474_v31  ;;  %v6611_v9 = vmax.f32 %v6579_v50, 0.0  ;;  %v10269_v28 = vld [vmem:[#allocation24_spill] sm:$0xff]  ;;  %v10270_v50 = vld [vmem:[#allocation26_spill] sm:$0xff] }
 0x354   : > { %v6386_v23 = vpop.f32.mrf.mxu0  ;;  %v5130_v0 = vadd.f32 %v10267_v47, %v10266_v21  ;;  %v5583_v33 = vadd.f32 %v10268_v22, %v5132_v51  ;;  %v6031_v57 = vadd.f32 %v10108_v19, %v10269_v28 }
 0x355   : > { %7465 = vst [vmem:[%s10085_s12 + $0x20] sm:$0xff] %v7405_v26   ;;  %v6580_v49 = vadd.f32 %v10059_v34, %v6477_v58  ;;  %v6475_v3 = vadd.f32 %v6386_v23, %v6024_v46  ;;  %v6609_v25 = vmax.f32 %v6577_v29, 0.0  ;;  %v5983_v23 = vpop.f32.mrf.mxu1 }
 0x356   : > { %v8255_v41 = vpop.f32.mrf.mxu0  ;;  %v5581_v58 = vadd.f32 %v10270_v50, %v5130_v0  ;;  %v6034_v56 = vadd.f32 %v10115_v38, %v5583_v33  ;;  %v10283_v50 = vld [vmem:[#allocation30_spill] sm:$0xff] }
 0x357   : > { %v6612_v42 = vmax.f32 %v6580_v49, 0.0  ;;  %v6578_v24 = vadd.f32 %v10059_v34, %v6475_v3  ;;  %v6480_v59 = vadd.f32 %v8255_v41, %v6029_v63  ;;  %v8219_v41 = vpop.f32.mrf.mxu1 }
 0x358   : > { %v6399_v15 = vpop.f32.mrf.mxu0  ;;  %v6032_v19 = vadd.f32 %v10130_v12, %v5581_v58  ;;  %v10274_v12 = vld [vmem:[#allocation16_spill] sm:$0xff] }
 0x359   : > { %v7420_v30 = vpack.c.bf16 %v6612_v42, %v6611_v9  ;;  %v6610_v32 = vmax.f32 %v6578_v24, 0.0  ;;  %v6478_v35 = vadd.f32 %v6399_v15, %v6027_v48  ;;  %v6583_v1 = vadd.f32 %v10059_v34, %v6480_v59  ;;  %v10275_v15 = vld [vmem:[#allocation27_spill] sm:$0xff] }
 0x35a   : > { %v8256_v16 = vpop.f32.mrf.mxu0  ;;  %v5136_v48 = vadd.f32 %v10272_v53, %v10271_v55  ;;  %v6037_v9 = vadd.f32 %v8215_v39, %v10023_v17  ;;  %v5134_v11 = vadd.f32 %v10274_v12, %v10273_v62  ;;  %v10276_v39 = vld [vmem:[#allocation28_spill] sm:$0xff] }
 0x35b   : > { %7468 = vst [vmem:[%s10085_s12 + $0x38] sm:$0xff] %v7420_v30   ;;  %v7415_v4 = vpack.c.bf16 %v6610_v32, %v6609_v25  ;;  %v6481_v14 = vadd.f32 %v8256_v16, %v6030_v27  ;;  %v6581_v13 = vadd.f32 %v10059_v34, %v6478_v35  ;;  %v6615_v2 = vmax.f32 %v6583_v1, 0.0  ;;  %v5996_v1 = vpop.f32.mrf.mxu1 }
 0x35c   : > { %v6402_v43 = vpop.f32.mrf.mxu0  ;;  %v5587_v27 = vadd.f32 %v10029_v18, %v5136_v48  ;;  %v6035_v25 = vadd.f32 %v5980_v37, %v10275_v15  ;;  %v6039_v58 = vadd.f32 %v5996_v1, %v10283_v50 }
 0x35d   : > { %7467 = vst [vmem:[%s10085_s12 + $0x30] sm:$0xff] %v7415_v4   ;;  %v6584_v61 = vadd.f32 %v10059_v34, %v6481_v14  ;;  %v6479_v6 = vadd.f32 %v6402_v43, %v6028_v45  ;;  %v6613_v63 = vmax.f32 %v6581_v13, 0.0  ;;  %v5585_v45 = vadd.f32 %v10276_v39, %v5134_v11  ;;  %v8220_v47 = vpop.f32.mrf.mxu1 }
 0x35e   : > { %v8259_v31 = vpop.f32.mrf.mxu0  ;;  %v6038_v4 = vadd.f32 %v8216_v20, %v5587_v27  ;;  %v10279_v20 = vld [vmem:[#allocation29_spill] sm:$0xff] }
 0x35f   : > { %v6616_v46 = vmax.f32 %v6584_v61, 0.0  ;;  %v6582_v10 = vadd.f32 %v10059_v34, %v6479_v6  ;;  %v6484_v26 = vadd.f32 %v8259_v31, %v6033_v54  ;;  %v6036_v52 = vadd.f32 %v5983_v23, %v5585_v45  ;;  %v10277_v61 = vld [vmem:[#allocation13_spill] sm:$0xff]  ;;  %v10280_v31 = vld [vmem:[#allocation14_spill] sm:$0xff] }
 0x360   : > { %v6415_v8 = vpop.f32.mrf.mxu0  ;;  %v10278_v6 = vld [vmem:[#allocation17_spill] sm:$0xff]  ;;  %v6041_v22 = vadd.f32 %v8219_v41, %v10279_v20 }
 0x361   : > { %v7430_v29 = vpack.c.bf16 %v6616_v46, %v6615_v2  ;;  %v6614_v49 = vmax.f32 %v6582_v10, 0.0  ;;  %v6482_v3 = vadd.f32 %v6415_v8, %v6031_v57  ;;  %v6587_v36 = vadd.f32 %v10059_v34, %v6484_v26  ;;  %v10281_v2 = vld [vmem:[#allocation18_spill] sm:$0xff]  ;;  %v10282_v10 = vld [vmem:[#allocation31_spill] sm:$0xff] }
 0x362   : > { %v8260_v5 = vpop.f32.mrf.mxu0  ;;  %v5140_v21 = vadd.f32 %v10278_v6, %v10277_v61  ;;  %v5138_v46 = vadd.f32 %v10281_v2, %v10280_v31 }
 0x363   : > { %7470 = vst [vmem:[%s10085_s12 + $0x48] sm:$0xff] %v7430_v29   ;;  %v7425_v7 = vpack.c.bf16 %v6614_v49, %v6613_v63  ;;  %v6485_v44 = vadd.f32 %v8260_v5, %v6034_v56  ;;  %v6585_v42 = vadd.f32 %v10059_v34, %v6482_v3  ;;  %v6619_v32 = vmax.f32 %v6587_v36, 0.0  ;;  %v10284_v49 = vld [vmem:[#allocation32_spill] sm:$0xff] }
 0x364   : > { %v6418_v38 = vpop.f32.mrf.mxu0  ;;  %v5591_v26 = vadd.f32 %v10282_v10, %v5140_v21  ;;  %v5589_v3 = vadd.f32 %v10284_v49, %v5138_v46 }
 0x365   : > { %7469 = vst [vmem:[%s10085_s12 + $0x40] sm:$0xff] %v7425_v7   ;;  %v6588_v24 = vadd.f32 %v10059_v34, %v6485_v44  ;;  %v6483_v59 = vadd.f32 %v6418_v38, %v6032_v19  ;;  %v6617_v40 = vmax.f32 %v6585_v42, 0.0  ;;  %v5999_v19 = vpop.f32.mrf.mxu1 }
 0x366   : > { %v8263_v30 = vpop.f32.mrf.mxu0  ;;  %v6042_v5 = vadd.f32 %v8220_v47, %v5591_v26  ;;  %v6040_v41 = vadd.f32 %v5999_v19, %v5589_v3 }
 0x367   : > { %v6620_v35 = vmax.f32 %v6588_v24, 0.0  ;;  %v6586_v16 = vadd.f32 %v10059_v34, %v6483_v59  ;;  %v6488_v17 = vadd.f32 %v8263_v30, %v6037_v9 }
 0x368   : > { %v6431_v14 = vpop.f32.mrf.mxu0 }
 0x369   : > { %v7440_v60 = vpack.c.bf16 %v6620_v35, %v6619_v32  ;;  %v6618_v51 = vmax.f32 %v6586_v16, 0.0  ;;  %v6486_v43 = vadd.f32 %v6431_v14, %v6035_v25  ;;  %v6591_v54 = vadd.f32 %v10059_v34, %v6488_v17 }
 0x36a   : > { %v8264_v18 = vpop.f32.mrf.mxu0 }
 0x36b   : > { %7472 = vst [vmem:[%s10085_s12 + $0x58] sm:$0xff] %v7440_v60   ;;  %v7435_v37 = vpack.c.bf16 %v6618_v51, %v6617_v40  ;;  %v6489_v13 = vadd.f32 %v8264_v18, %v6038_v4  ;;  %v6589_v33 = vadd.f32 %v10059_v34, %v6486_v43  ;;  %v6623_v23 = vmax.f32 %v6591_v54, 0.0 }
 0x36c   : > { %v6434_v0 = vpop.f32.mrf.mxu0 }
 0x36d   : > { %7471 = vst [vmem:[%s10085_s12 + $0x50] sm:$0xff] %v7435_v37   ;;  %v6592_v28 = vadd.f32 %v10059_v34, %v6489_v13  ;;  %v6487_v57 = vadd.f32 %v6434_v0, %v6036_v52  ;;  %v6621_v36 = vmax.f32 %v6589_v33, 0.0 }
 0x36e   : > { %v8267_v56 = vpop.f32.mrf.mxu0 }
 0x36f   : > { %v6624_v8 = vmax.f32 %v6592_v28, 0.0  ;;  %v6590_v63 = vadd.f32 %v10059_v34, %v6487_v57  ;;  %v6492_v29 = vadd.f32 %v8267_v56, %v6041_v22 }
 0x370   : > { %v6447_v7 = vpop.f32.mrf.mxu0 }
 0x371   : > { %v7450_v44 = vpack.c.bf16 %v6624_v8, %v6623_v23  ;;  %v6622_v55 = vmax.f32 %v6590_v63, 0.0  ;;  %v6490_v53 = vadd.f32 %v6447_v7, %v6039_v58  ;;  %v6595_v9 = vadd.f32 %v10059_v34, %v6492_v29 }
 0x372   : > { %v8268_v48 = vpop.f32.mrf.mxu0 }
 0x373   : > { %7474 = vst [vmem:[%s10085_s12 + $0x68] sm:$0xff] %v7450_v44   ;;  %v7445_v38 = vpack.c.bf16 %v6622_v55, %v6621_v36  ;;  %v6493_v42 = vadd.f32 %v8268_v48, %v6042_v5  ;;  %v6593_v59 = vadd.f32 %v10059_v34, %v6490_v53  ;;  %v6627_v11 = vmax.f32 %v6595_v9, 0.0 }
 0x374   : > { %v6450_v24 = vpop.f32.mrf.mxu0 }
 0x375   : > { %7473 = vst [vmem:[%s10085_s12 + $0x60] sm:$0xff] %v7445_v38   ;;  %v6596_v62 = vadd.f32 %v10059_v34, %v6493_v42  ;;  %v6491_v12 = vadd.f32 %v6450_v24, %v6040_v41  ;;  %v6625_v25 = vmax.f32 %v6593_v59, 0.0 }
 0x377   : > { %v6628_v27 = vmax.f32 %v6596_v62, 0.0  ;;  %v6594_v15 = vadd.f32 %v10059_v34, %v6491_v12 }
 0x379   : > { %v7460_v30 = vpack.c.bf16 %v6628_v27, %v6627_v11  ;;  %v6626_v32 = vmax.f32 %v6594_v15, 0.0 }
 0x37b   : > { %7476 = vst [vmem:[%s10085_s12 + $0x78] sm:$0xff] %v7460_v30   ;;  %v7455_v35 = vpack.c.bf16 %v6626_v32, %v6625_v25 }
 0x37d   : > { %7475 = vst [vmem:[%s10085_s12 + $0x70] sm:$0xff] %v7455_v35  }
 0x37e PF: > { %s17_s24 = sadd.s32 1, %s8552_s24  }
 0x37f   : > { %p14_p4 = scmp.ge.s32.totalorder %s17_s24, 4  }
 0x381   :  { %16 = sbr.rel (!%p14_p4) target bundleno = 1 (0x1), region = 95 }

</bundles_post_ra>
